<compile_context>
chip_gen: v6e
topology: v6e:2x2x1
jax: 0.10.0
libtpu: 0.0.40
codegen_flags: <defaults>
</compile_context>

<pallas_src>
import jax
import jax.numpy as jnp
from jax import lax
from jax.experimental import pallas as pl
from jax.experimental.pallas import tpu as pltpu


# Keep per-call residency well under v7x's 64 MiB physical VMEM; make the
# scoped limit explicit so v5e's 16 MiB default never bites.
_VMEM_TARGET = 20 * 1024 * 1024
_VMEM_LIMIT = 40 * 1024 * 1024


def _round_up(x, m):
    return (x + m - 1) // m * m


def _mosaic(sems):
    return pltpu.CompilerParams(dimension_semantics=sems,
                                vmem_limit_bytes=_VMEM_LIMIT)


def _choose_tc(T, Bp, per_step_bytes, resident_bytes, row_multiple=8):
    """Largest time-chunk Tc dividing T whose (double-buffered) blocks fit the
    VMEM target; `row_multiple` keeps 2-D (Tc*Bp, N) bf16 blocks tile-legal."""
    budget = _VMEM_TARGET - resident_bytes
    max_tc = max(int(budget // max(per_step_bytes, 1)), 1)
    best = None
    for d in range(1, T + 1):
        if T % d:
            continue
        rows_ok = (d == T) or ((d * Bp) % row_multiple == 0)
        if d <= max_tc and rows_ok:
            best = d
    return best if best is not None else T


# ---------------------------------------------------------------------------
# Kernels
# ---------------------------------------------------------------------------
def _in_proj_kernel(x_ref, w_ref, b_ref, gx_ref):
    # x: (rows, I) f32 ; w: (I, 8Hp) bf16 ; b: (1, 8Hp) f32 -> gx: (rows, 8Hp) bf16
    y = jnp.dot(x_ref[...].astype(jnp.bfloat16), w_ref[...],
                preferred_element_type=jnp.float32) + b_ref[...]
    gx_ref[...] = y.astype(gx_ref.dtype)


def _hid_proj_kernel(hf_ref, hb_ref, wf_ref, wb_ref, b_ref, gx_ref):
    # hf/hb: (rows, Hp) bf16 ; wf/wb: (Hp, 8Hp) bf16 -> gx: (rows, 8Hp) bf16
    y = jnp.dot(hf_ref[...], wf_ref[...], preferred_element_type=jnp.float32)
    y = y + jnp.dot(hb_ref[...], wb_ref[...], preferred_element_type=jnp.float32)
    gx_ref[...] = (y + b_ref[...]).astype(gx_ref.dtype)


def _linear_relu_kernel(hf_ref, hb_ref, wf_ref, wb_ref, b_ref, o_ref):
    # Final projection + ReLU on a lane-dense (rows, Mp) slab, Mp % 128 == 0.
    y = jnp.dot(hf_ref[...], wf_ref[...], preferred_element_type=jnp.float32)
    y = y + jnp.dot(hb_ref[...], wb_ref[...], preferred_element_type=jnp.float32)
    o_ref[...] = jnp.maximum(y + b_ref[...], 0.0).astype(o_ref.dtype)


def _bilstm_recurrence_kernel(gxf_ref, gxb_ref,      # (Tc, Bp, 4Hp) bf16
                              whhf_ref, whhb_ref,    # (Hp, 4Hp) bf16
                              h0_ref, c0_ref,        # (2, Bp, Hp) f32
                              outf_ref, outb_ref,    # (Tc, Bp, Hp) bf16
                              hT_ref,                # (2, Bp, Hp) f32
                              hf_s, cf_s, hb_s, cb_s):  # (Bp, Hp) f32 carries
    i = pl.program_id(0)
    nc = pl.num_programs(0)
    Tc = gxf_ref.shape[0]
    Hp = whhf_ref.shape[0]

    @pl.when(i == 0)
    def _():
        hf_s[...] = h0_ref[0]
        cf_s[...] = c0_ref[0]
        hb_s[...] = h0_ref[1]
        cb_s[...] = c0_ref[1]

    def gates(pre, c):
        # PyTorch gate order: i, f, g, o  (all slices lane-aligned: Hp % 128 == 0)
        ig = jax.nn.sigmoid(pre[:, 0 * Hp:1 * Hp])
        fg = jax.nn.sigmoid(pre[:, 1 * Hp:2 * Hp])
        gg = jnp.tanh(pre[:, 2 * Hp:3 * Hp])
        og = jax.nn.sigmoid(pre[:, 3 * Hp:4 * Hp])
        c_new = fg * c + ig * gg
        h_new = og * jnp.tanh(c_new)
        return h_new, c_new

    def body(j, carry):
        h_f, c_f, h_b, c_b = carry
        jb = Tc - 1 - j
        # Recurrent weights read at the call sites (stay in VMEM, no vreg hoist).
        pre_f = gxf_ref[j] + jnp.dot(h_f.astype(jnp.bfloat16), whhf_ref[...],
                                     preferred_element_type=jnp.float32)
        pre_b = gxb_ref[jb] + jnp.dot(h_b.astype(jnp.bfloat16), whhb_ref[...],
                                      preferred_element_type=jnp.float32)
        h_f, c_f = gates(pre_f, c_f)
        h_b, c_b = gates(pre_b, c_b)
        outf_ref[j] = h_f.astype(outf_ref.dtype)
        outb_ref[jb] = h_b.astype(outb_ref.dtype)
        return (h_f, c_f, h_b, c_b)

    carry0 = (hf_s[...], cf_s[...], hb_s[...], cb_s[...])
    unroll = True if Tc <= 8 else 4
    h_f, c_f, h_b, c_b = lax.fori_loop(0, Tc, body, carry0, unroll=unroll)
    hf_s[...] = h_f
    cf_s[...] = c_f
    hb_s[...] = h_b
    cb_s[...] = c_b

    @pl.when(i == nc - 1)
    def _():
        hT_ref[0] = h_f
        hT_ref[1] = h_b
    # c_T intentionally discarded — the PyTorch forward() discards c_n.


# ---------------------------------------------------------------------------
# Wrappers (each picks its own time-chunk to respect the VMEM budget)
# ---------------------------------------------------------------------------
def _input_projection(x2d, w, b, Bp):
    rows, I = x2d.shape
    T = rows // Bp
    n8 = w.shape[1]
    per_step = 2 * Bp * (I * 4 + n8 * 2)          # double-buffered x + gx / step
    resident = w.size * 2 + b.size * 4
    Tc = _choose_tc(T, Bp, per_step, resident, row_multiple=16)
    nc = T // Tc
    return pl.pallas_call(
        _in_proj_kernel,
        out_shape=jax.ShapeDtypeStruct((rows, n8), jnp.bfloat16),
        grid=(nc,),
        in_specs=[pl.BlockSpec((Tc * Bp, I), lambda i: (i, 0)),
                  pl.BlockSpec(w.shape, lambda i: (0, 0)),
                  pl.BlockSpec(b.shape, lambda i: (0, 0))],
        out_specs=pl.BlockSpec((Tc * Bp, n8), lambda i: (i, 0)),
        compiler_params=_mosaic(("parallel",)),
    )(x2d, w, b)


def _hidden_projection(hf2d, hb2d, wf, wb, b, Bp):
    rows, Hp = hf2d.shape
    T = rows // Bp
    n8 = wf.shape[1]
    per_step = 2 * Bp * (2 * Hp * 2 + n8 * 2)
    resident = (wf.size + wb.size) * 2 + b.size * 4
    Tc = _choose_tc(T, Bp, per_step, resident, row_multiple=16)
    nc = T // Tc
    return pl.pallas_call(
        _hid_proj_kernel,
        out_shape=jax.ShapeDtypeStruct((rows, n8), jnp.bfloat16),
        grid=(nc,),
        in_specs=[pl.BlockSpec((Tc * Bp, Hp), lambda i: (i, 0)),
                  pl.BlockSpec((Tc * Bp, Hp), lambda i: (i, 0)),
                  pl.BlockSpec(wf.shape, lambda i: (0, 0)),
                  pl.BlockSpec(wb.shape, lambda i: (0, 0)),
                  pl.BlockSpec(b.shape, lambda i: (0, 0))],
        out_specs=pl.BlockSpec((Tc * Bp, n8), lambda i: (i, 0)),
        compiler_params=_mosaic(("parallel",)),
    )(hf2d, hb2d, wf, wb, b)


def _linear_relu(hf2d, hb2d, wf, wb, b, Bp):
    rows, Hp = hf2d.shape
    T = rows // Bp
    Mp = wf.shape[1]
    per_step = 2 * Bp * (2 * Hp * 2 + Mp * 4)
    resident = (wf.size + wb.size) * 2 + b.size * 4
    Tc = _choose_tc(T, Bp, per_step, resident, row_multiple=16)
    nc = T // Tc
    return pl.pallas_call(
        _linear_relu_kernel,
        out_shape=jax.ShapeDtypeStruct((rows, Mp), jnp.float32),
        grid=(nc,),
        in_specs=[pl.BlockSpec((Tc * Bp, Hp), lambda i: (i, 0)),
                  pl.BlockSpec((Tc * Bp, Hp), lambda i: (i, 0)),
                  pl.BlockSpec(wf.shape, lambda i: (0, 0)),
                  pl.BlockSpec(wb.shape, lambda i: (0, 0)),
                  pl.BlockSpec(b.shape, lambda i: (0, 0))],
        out_specs=pl.BlockSpec((Tc * Bp, Mp), lambda i: (i, 0)),
        compiler_params=_mosaic(("parallel",)),
    )(hf2d, hb2d, wf, wb, b)


def _bilstm_recurrence(gx3, whh_f, whh_b, h0, c0):
    """Fused fwd/bwd LSTM recurrence streaming gx / outputs in time chunks."""
    T, Bp, n8 = gx3.shape
    Hp = n8 // 8
    per_step = 2 * Bp * (2 * 4 * Hp * 2 + 2 * Hp * 2)   # dbl-buffered gx + out
    resident = ((whh_f.size + whh_b.size) * 2 + (h0.size + c0.size) * 4
                + 2 * Bp * Hp * 4 + 4 * Bp * Hp * 4)    # hT block + carry scratch
    Tc = _choose_tc(T, Bp, per_step, resident, row_multiple=1)
    nc = T // Tc
    # TODO(synk): on v7x, split the fwd/bwd chains across the two TensorCores
    # (leading core-parallel grid axis of size 2) instead of fusing them here.
    out_f, out_b, hT = pl.pallas_call(
        _bilstm_recurrence_kernel,
        out_shape=(jax.ShapeDtypeStruct((T, Bp, Hp), jnp.bfloat16),
                   jax.ShapeDtypeStruct((T, Bp, Hp), jnp.bfloat16),
                   jax.ShapeDtypeStruct((2, Bp, Hp), jnp.float32)),
        grid=(nc,),
        in_specs=[
            pl.BlockSpec((Tc, Bp, 4 * Hp), lambda i: (i, 0, 0)),            # fwd gates
            pl.BlockSpec((Tc, Bp, 4 * Hp), lambda i: (nc - 1 - i, 0, 1)),   # bwd gates
            pl.BlockSpec(whh_f.shape, lambda i: (0, 0)),
            pl.BlockSpec(whh_b.shape, lambda i: (0, 0)),
            pl.BlockSpec(h0.shape, lambda i: (0, 0, 0)),
            pl.BlockSpec(c0.shape, lambda i: (0, 0, 0)),
        ],
        out_specs=(
            pl.BlockSpec((Tc, Bp, Hp), lambda i: (i, 0, 0)),
            pl.BlockSpec((Tc, Bp, Hp), lambda i: (nc - 1 - i, 0, 0)),
            pl.BlockSpec((2, Bp, Hp), lambda i: (0, 0, 0)),
        ),
        scratch_shapes=[pltpu.VMEM((Bp, Hp), jnp.float32)] * 4,
        compiler_params=_mosaic(("arbitrary",)),
    )(gx3, gx3, whh_f, whh_b, h0, c0)
    return out_f, out_b, hT


def _pad_state(s, Bp, Hp):
    d, B, H = s.shape
    return jnp.pad(s, ((0, 0), (0, Bp - B), (0, Hp - H)))


def encoder_forward(params, x, hidden):
    """Equivalent of Encoder.forward(input, hidden)."""
    h0_all, c0_all = hidden                  # (num_layers*2, B, H) each
    B, T, _ = x.shape
    H = params["hidden_size"]
    Hp = params["Hp"]
    L = params["num_layers"]
    Bp = _round_up(B, 8)

    # Layer-0 input: time-major, batch-padded, row-flattened.  Only the raw
    # input features pay this transpose; every later layer boundary stays
    # time-major and moves through free reshapes.
    x_tm = jnp.transpose(x, (1, 0, 2))
    if Bp != B:
        x_tm = jnp.pad(x_tm, ((0, 0), (0, Bp - B), (0, 0)))
    x2d = x_tm.reshape(T * Bp, -1)

    hf2d = hb2d = None
    hTs = []
    for layer in range(L):
        p = params["lstm"][layer]
        h0 = _pad_state(h0_all[2 * layer:2 * layer + 2], Bp, Hp)
        c0 = _pad_state(c0_all[2 * layer:2 * layer + 2], Bp, Hp)
        if layer == 0:
            gx = _input_projection(x2d, p["w_in"], p["b"], Bp)
        else:
            gx = _hidden_projection(hf2d, hb2d, p["w_hf"], p["w_hb"], p["b"], Bp)
        out_f, out_b, hT = _bilstm_recurrence(
            gx.reshape(T, Bp, 8 * Hp), p["whh_f"], p["whh_b"], h0, c0)
        hf2d = out_f.reshape(T * Bp, Hp)
        hb2d = out_b.reshape(T * Bp, Hp)
        hTs.append(hT)

    hidden_t = jnp.concatenate(hTs, axis=0)[:, :B, :H]     # (num_layers*2, B, H)

    y = _linear_relu(hf2d, hb2d, params["out_wf"], params["out_wb"],
                     params["out_b"], Bp)                   # (T*Bp, Mp) f32
    y = y.reshape(T, Bp, -1)[:, :B, :H]
    outputs = jnp.transpose(y, (1, 0, 2))                   # (B, T, H)
    return outputs, hidden_t


# ---------------------------------------------------------------------------
# Deterministic parameter init (PyTorch-style uniform(-1/sqrt(H), 1/sqrt(H))),
# repacked/padded for the kernels (gate-wise H -> Hp padding, Hp % 128 == 0).
# ---------------------------------------------------------------------------
def init_encoder_params(key, input_size, hidden_size, num_layers):
    H = hidden_size
    Hp = _round_up(H, 128)
    k = 1.0 / float(H) ** 0.5

    def uni(key, shape, scale):
        return jax.random.uniform(key, shape, jnp.float32, -scale, scale)

    def pad_gates_cols(w):          # (..., 4H) -> (..., 4Hp), per-gate zero pad
        parts = []
        for g in range(4):
            seg = w[..., g * H:(g + 1) * H]
            pad = [(0, 0)] * (seg.ndim - 1) + [(0, Hp - H)]
            parts.append(jnp.pad(seg, pad))
        return jnp.concatenate(parts, axis=-1)

    def pad_rows(w, rows_to):
        return jnp.pad(w, ((0, rows_to - w.shape[0]), (0, 0)))

    params = {"hidden_size": H, "Hp": Hp, "num_layers": num_layers, "lstm": []}
    for layer in range(num_layers):
        in_sz = input_size if layer == 0 else 2 * H
        keys = jax.random.split(key, 9)
        key = keys[0]
        kf1, kf2, kf3, kf4, kb1, kb2, kb3, kb4 = keys[1:]
        # PyTorch shapes: W_ih (4H, in), W_hh (4H, H), b_ih (4H,), b_hh (4H,)
        w_ih_f = uni(kf1, (4 * H, in_sz), k)
        w_hh_f = uni(kf2, (4 * H, H), k)
        b_f = uni(kf3, (4 * H,), k) + uni(kf4, (4 * H,), k)
        w_ih_b = uni(kb1, (4 * H, in_sz), k)
        w_hh_b = uni(kb2, (4 * H, H), k)
        b_b = uni(kb3, (4 * H,), k) + uni(kb4, (4 * H,), k)

        wihf_t = pad_gates_cols(w_ih_f.T)            # (in, 4Hp)
        wihb_t = pad_gates_cols(w_ih_b.T)            # (in, 4Hp)
        entry = {
            "whh_f": pad_rows(pad_gates_cols(w_hh_f.T), Hp).astype(jnp.bfloat16),
            "whh_b": pad_rows(pad_gates_cols(w_hh_b.T), Hp).astype(jnp.bfloat16),
            "b": jnp.concatenate([pad_gates_cols(b_f),
                                  pad_gates_cols(b_b)]).reshape(1, 8 * Hp),  # f32
        }
        if layer == 0:
            entry["w_in"] = jnp.concatenate([wihf_t, wihb_t],
                                            axis=1).astype(jnp.bfloat16)     # (I, 8Hp)
        else:
            # rows 0:H act on the previous layer's fwd half, H:2H on the bwd half
            entry["w_hf"] = jnp.concatenate(
                [pad_rows(wihf_t[:H], Hp), pad_rows(wihb_t[:H], Hp)],
                axis=1).astype(jnp.bfloat16)                                 # (Hp, 8Hp)
            entry["w_hb"] = jnp.concatenate(
                [pad_rows(wihf_t[H:2 * H], Hp), pad_rows(wihb_t[H:2 * H], Hp)],
                axis=1).astype(jnp.bfloat16)                                 # (Hp, 8Hp)
        params["lstm"].append(entry)

    # self.out = Linear(2H, H).  (self.hidden_out exists but is unused in forward.)
    ko = 1.0 / float(2 * H) ** 0.5
    key, k1, k2 = jax.random.split(key, 3)
    out_w = uni(k1, (H, 2 * H), ko)
    out_b = uni(k2, (H,), ko)
    Mp = Hp
    wt = out_w.T                                           # (2H, H)
    params["out_wf"] = jnp.pad(wt[:H], ((0, Hp - H), (0, Mp - H))).astype(jnp.bfloat16)
    params["out_wb"] = jnp.pad(wt[H:], ((0, Hp - H), (0, Mp - H))).astype(jnp.bfloat16)
    params["out_b"] = jnp.pad(out_b, (0, Mp - H)).reshape(1, Mp)             # f32
    return params


# ---------------------------------------------------------------------------
if __name__ == "__main__":
    input_size = 16
    batch_size = 2
    seq_len = 8
    hidden_size = 32
    num_layers = 1
    is_bidirectional = True   # module's Linear(2H, H) requires bidirectional

    key = jax.random.PRNGKey(0)
    kp, kx = jax.random.split(key)
    params = init_encoder_params(kp, input_size, hidden_size, num_layers)

    x = jax.random.normal(kx, (batch_size, seq_len, input_size), jnp.float32)
    # init_state(): zeros (directions*num_layers, batch, hidden)
    h0 = jnp.zeros((2 * num_layers, batch_size, hidden_size), jnp.float32)
    c0 = jnp.zeros((2 * num_layers, batch_size, hidden_size), jnp.float32)

    fwd = jax.jit(lambda xx, hh0, cc0: encoder_forward(params, xx, (hh0, cc0)))
    outputs, hidden_t = fwd(x, h0, c0)
    jax.block_until_ready((outputs, hidden_t))

    assert outputs.shape == (batch_size, seq_len, hidden_size)
    assert hidden_t.shape == (2 * num_layers, batch_size, hidden_size)
    print("KERNEL_OK")
</pallas_src>

<mosaic_0001>
module attributes {stable_mosaic.version = 11 : i64} {
  func.func @_in_proj_kernel(%arg0: i32, %arg1: memref<64x16xf32, #tpu.memory_space<vmem>>, %arg2: memref<16x1024xbf16, #tpu.memory_space<vmem>>, %arg3: memref<1x1024xf32, #tpu.memory_space<vmem>>, %arg4: memref<64x1024xbf16, #tpu.memory_space<vmem>>) attributes {dimension_semantics = [#tpu.dimension_semantics<parallel>], iteration_bounds = array<i64: 1>, scalar_prefetch = 0 : i64, scratch_operands = 0 : i64, tpu.core_type = #tpu.core_type<tc>, window_params = [{transform_indices = @transform_0, window_bounds = array<i64: 64, 16>}, {pipeline_mode = #tpu.pipeline_mode<synchronous>, transform_indices = @transform_1, window_bounds = array<i64: 16, 1024>}, {pipeline_mode = #tpu.pipeline_mode<synchronous>, transform_indices = @transform_2, window_bounds = array<i64: 1, 1024>}, {transform_indices = @transform_3, window_bounds = array<i64: 64, 1024>}]} {
    %c0 = arith.constant 0 : index
    %c0_0 = arith.constant 0 : index
    %0 = vector.load %arg1[%c0, %c0_0] : memref<64x16xf32, #tpu.memory_space<vmem>>, vector<64x16xf32>
    %1 = arith.truncf %0 : vector<64x16xf32> to vector<64x16xbf16>
    %c0_1 = arith.constant 0 : index
    %c0_2 = arith.constant 0 : index
    %2 = vector.load %arg2[%c0_1, %c0_2] : memref<16x1024xbf16, #tpu.memory_space<vmem>>, vector<16x1024xbf16>
    %cst = arith.constant dense<0.000000e+00> : vector<64x1024xf32>
    %3 = tpu.matmul %1, %2, %cst {dimension_numbers = #tpu.dot_dimension_numbers<[1], [0], [0], [1], [0, 0, 1, 1], [], []>} : vector<64x16xbf16>, vector<16x1024xbf16>, vector<64x1024xf32> -> vector<64x1024xf32>
    %c0_3 = arith.constant 0 : index
    %c0_4 = arith.constant 0 : index
    %4 = vector.load %arg3[%c0_3, %c0_4] : memref<1x1024xf32, #tpu.memory_space<vmem>>, vector<1x1024xf32>
    %5 = vector.broadcast %4 : vector<1x1024xf32> to vector<64x1024xf32>
    %6 = arith.addf %3, %5 : vector<64x1024xf32>
    %7 = arith.truncf %6 : vector<64x1024xf32> to vector<64x1024xbf16>
    %c0_5 = arith.constant 0 : index
    %c0_6 = arith.constant 0 : index
    %8 = vector.load %arg4[%c0_5, %c0_6] : memref<64x1024xbf16, #tpu.memory_space<vmem>>, vector<64x1024xbf16>
    tpu.vector_store %arg4[%c0_5, %c0_6], %7 {strides = array<i32>} : memref<64x1024xbf16, #tpu.memory_space<vmem>>, vector<64x1024xbf16>,
    return
  }
  func.func @transform_0(%arg0: i32) -> (i32, i32) {
    %c0_i32 = arith.constant 0 : i32
    %c0_i32_0 = arith.constant 0 : i32
    return %arg0, %c0_i32 : i32, i32
  }
  func.func @transform_1(%arg0: i32) -> (i32, i32) {
    %c0_i32 = arith.constant 0 : i32
    %c0_i32_0 = arith.constant 0 : i32
    %c0_i32_1 = arith.constant 0 : i32
    return %c0_i32, %c0_i32_0 : i32, i32
  }
  func.func @transform_2(%arg0: i32) -> (i32, i32) {
    %c0_i32 = arith.constant 0 : i32
    %c0_i32_0 = arith.constant 0 : i32
    %c0_i32_1 = arith.constant 0 : i32
    return %c0_i32, %c0_i32_0 : i32, i32
  }
  func.func @transform_3(%arg0: i32) -> (i32, i32) {
    %c0_i32 = arith.constant 0 : i32
    %c0_i32_0 = arith.constant 0 : i32
    return %arg0, %c0_i32 : i32, i32
  }
}

module attributes {stable_mosaic.version = 11 : i64} {
  func.func @_linear_relu_kernel(%arg0: i32, %arg1: memref<64x128xbf16, #tpu.memory_space<vmem>>, %arg2: memref<64x128xbf16, #tpu.memory_space<vmem>>, %arg3: memref<128x128xbf16, #tpu.memory_space<vmem>>, %arg4: memref<128x128xbf16, #tpu.memory_space<vmem>>, %arg5: memref<1x128xf32, #tpu.memory_space<vmem>>, %arg6: memref<64x128xf32, #tpu.memory_space<vmem>>) attributes {dimension_semantics = [#tpu.dimension_semantics<parallel>], iteration_bounds = array<i64: 1>, scalar_prefetch = 0 : i64, scratch_operands = 0 : i64, tpu.core_type = #tpu.core_type<tc>, window_params = [{transform_indices = @transform_0, window_bounds = array<i64: 64, 128>}, {transform_indices = @transform_1, window_bounds = array<i64: 64, 128>}, {pipeline_mode = #tpu.pipeline_mode<synchronous>, transform_indices = @transform_2, window_bounds = array<i64: 128, 128>}, {pipeline_mode = #tpu.pipeline_mode<synchronous>, transform_indices = @transform_3, window_bounds = array<i64: 128, 128>}, {pipeline_mode = #tpu.pipeline_mode<synchronous>, transform_indices = @transform_4, window_bounds = array<i64: 1, 128>}, {transform_indices = @transform_5, window_bounds = array<i64: 64, 128>}]} {
    %c0 = arith.constant 0 : index
    %c0_0 = arith.constant 0 : index
    %0 = vector.load %arg1[%c0, %c0_0] : memref<64x128xbf16, #tpu.memory_space<vmem>>, vector<64x128xbf16>
    %c0_1 = arith.constant 0 : index
    %c0_2 = arith.constant 0 : index
    %1 = vector.load %arg3[%c0_1, %c0_2] : memref<128x128xbf16, #tpu.memory_space<vmem>>, vector<128x128xbf16>
    %cst = arith.constant dense<0.000000e+00> : vector<64x128xf32>
    %2 = tpu.matmul %0, %1, %cst {dimension_numbers = #tpu.dot_dimension_numbers<[1], [0], [0], [1], [0, 0, 1, 1], [], []>} : vector<64x128xbf16>, vector<128x128xbf16>, vector<64x128xf32> -> vector<64x128xf32>
    %c0_3 = arith.constant 0 : index
    %c0_4 = arith.constant 0 : index
    %3 = vector.load %arg2[%c0_3, %c0_4] : memref<64x128xbf16, #tpu.memory_space<vmem>>, vector<64x128xbf16>
    %c0_5 = arith.constant 0 : index
    %c0_6 = arith.constant 0 : index
    %4 = vector.load %arg4[%c0_5, %c0_6] : memref<128x128xbf16, #tpu.memory_space<vmem>>, vector<128x128xbf16>
    %cst_7 = arith.constant dense<0.000000e+00> : vector<64x128xf32>
    %5 = tpu.matmul %3, %4, %cst_7 {dimension_numbers = #tpu.dot_dimension_numbers<[1], [0], [0], [1], [0, 0, 1, 1], [], []>} : vector<64x128xbf16>, vector<128x128xbf16>, vector<64x128xf32> -> vector<64x128xf32>
    %6 = arith.addf %2, %5 : vector<64x128xf32>
    %c0_8 = arith.constant 0 : index
    %c0_9 = arith.constant 0 : index
    %7 = vector.load %arg5[%c0_8, %c0_9] : memref<1x128xf32, #tpu.memory_space<vmem>>, vector<1x128xf32>
    %8 = vector.broadcast %7 : vector<1x128xf32> to vector<64x128xf32>
    %9 = arith.addf %6, %8 : vector<64x128xf32>
    %cst_10 = arith.constant 0.000000e+00 : f32
    %10 = vector.broadcast %cst_10 : f32 to vector<64x128xf32>
    %11 = arith.maximumf %9, %10 : vector<64x128xf32>
    %c0_11 = arith.constant 0 : index
    %c0_12 = arith.constant 0 : index
    %12 = vector.load %arg6[%c0_11, %c0_12] : memref<64x128xf32, #tpu.memory_space<vmem>>, vector<64x128xf32>
    tpu.vector_store %arg6[%c0_11, %c0_12], %11 {strides = array<i32>} : memref<64x128xf32, #tpu.memory_space<vmem>>, vector<64x128xf32>,
    return
  }
  func.func @transform_0(%arg0: i32) -> (i32, i32) {
    %c0_i32 = arith.constant 0 : i32
    %c0_i32_0 = arith.constant 0 : i32
    return %arg0, %c0_i32 : i32, i32
  }
  func.func @transform_1(%arg0: i32) -> (i32, i32) {
    %c0_i32 = arith.constant 0 : i32
    %c0_i32_0 = arith.constant 0 : i32
    return %arg0, %c0_i32 : i32, i32
  }
  func.func @transform_2(%arg0: i32) -> (i32, i32) {
    %c0_i32 = arith.constant 0 : i32
    %c0_i32_0 = arith.constant 0 : i32
    %c0_i32_1 = arith.constant 0 : i32
    return %c0_i32, %c0_i32_0 : i32, i32
  }
  func.func @transform_3(%arg0: i32) -> (i32, i32) {
    %c0_i32 = arith.constant 0 : i32
    %c0_i32_0 = arith.constant 0 : i32
    %c0_i32_1 = arith.constant 0 : i32
    return %c0_i32, %c0_i32_0 : i32, i32
  }
  func.func @transform_4(%arg0: i32) -> (i32, i32) {
    %c0_i32 = arith.constant 0 : i32
    %c0_i32_0 = arith.constant 0 : i32
    %c0_i32_1 = arith.constant 0 : i32
    return %c0_i32, %c0_i32_0 : i32, i32
  }
  func.func @transform_5(%arg0: i32) -> (i32, i32) {
    %c0_i32 = arith.constant 0 : i32
    %c0_i32_0 = arith.constant 0 : i32
    return %arg0, %c0_i32 : i32, i32
  }
}

module attributes {stable_mosaic.version = 11 : i64} {
  func.func @_bilstm_recurrence_kernel(%arg0: i32, %arg1: memref<8x8x512xbf16, #tpu.memory_space<vmem>>, %arg2: memref<8x8x512xbf16, #tpu.memory_space<vmem>>, %arg3: memref<128x512xbf16, #tpu.memory_space<vmem>>, %arg4: memref<128x512xbf16, #tpu.memory_space<vmem>>, %arg5: memref<2x8x128xf32, #tpu.memory_space<vmem>>, %arg6: memref<2x8x128xf32, #tpu.memory_space<vmem>>, %arg7: memref<8x8x128xbf16, #tpu.memory_space<vmem>>, %arg8: memref<8x8x128xbf16, #tpu.memory_space<vmem>>, %arg9: memref<2x8x128xf32, #tpu.memory_space<vmem>>, %arg10: memref<8x128xf32, #tpu.memory_space<vmem>>, %arg11: memref<8x128xf32, #tpu.memory_space<vmem>>, %arg12: memref<8x128xf32, #tpu.memory_space<vmem>>, %arg13: memref<8x128xf32, #tpu.memory_space<vmem>>) attributes {dimension_semantics = [#tpu.dimension_semantics<arbitrary>], iteration_bounds = array<i64: 1>, scalar_prefetch = 0 : i64, scratch_operands = 4 : i64, tpu.core_type = #tpu.core_type<tc>, window_params = [{transform_indices = @transform_0, window_bounds = array<i64: 8, 8, 512>}, {transform_indices = @transform_1, window_bounds = array<i64: 8, 8, 512>}, {pipeline_mode = #tpu.pipeline_mode<synchronous>, transform_indices = @transform_2, window_bounds = array<i64: 128, 512>}, {pipeline_mode = #tpu.pipeline_mode<synchronous>, transform_indices = @transform_3, window_bounds = array<i64: 128, 512>}, {pipeline_mode = #tpu.pipeline_mode<synchronous>, transform_indices = @transform_4, window_bounds = array<i64: 2, 8, 128>}, {pipeline_mode = #tpu.pipeline_mode<synchronous>, transform_indices = @transform_5, window_bounds = array<i64: 2, 8, 128>}, {transform_indices = @transform_6, window_bounds = array<i64: 8, 8, 128>}, {transform_indices = @transform_7, window_bounds = array<i64: 8, 8, 128>}, {pipeline_mode = #tpu.pipeline_mode<synchronous>, transform_indices = @transform_8, window_bounds = array<i64: 2, 8, 128>}]} {
    %c0_i32 = arith.constant 0 : i32
    %0 = arith.cmpi eq, %arg0, %c0_i32 : i32
    %1 = arith.extui %0 : i1 to i32
    %c0_i32_0 = arith.constant 0 : i32
    %2 = arith.cmpi ne, %1, %c0_i32_0 : i32
    scf.if %2 {
      %c0_186 = arith.constant 0 : index
      %c0_187 = arith.constant 0 : index
      %c0_188 = arith.constant 0 : index
      %630 = vector.load %arg5[%c0_186, %c0_187, %c0_188] : memref<2x8x128xf32, #tpu.memory_space<vmem>>, vector<1x8x128xf32>
      %631 = vector.shape_cast %630 : vector<1x8x128xf32> to vector<8x128xf32>
      %c0_189 = arith.constant 0 : index
      %c0_190 = arith.constant 0 : index
      %632 = vector.load %arg10[%c0_189, %c0_190] : memref<8x128xf32, #tpu.memory_space<vmem>>, vector<8x128xf32>
      tpu.vector_store %arg10[%c0_189, %c0_190], %631 {strides = array<i32>} : memref<8x128xf32, #tpu.memory_space<vmem>>, vector<8x128xf32>,
      %c0_191 = arith.constant 0 : index
      %c0_192 = arith.constant 0 : index
      %c0_193 = arith.constant 0 : index
      %633 = vector.load %arg6[%c0_191, %c0_192, %c0_193] : memref<2x8x128xf32, #tpu.memory_space<vmem>>, vector<1x8x128xf32>
      %634 = vector.shape_cast %633 : vector<1x8x128xf32> to vector<8x128xf32>
      %c0_194 = arith.constant 0 : index
      %c0_195 = arith.constant 0 : index
      %635 = vector.load %arg11[%c0_194, %c0_195] : memref<8x128xf32, #tpu.memory_space<vmem>>, vector<8x128xf32>
      tpu.vector_store %arg11[%c0_194, %c0_195], %634 {strides = array<i32>} : memref<8x128xf32, #tpu.memory_space<vmem>>, vector<8x128xf32>,
      %c1 = arith.constant 1 : index
      %c0_196 = arith.constant 0 : index
      %c0_197 = arith.constant 0 : index
      %636 = vector.load %arg5[%c1, %c0_196, %c0_197] : memref<2x8x128xf32, #tpu.memory_space<vmem>>, vector<1x8x128xf32>
      %637 = vector.shape_cast %636 : vector<1x8x128xf32> to vector<8x128xf32>
      %c0_198 = arith.constant 0 : index
      %c0_199 = arith.constant 0 : index
      %638 = vector.load %arg12[%c0_198, %c0_199] : memref<8x128xf32, #tpu.memory_space<vmem>>, vector<8x128xf32>
      tpu.vector_store %arg12[%c0_198, %c0_199], %637 {strides = array<i32>} : memref<8x128xf32, #tpu.memory_space<vmem>>, vector<8x128xf32>,
      %c1_200 = arith.constant 1 : index
      %c0_201 = arith.constant 0 : index
      %c0_202 = arith.constant 0 : index
      %639 = vector.load %arg6[%c1_200, %c0_201, %c0_202] : memref<2x8x128xf32, #tpu.memory_space<vmem>>, vector<1x8x128xf32>
      %640 = vector.shape_cast %639 : vector<1x8x128xf32> to vector<8x128xf32>
      %c0_203 = arith.constant 0 : index
      %c0_204 = arith.constant 0 : index
      %641 = vector.load %arg13[%c0_203, %c0_204] : memref<8x128xf32, #tpu.memory_space<vmem>>, vector<8x128xf32>
      tpu.vector_store %arg13[%c0_203, %c0_204], %640 {strides = array<i32>} : memref<8x128xf32, #tpu.memory_space<vmem>>, vector<8x128xf32>,
    } else {
    }
    %c0 = arith.constant 0 : index
    %c0_1 = arith.constant 0 : index
    %3 = vector.load %arg10[%c0, %c0_1] : memref<8x128xf32, #tpu.memory_space<vmem>>, vector<8x128xf32>
    %c0_2 = arith.constant 0 : index
    %c0_3 = arith.constant 0 : index
    %4 = vector.load %arg11[%c0_2, %c0_3] : memref<8x128xf32, #tpu.memory_space<vmem>>, vector<8x128xf32>
    %c0_4 = arith.constant 0 : index
    %c0_5 = arith.constant 0 : index
    %5 = vector.load %arg12[%c0_4, %c0_5] : memref<8x128xf32, #tpu.memory_space<vmem>>, vector<8x128xf32>
    %c0_6 = arith.constant 0 : index
    %c0_7 = arith.constant 0 : index
    %6 = vector.load %arg13[%c0_6, %c0_7] : memref<8x128xf32, #tpu.memory_space<vmem>>, vector<8x128xf32>
    %c0_i32_8 = arith.constant 0 : i32
    %c7_i32 = arith.constant 7 : i32
    %7 = arith.subi %c7_i32, %c0_i32_8 : i32
    %8 = arith.index_cast %c0_i32_8 : i32 to index
    %c0_9 = arith.constant 0 : index
    %c0_10 = arith.constant 0 : index
    %9 = vector.load %arg1[%8, %c0_9, %c0_10] : memref<8x8x512xbf16, #tpu.memory_space<vmem>>, vector<1x8x512xbf16>
    %10 = vector.shape_cast %9 : vector<1x8x512xbf16> to vector<8x512xbf16>
    %11 = arith.truncf %3 : vector<8x128xf32> to vector<8x128xbf16>
    %c0_11 = arith.constant 0 : index
    %c0_12 = arith.constant 0 : index
    %12 = vector.load %arg3[%c0_11, %c0_12] : memref<128x512xbf16, #tpu.memory_space<vmem>>, vector<128x512xbf16>
    %cst = arith.constant dense<0.000000e+00> : vector<8x512xf32>
    %13 = tpu.matmul %11, %12, %cst {dimension_numbers = #tpu.dot_dimension_numbers<[1], [0], [0], [1], [0, 0, 1, 1], [], []>} : vector<8x128xbf16>, vector<128x512xbf16>, vector<8x512xf32> -> vector<8x512xf32>
    %14 = arith.extf %10 : vector<8x512xbf16> to vector<8x512xf32>
    %15 = arith.addf %14, %13 : vector<8x512xf32>
    %16 = arith.index_cast %7 : i32 to index
    %c0_13 = arith.constant 0 : index
    %c0_14 = arith.constant 0 : index
    %17 = vector.load %arg2[%16, %c0_13, %c0_14] : memref<8x8x512xbf16, #tpu.memory_space<vmem>>, vector<1x8x512xbf16>
    %18 = vector.shape_cast %17 : vector<1x8x512xbf16> to vector<8x512xbf16>
    %19 = arith.truncf %5 : vector<8x128xf32> to vector<8x128xbf16>
    %c0_15 = arith.constant 0 : index
    %c0_16 = arith.constant 0 : index
    %20 = vector.load %arg4[%c0_15, %c0_16] : memref<128x512xbf16, #tpu.memory_space<vmem>>, vector<128x512xbf16>
    %cst_17 = arith.constant dense<0.000000e+00> : vector<8x512xf32>
    %21 = tpu.matmul %19, %20, %cst_17 {dimension_numbers = #tpu.dot_dimension_numbers<[1], [0], [0], [1], [0, 0, 1, 1], [], []>} : vector<8x128xbf16>, vector<128x512xbf16>, vector<8x512xf32> -> vector<8x512xf32>
    %22 = arith.extf %18 : vector<8x512xbf16> to vector<8x512xf32>
    %23 = arith.addf %22, %21 : vector<8x512xf32>
    %24 = vector.extract_strided_slice %15 {offsets = [0, 0], sizes = [8, 128], strides = [1, 1]} : vector<8x512xf32> to vector<8x128xf32>
    %25 = arith.negf %24 : vector<8x128xf32>
    %26 = math.exp %25 : vector<8x128xf32>
    %cst_18 = arith.constant 1.000000e+00 : f32
    %27 = vector.broadcast %cst_18 : f32 to vector<8x128xf32>
    %28 = arith.addf %27, %26 : vector<8x128xf32>
    %29 = arith.divf %27, %28 : vector<8x128xf32>
    %30 = vector.extract_strided_slice %15 {offsets = [0, 128], sizes = [8, 128], strides = [1, 1]} : vector<8x512xf32> to vector<8x128xf32>
    %31 = arith.negf %30 : vector<8x128xf32>
    %32 = math.exp %31 : vector<8x128xf32>
    %cst_19 = arith.constant 1.000000e+00 : f32
    %33 = vector.broadcast %cst_19 : f32 to vector<8x128xf32>
    %34 = arith.addf %33, %32 : vector<8x128xf32>
    %35 = arith.divf %33, %34 : vector<8x128xf32>
    %36 = vector.extract_strided_slice %15 {offsets = [0, 256], sizes = [8, 128], strides = [1, 1]} : vector<8x512xf32> to vector<8x128xf32>
    %37 = math.tanh %36 : vector<8x128xf32>
    %38 = vector.extract_strided_slice %15 {offsets = [0, 384], sizes = [8, 128], strides = [1, 1]} : vector<8x512xf32> to vector<8x128xf32>
    %39 = arith.negf %38 : vector<8x128xf32>
    %40 = math.exp %39 : vector<8x128xf32>
    %cst_20 = arith.constant 1.000000e+00 : f32
    %41 = vector.broadcast %cst_20 : f32 to vector<8x128xf32>
    %42 = arith.addf %41, %40 : vector<8x128xf32>
    %43 = arith.divf %41, %42 : vector<8x128xf32>
    %44 = arith.mulf %35, %4 : vector<8x128xf32>
    %45 = arith.mulf %29, %37 : vector<8x128xf32>
    %46 = arith.addf %44, %45 : vector<8x128xf32>
    %47 = math.tanh %46 : vector<8x128xf32>
    %48 = arith.mulf %43, %47 : vector<8x128xf32>
    %49 = vector.extract_strided_slice %23 {offsets = [0, 0], sizes = [8, 128], strides = [1, 1]} : vector<8x512xf32> to vector<8x128xf32>
    %50 = arith.negf %49 : vector<8x128xf32>
    %51 = math.exp %50 : vector<8x128xf32>
    %cst_21 = arith.constant 1.000000e+00 : f32
    %52 = vector.broadcast %cst_21 : f32 to vector<8x128xf32>
    %53 = arith.addf %52, %51 : vector<8x128xf32>
    %54 = arith.divf %52, %53 : vector<8x128xf32>
    %55 = vector.extract_strided_slice %23 {offsets = [0, 128], sizes = [8, 128], strides = [1, 1]} : vector<8x512xf32> to vector<8x128xf32>
    %56 = arith.negf %55 : vector<8x128xf32>
    %57 = math.exp %56 : vector<8x128xf32>
    %cst_22 = arith.constant 1.000000e+00 : f32
    %58 = vector.broadcast %cst_22 : f32 to vector<8x128xf32>
    %59 = arith.addf %58, %57 : vector<8x128xf32>
    %60 = arith.divf %58, %59 : vector<8x128xf32>
    %61 = vector.extract_strided_slice %23 {offsets = [0, 256], sizes = [8, 128], strides = [1, 1]} : vector<8x512xf32> to vector<8x128xf32>
    %62 = math.tanh %61 : vector<8x128xf32>
    %63 = vector.extract_strided_slice %23 {offsets = [0, 384], sizes = [8, 128], strides = [1, 1]} : vector<8x512xf32> to vector<8x128xf32>
    %64 = arith.negf %63 : vector<8x128xf32>
    %65 = math.exp %64 : vector<8x128xf32>
    %cst_23 = arith.constant 1.000000e+00 : f32
    %66 = vector.broadcast %cst_23 : f32 to vector<8x128xf32>
    %67 = arith.addf %66, %65 : vector<8x128xf32>
    %68 = arith.divf %66, %67 : vector<8x128xf32>
    %69 = arith.mulf %60, %6 : vector<8x128xf32>
    %70 = arith.mulf %54, %62 : vector<8x128xf32>
    %71 = arith.addf %69, %70 : vector<8x128xf32>
    %72 = math.tanh %71 : vector<8x128xf32>
    %73 = arith.mulf %68, %72 : vector<8x128xf32>
    %74 = arith.truncf %48 : vector<8x128xf32> to vector<8x128xbf16>
    %75 = arith.index_cast %c0_i32_8 : i32 to index
    %c0_24 = arith.constant 0 : index
    %c0_25 = arith.constant 0 : index
    %76 = vector.load %arg7[%75, %c0_24, %c0_25] : memref<8x8x128xbf16, #tpu.memory_space<vmem>>, vector<1x8x128xbf16>
    %77 = vector.shape_cast %76 : vector<1x8x128xbf16> to vector<8x128xbf16>
    %78 = vector.shape_cast %74 : vector<8x128xbf16> to vector<1x8x128xbf16>
    tpu.vector_store %arg7[%75, %c0_24, %c0_25], %78 {strides = array<i32>} : memref<8x8x128xbf16, #tpu.memory_space<vmem>>, vector<1x8x128xbf16>,
    %79 = arith.truncf %73 : vector<8x128xf32> to vector<8x128xbf16>
    %80 = arith.index_cast %7 : i32 to index
    %c0_26 = arith.constant 0 : index
    %c0_27 = arith.constant 0 : index
    %81 = vector.load %arg8[%80, %c0_26, %c0_27] : memref<8x8x128xbf16, #tpu.memory_space<vmem>>, vector<1x8x128xbf16>
    %82 = vector.shape_cast %81 : vector<1x8x128xbf16> to vector<8x128xbf16>
    %83 = vector.shape_cast %79 : vector<8x128xbf16> to vector<1x8x128xbf16>
    tpu.vector_store %arg8[%80, %c0_26, %c0_27], %83 {strides = array<i32>} : memref<8x8x128xbf16, #tpu.memory_space<vmem>>, vector<1x8x128xbf16>,
    %c1_i32 = arith.constant 1 : i32
    %c7_i32_28 = arith.constant 7 : i32
    %84 = arith.subi %c7_i32_28, %c1_i32 : i32
    %85 = arith.index_cast %c1_i32 : i32 to index
    %c0_29 = arith.constant 0 : index
    %c0_30 = arith.constant 0 : index
    %86 = vector.load %arg1[%85, %c0_29, %c0_30] : memref<8x8x512xbf16, #tpu.memory_space<vmem>>, vector<1x8x512xbf16>
    %87 = vector.shape_cast %86 : vector<1x8x512xbf16> to vector<8x512xbf16>
    %88 = arith.truncf %48 : vector<8x128xf32> to vector<8x128xbf16>
    %c0_31 = arith.constant 0 : index
    %c0_32 = arith.constant 0 : index
    %89 = vector.load %arg3[%c0_31, %c0_32] : memref<128x512xbf16, #tpu.memory_space<vmem>>, vector<128x512xbf16>
    %cst_33 = arith.constant dense<0.000000e+00> : vector<8x512xf32>
    %90 = tpu.matmul %88, %89, %cst_33 {dimension_numbers = #tpu.dot_dimension_numbers<[1], [0], [0], [1], [0, 0, 1, 1], [], []>} : vector<8x128xbf16>, vector<128x512xbf16>, vector<8x512xf32> -> vector<8x512xf32>
    %91 = arith.extf %87 : vector<8x512xbf16> to vector<8x512xf32>
    %92 = arith.addf %91, %90 : vector<8x512xf32>
    %93 = arith.index_cast %84 : i32 to index
    %c0_34 = arith.constant 0 : index
    %c0_35 = arith.constant 0 : index
    %94 = vector.load %arg2[%93, %c0_34, %c0_35] : memref<8x8x512xbf16, #tpu.memory_space<vmem>>, vector<1x8x512xbf16>
    %95 = vector.shape_cast %94 : vector<1x8x512xbf16> to vector<8x512xbf16>
    %96 = arith.truncf %73 : vector<8x128xf32> to vector<8x128xbf16>
    %c0_36 = arith.constant 0 : index
    %c0_37 = arith.constant 0 : index
    %97 = vector.load %arg4[%c0_36, %c0_37] : memref<128x512xbf16, #tpu.memory_space<vmem>>, vector<128x512xbf16>
    %cst_38 = arith.constant dense<0.000000e+00> : vector<8x512xf32>
    %98 = tpu.matmul %96, %97, %cst_38 {dimension_numbers = #tpu.dot_dimension_numbers<[1], [0], [0], [1], [0, 0, 1, 1], [], []>} : vector<8x128xbf16>, vector<128x512xbf16>, vector<8x512xf32> -> vector<8x512xf32>
    %99 = arith.extf %95 : vector<8x512xbf16> to vector<8x512xf32>
    %100 = arith.addf %99, %98 : vector<8x512xf32>
    %101 = vector.extract_strided_slice %92 {offsets = [0, 0], sizes = [8, 128], strides = [1, 1]} : vector<8x512xf32> to vector<8x128xf32>
    %102 = arith.negf %101 : vector<8x128xf32>
    %103 = math.exp %102 : vector<8x128xf32>
    %cst_39 = arith.constant 1.000000e+00 : f32
    %104 = vector.broadcast %cst_39 : f32 to vector<8x128xf32>
    %105 = arith.addf %104, %103 : vector<8x128xf32>
    %106 = arith.divf %104, %105 : vector<8x128xf32>
    %107 = vector.extract_strided_slice %92 {offsets = [0, 128], sizes = [8, 128], strides = [1, 1]} : vector<8x512xf32> to vector<8x128xf32>
    %108 = arith.negf %107 : vector<8x128xf32>
    %109 = math.exp %108 : vector<8x128xf32>
    %cst_40 = arith.constant 1.000000e+00 : f32
    %110 = vector.broadcast %cst_40 : f32 to vector<8x128xf32>
    %111 = arith.addf %110, %109 : vector<8x128xf32>
    %112 = arith.divf %110, %111 : vector<8x128xf32>
    %113 = vector.extract_strided_slice %92 {offsets = [0, 256], sizes = [8, 128], strides = [1, 1]} : vector<8x512xf32> to vector<8x128xf32>
    %114 = math.tanh %113 : vector<8x128xf32>
    %115 = vector.extract_strided_slice %92 {offsets = [0, 384], sizes = [8, 128], strides = [1, 1]} : vector<8x512xf32> to vector<8x128xf32>
    %116 = arith.negf %115 : vector<8x128xf32>
    %117 = math.exp %116 : vector<8x128xf32>
    %cst_41 = arith.constant 1.000000e+00 : f32
    %118 = vector.broadcast %cst_41 : f32 to vector<8x128xf32>
    %119 = arith.addf %118, %117 : vector<8x128xf32>
    %120 = arith.divf %118, %119 : vector<8x128xf32>
    %121 = arith.mulf %112, %46 : vector<8x128xf32>
    %122 = arith.mulf %106, %114 : vector<8x128xf32>
    %123 = arith.addf %121, %122 : vector<8x128xf32>
    %124 = math.tanh %123 : vector<8x128xf32>
    %125 = arith.mulf %120, %124 : vector<8x128xf32>
    %126 = vector.extract_strided_slice %100 {offsets = [0, 0], sizes = [8, 128], strides = [1, 1]} : vector<8x512xf32> to vector<8x128xf32>
    %127 = arith.negf %126 : vector<8x128xf32>
    %128 = math.exp %127 : vector<8x128xf32>
    %cst_42 = arith.constant 1.000000e+00 : f32
    %129 = vector.broadcast %cst_42 : f32 to vector<8x128xf32>
    %130 = arith.addf %129, %128 : vector<8x128xf32>
    %131 = arith.divf %129, %130 : vector<8x128xf32>
    %132 = vector.extract_strided_slice %100 {offsets = [0, 128], sizes = [8, 128], strides = [1, 1]} : vector<8x512xf32> to vector<8x128xf32>
    %133 = arith.negf %132 : vector<8x128xf32>
    %134 = math.exp %133 : vector<8x128xf32>
    %cst_43 = arith.constant 1.000000e+00 : f32
    %135 = vector.broadcast %cst_43 : f32 to vector<8x128xf32>
    %136 = arith.addf %135, %134 : vector<8x128xf32>
    %137 = arith.divf %135, %136 : vector<8x128xf32>
    %138 = vector.extract_strided_slice %100 {offsets = [0, 256], sizes = [8, 128], strides = [1, 1]} : vector<8x512xf32> to vector<8x128xf32>
    %139 = math.tanh %138 : vector<8x128xf32>
    %140 = vector.extract_strided_slice %100 {offsets = [0, 384], sizes = [8, 128], strides = [1, 1]} : vector<8x512xf32> to vector<8x128xf32>
    %141 = arith.negf %140 : vector<8x128xf32>
    %142 = math.exp %141 : vector<8x128xf32>
    %cst_44 = arith.constant 1.000000e+00 : f32
    %143 = vector.broadcast %cst_44 : f32 to vector<8x128xf32>
    %144 = arith.addf %143, %142 : vector<8x128xf32>
    %145 = arith.divf %143, %144 : vector<8x128xf32>
    %146 = arith.mulf %137, %71 : vector<8x128xf32>
    %147 = arith.mulf %131, %139 : vector<8x128xf32>
    %148 = arith.addf %146, %147 : vector<8x128xf32>
    %149 = math.tanh %148 : vector<8x128xf32>
    %150 = arith.mulf %145, %149 : vector<8x128xf32>
    %151 = arith.truncf %125 : vector<8x128xf32> to vector<8x128xbf16>
    %152 = arith.index_cast %c1_i32 : i32 to index
    %c0_45 = arith.constant 0 : index
    %c0_46 = arith.constant 0 : index
    %153 = vector.load %arg7[%152, %c0_45, %c0_46] : memref<8x8x128xbf16, #tpu.memory_space<vmem>>, vector<1x8x128xbf16>
    %154 = vector.shape_cast %153 : vector<1x8x128xbf16> to vector<8x128xbf16>
    %155 = vector.shape_cast %151 : vector<8x128xbf16> to vector<1x8x128xbf16>
    tpu.vector_store %arg7[%152, %c0_45, %c0_46], %155 {strides = array<i32>} : memref<8x8x128xbf16, #tpu.memory_space<vmem>>, vector<1x8x128xbf16>,
    %156 = arith.truncf %150 : vector<8x128xf32> to vector<8x128xbf16>
    %157 = arith.index_cast %84 : i32 to index
    %c0_47 = arith.constant 0 : index
    %c0_48 = arith.constant 0 : index
    %158 = vector.load %arg8[%157, %c0_47, %c0_48] : memref<8x8x128xbf16, #tpu.memory_space<vmem>>, vector<1x8x128xbf16>
    %159 = vector.shape_cast %158 : vector<1x8x128xbf16> to vector<8x128xbf16>
    %160 = vector.shape_cast %156 : vector<8x128xbf16> to vector<1x8x128xbf16>
    tpu.vector_store %arg8[%157, %c0_47, %c0_48], %160 {strides = array<i32>} : memref<8x8x128xbf16, #tpu.memory_space<vmem>>, vector<1x8x128xbf16>,
    %c2_i32 = arith.constant 2 : i32
    %c7_i32_49 = arith.constant 7 : i32
    %161 = arith.subi %c7_i32_49, %c2_i32 : i32
    %162 = arith.index_cast %c2_i32 : i32 to index
    %c0_50 = arith.constant 0 : index
    %c0_51 = arith.constant 0 : index
    %163 = vector.load %arg1[%162, %c0_50, %c0_51] : memref<8x8x512xbf16, #tpu.memory_space<vmem>>, vector<1x8x512xbf16>
    %164 = vector.shape_cast %163 : vector<1x8x512xbf16> to vector<8x512xbf16>
    %165 = arith.truncf %125 : vector<8x128xf32> to vector<8x128xbf16>
    %c0_52 = arith.constant 0 : index
    %c0_53 = arith.constant 0 : index
    %166 = vector.load %arg3[%c0_52, %c0_53] : memref<128x512xbf16, #tpu.memory_space<vmem>>, vector<128x512xbf16>
    %cst_54 = arith.constant dense<0.000000e+00> : vector<8x512xf32>
    %167 = tpu.matmul %165, %166, %cst_54 {dimension_numbers = #tpu.dot_dimension_numbers<[1], [0], [0], [1], [0, 0, 1, 1], [], []>} : vector<8x128xbf16>, vector<128x512xbf16>, vector<8x512xf32> -> vector<8x512xf32>
    %168 = arith.extf %164 : vector<8x512xbf16> to vector<8x512xf32>
    %169 = arith.addf %168, %167 : vector<8x512xf32>
    %170 = arith.index_cast %161 : i32 to index
    %c0_55 = arith.constant 0 : index
    %c0_56 = arith.constant 0 : index
    %171 = vector.load %arg2[%170, %c0_55, %c0_56] : memref<8x8x512xbf16, #tpu.memory_space<vmem>>, vector<1x8x512xbf16>
    %172 = vector.shape_cast %171 : vector<1x8x512xbf16> to vector<8x512xbf16>
    %173 = arith.truncf %150 : vector<8x128xf32> to vector<8x128xbf16>
    %c0_57 = arith.constant 0 : index
    %c0_58 = arith.constant 0 : index
    %174 = vector.load %arg4[%c0_57, %c0_58] : memref<128x512xbf16, #tpu.memory_space<vmem>>, vector<128x512xbf16>
    %cst_59 = arith.constant dense<0.000000e+00> : vector<8x512xf32>
    %175 = tpu.matmul %173, %174, %cst_59 {dimension_numbers = #tpu.dot_dimension_numbers<[1], [0], [0], [1], [0, 0, 1, 1], [], []>} : vector<8x128xbf16>, vector<128x512xbf16>, vector<8x512xf32> -> vector<8x512xf32>
    %176 = arith.extf %172 : vector<8x512xbf16> to vector<8x512xf32>
    %177 = arith.addf %176, %175 : vector<8x512xf32>
    %178 = vector.extract_strided_slice %169 {offsets = [0, 0], sizes = [8, 128], strides = [1, 1]} : vector<8x512xf32> to vector<8x128xf32>
    %179 = arith.negf %178 : vector<8x128xf32>
    %180 = math.exp %179 : vector<8x128xf32>
    %cst_60 = arith.constant 1.000000e+00 : f32
    %181 = vector.broadcast %cst_60 : f32 to vector<8x128xf32>
    %182 = arith.addf %181, %180 : vector<8x128xf32>
    %183 = arith.divf %181, %182 : vector<8x128xf32>
    %184 = vector.extract_strided_slice %169 {offsets = [0, 128], sizes = [8, 128], strides = [1, 1]} : vector<8x512xf32> to vector<8x128xf32>
    %185 = arith.negf %184 : vector<8x128xf32>
    %186 = math.exp %185 : vector<8x128xf32>
    %cst_61 = arith.constant 1.000000e+00 : f32
    %187 = vector.broadcast %cst_61 : f32 to vector<8x128xf32>
    %188 = arith.addf %187, %186 : vector<8x128xf32>
    %189 = arith.divf %187, %188 : vector<8x128xf32>
    %190 = vector.extract_strided_slice %169 {offsets = [0, 256], sizes = [8, 128], strides = [1, 1]} : vector<8x512xf32> to vector<8x128xf32>
    %191 = math.tanh %190 : vector<8x128xf32>
    %192 = vector.extract_strided_slice %169 {offsets = [0, 384], sizes = [8, 128], strides = [1, 1]} : vector<8x512xf32> to vector<8x128xf32>
    %193 = arith.negf %192 : vector<8x128xf32>
    %194 = math.exp %193 : vector<8x128xf32>
    %cst_62 = arith.constant 1.000000e+00 : f32
    %195 = vector.broadcast %cst_62 : f32 to vector<8x128xf32>
    %196 = arith.addf %195, %194 : vector<8x128xf32>
    %197 = arith.divf %195, %196 : vector<8x128xf32>
    %198 = arith.mulf %189, %123 : vector<8x128xf32>
    %199 = arith.mulf %183, %191 : vector<8x128xf32>
    %200 = arith.addf %198, %199 : vector<8x128xf32>
    %201 = math.tanh %200 : vector<8x128xf32>
    %202 = arith.mulf %197, %201 : vector<8x128xf32>
    %203 = vector.extract_strided_slice %177 {offsets = [0, 0], sizes = [8, 128], strides = [1, 1]} : vector<8x512xf32> to vector<8x128xf32>
    %204 = arith.negf %203 : vector<8x128xf32>
    %205 = math.exp %204 : vector<8x128xf32>
    %cst_63 = arith.constant 1.000000e+00 : f32
    %206 = vector.broadcast %cst_63 : f32 to vector<8x128xf32>
    %207 = arith.addf %206, %205 : vector<8x128xf32>
    %208 = arith.divf %206, %207 : vector<8x128xf32>
    %209 = vector.extract_strided_slice %177 {offsets = [0, 128], sizes = [8, 128], strides = [1, 1]} : vector<8x512xf32> to vector<8x128xf32>
    %210 = arith.negf %209 : vector<8x128xf32>
    %211 = math.exp %210 : vector<8x128xf32>
    %cst_64 = arith.constant 1.000000e+00 : f32
    %212 = vector.broadcast %cst_64 : f32 to vector<8x128xf32>
    %213 = arith.addf %212, %211 : vector<8x128xf32>
    %214 = arith.divf %212, %213 : vector<8x128xf32>
    %215 = vector.extract_strided_slice %177 {offsets = [0, 256], sizes = [8, 128], strides = [1, 1]} : vector<8x512xf32> to vector<8x128xf32>
    %216 = math.tanh %215 : vector<8x128xf32>
    %217 = vector.extract_strided_slice %177 {offsets = [0, 384], sizes = [8, 128], strides = [1, 1]} : vector<8x512xf32> to vector<8x128xf32>
    %218 = arith.negf %217 : vector<8x128xf32>
    %219 = math.exp %218 : vector<8x128xf32>
    %cst_65 = arith.constant 1.000000e+00 : f32
    %220 = vector.broadcast %cst_65 : f32 to vector<8x128xf32>
    %221 = arith.addf %220, %219 : vector<8x128xf32>
    %222 = arith.divf %220, %221 : vector<8x128xf32>
    %223 = arith.mulf %214, %148 : vector<8x128xf32>
    %224 = arith.mulf %208, %216 : vector<8x128xf32>
    %225 = arith.addf %223, %224 : vector<8x128xf32>
    %226 = math.tanh %225 : vector<8x128xf32>
    %227 = arith.mulf %222, %226 : vector<8x128xf32>
    %228 = arith.truncf %202 : vector<8x128xf32> to vector<8x128xbf16>
    %229 = arith.index_cast %c2_i32 : i32 to index
    %c0_66 = arith.constant 0 : index
    %c0_67 = arith.constant 0 : index
    %230 = vector.load %arg7[%229, %c0_66, %c0_67] : memref<8x8x128xbf16, #tpu.memory_space<vmem>>, vector<1x8x128xbf16>
    %231 = vector.shape_cast %230 : vector<1x8x128xbf16> to vector<8x128xbf16>
    %232 = vector.shape_cast %228 : vector<8x128xbf16> to vector<1x8x128xbf16>
    tpu.vector_store %arg7[%229, %c0_66, %c0_67], %232 {strides = array<i32>} : memref<8x8x128xbf16, #tpu.memory_space<vmem>>, vector<1x8x128xbf16>,
    %233 = arith.truncf %227 : vector<8x128xf32> to vector<8x128xbf16>
    %234 = arith.index_cast %161 : i32 to index
    %c0_68 = arith.constant 0 : index
    %c0_69 = arith.constant 0 : index
    %235 = vector.load %arg8[%234, %c0_68, %c0_69] : memref<8x8x128xbf16, #tpu.memory_space<vmem>>, vector<1x8x128xbf16>
    %236 = vector.shape_cast %235 : vector<1x8x128xbf16> to vector<8x128xbf16>
    %237 = vector.shape_cast %233 : vector<8x128xbf16> to vector<1x8x128xbf16>
    tpu.vector_store %arg8[%234, %c0_68, %c0_69], %237 {strides = array<i32>} : memref<8x8x128xbf16, #tpu.memory_space<vmem>>, vector<1x8x128xbf16>,
    %c3_i32 = arith.constant 3 : i32
    %c7_i32_70 = arith.constant 7 : i32
    %238 = arith.subi %c7_i32_70, %c3_i32 : i32
    %239 = arith.index_cast %c3_i32 : i32 to index
    %c0_71 = arith.constant 0 : index
    %c0_72 = arith.constant 0 : index
    %240 = vector.load %arg1[%239, %c0_71, %c0_72] : memref<8x8x512xbf16, #tpu.memory_space<vmem>>, vector<1x8x512xbf16>
    %241 = vector.shape_cast %240 : vector<1x8x512xbf16> to vector<8x512xbf16>
    %242 = arith.truncf %202 : vector<8x128xf32> to vector<8x128xbf16>
    %c0_73 = arith.constant 0 : index
    %c0_74 = arith.constant 0 : index
    %243 = vector.load %arg3[%c0_73, %c0_74] : memref<128x512xbf16, #tpu.memory_space<vmem>>, vector<128x512xbf16>
    %cst_75 = arith.constant dense<0.000000e+00> : vector<8x512xf32>
    %244 = tpu.matmul %242, %243, %cst_75 {dimension_numbers = #tpu.dot_dimension_numbers<[1], [0], [0], [1], [0, 0, 1, 1], [], []>} : vector<8x128xbf16>, vector<128x512xbf16>, vector<8x512xf32> -> vector<8x512xf32>
    %245 = arith.extf %241 : vector<8x512xbf16> to vector<8x512xf32>
    %246 = arith.addf %245, %244 : vector<8x512xf32>
    %247 = arith.index_cast %238 : i32 to index
    %c0_76 = arith.constant 0 : index
    %c0_77 = arith.constant 0 : index
    %248 = vector.load %arg2[%247, %c0_76, %c0_77] : memref<8x8x512xbf16, #tpu.memory_space<vmem>>, vector<1x8x512xbf16>
    %249 = vector.shape_cast %248 : vector<1x8x512xbf16> to vector<8x512xbf16>
    %250 = arith.truncf %227 : vector<8x128xf32> to vector<8x128xbf16>
    %c0_78 = arith.constant 0 : index
    %c0_79 = arith.constant 0 : index
    %251 = vector.load %arg4[%c0_78, %c0_79] : memref<128x512xbf16, #tpu.memory_space<vmem>>, vector<128x512xbf16>
    %cst_80 = arith.constant dense<0.000000e+00> : vector<8x512xf32>
    %252 = tpu.matmul %250, %251, %cst_80 {dimension_numbers = #tpu.dot_dimension_numbers<[1], [0], [0], [1], [0, 0, 1, 1], [], []>} : vector<8x128xbf16>, vector<128x512xbf16>, vector<8x512xf32> -> vector<8x512xf32>
    %253 = arith.extf %249 : vector<8x512xbf16> to vector<8x512xf32>
    %254 = arith.addf %253, %252 : vector<8x512xf32>
    %255 = vector.extract_strided_slice %246 {offsets = [0, 0], sizes = [8, 128], strides = [1, 1]} : vector<8x512xf32> to vector<8x128xf32>
    %256 = arith.negf %255 : vector<8x128xf32>
    %257 = math.exp %256 : vector<8x128xf32>
    %cst_81 = arith.constant 1.000000e+00 : f32
    %258 = vector.broadcast %cst_81 : f32 to vector<8x128xf32>
    %259 = arith.addf %258, %257 : vector<8x128xf32>
    %260 = arith.divf %258, %259 : vector<8x128xf32>
    %261 = vector.extract_strided_slice %246 {offsets = [0, 128], sizes = [8, 128], strides = [1, 1]} : vector<8x512xf32> to vector<8x128xf32>
    %262 = arith.negf %261 : vector<8x128xf32>
    %263 = math.exp %262 : vector<8x128xf32>
    %cst_82 = arith.constant 1.000000e+00 : f32
    %264 = vector.broadcast %cst_82 : f32 to vector<8x128xf32>
    %265 = arith.addf %264, %263 : vector<8x128xf32>
    %266 = arith.divf %264, %265 : vector<8x128xf32>
    %267 = vector.extract_strided_slice %246 {offsets = [0, 256], sizes = [8, 128], strides = [1, 1]} : vector<8x512xf32> to vector<8x128xf32>
    %268 = math.tanh %267 : vector<8x128xf32>
    %269 = vector.extract_strided_slice %246 {offsets = [0, 384], sizes = [8, 128], strides = [1, 1]} : vector<8x512xf32> to vector<8x128xf32>
    %270 = arith.negf %269 : vector<8x128xf32>
    %271 = math.exp %270 : vector<8x128xf32>
    %cst_83 = arith.constant 1.000000e+00 : f32
    %272 = vector.broadcast %cst_83 : f32 to vector<8x128xf32>
    %273 = arith.addf %272, %271 : vector<8x128xf32>
    %274 = arith.divf %272, %273 : vector<8x128xf32>
    %275 = arith.mulf %266, %200 : vector<8x128xf32>
    %276 = arith.mulf %260, %268 : vector<8x128xf32>
    %277 = arith.addf %275, %276 : vector<8x128xf32>
    %278 = math.tanh %277 : vector<8x128xf32>
    %279 = arith.mulf %274, %278 : vector<8x128xf32>
    %280 = vector.extract_strided_slice %254 {offsets = [0, 0], sizes = [8, 128], strides = [1, 1]} : vector<8x512xf32> to vector<8x128xf32>
    %281 = arith.negf %280 : vector<8x128xf32>
    %282 = math.exp %281 : vector<8x128xf32>
    %cst_84 = arith.constant 1.000000e+00 : f32
    %283 = vector.broadcast %cst_84 : f32 to vector<8x128xf32>
    %284 = arith.addf %283, %282 : vector<8x128xf32>
    %285 = arith.divf %283, %284 : vector<8x128xf32>
    %286 = vector.extract_strided_slice %254 {offsets = [0, 128], sizes = [8, 128], strides = [1, 1]} : vector<8x512xf32> to vector<8x128xf32>
    %287 = arith.negf %286 : vector<8x128xf32>
    %288 = math.exp %287 : vector<8x128xf32>
    %cst_85 = arith.constant 1.000000e+00 : f32
    %289 = vector.broadcast %cst_85 : f32 to vector<8x128xf32>
    %290 = arith.addf %289, %288 : vector<8x128xf32>
    %291 = arith.divf %289, %290 : vector<8x128xf32>
    %292 = vector.extract_strided_slice %254 {offsets = [0, 256], sizes = [8, 128], strides = [1, 1]} : vector<8x512xf32> to vector<8x128xf32>
    %293 = math.tanh %292 : vector<8x128xf32>
    %294 = vector.extract_strided_slice %254 {offsets = [0, 384], sizes = [8, 128], strides = [1, 1]} : vector<8x512xf32> to vector<8x128xf32>
    %295 = arith.negf %294 : vector<8x128xf32>
    %296 = math.exp %295 : vector<8x128xf32>
    %cst_86 = arith.constant 1.000000e+00 : f32
    %297 = vector.broadcast %cst_86 : f32 to vector<8x128xf32>
    %298 = arith.addf %297, %296 : vector<8x128xf32>
    %299 = arith.divf %297, %298 : vector<8x128xf32>
    %300 = arith.mulf %291, %225 : vector<8x128xf32>
    %301 = arith.mulf %285, %293 : vector<8x128xf32>
    %302 = arith.addf %300, %301 : vector<8x128xf32>
    %303 = math.tanh %302 : vector<8x128xf32>
    %304 = arith.mulf %299, %303 : vector<8x128xf32>
    %305 = arith.truncf %279 : vector<8x128xf32> to vector<8x128xbf16>
    %306 = arith.index_cast %c3_i32 : i32 to index
    %c0_87 = arith.constant 0 : index
    %c0_88 = arith.constant 0 : index
    %307 = vector.load %arg7[%306, %c0_87, %c0_88] : memref<8x8x128xbf16, #tpu.memory_space<vmem>>, vector<1x8x128xbf16>
    %308 = vector.shape_cast %307 : vector<1x8x128xbf16> to vector<8x128xbf16>
    %309 = vector.shape_cast %305 : vector<8x128xbf16> to vector<1x8x128xbf16>
    tpu.vector_store %arg7[%306, %c0_87, %c0_88], %309 {strides = array<i32>} : memref<8x8x128xbf16, #tpu.memory_space<vmem>>, vector<1x8x128xbf16>,
    %310 = arith.truncf %304 : vector<8x128xf32> to vector<8x128xbf16>
    %311 = arith.index_cast %238 : i32 to index
    %c0_89 = arith.constant 0 : index
    %c0_90 = arith.constant 0 : index
    %312 = vector.load %arg8[%311, %c0_89, %c0_90] : memref<8x8x128xbf16, #tpu.memory_space<vmem>>, vector<1x8x128xbf16>
    %313 = vector.shape_cast %312 : vector<1x8x128xbf16> to vector<8x128xbf16>
    %314 = vector.shape_cast %310 : vector<8x128xbf16> to vector<1x8x128xbf16>
    tpu.vector_store %arg8[%311, %c0_89, %c0_90], %314 {strides = array<i32>} : memref<8x8x128xbf16, #tpu.memory_space<vmem>>, vector<1x8x128xbf16>,
    %c4_i32 = arith.constant 4 : i32
    %c7_i32_91 = arith.constant 7 : i32
    %315 = arith.subi %c7_i32_91, %c4_i32 : i32
    %316 = arith.index_cast %c4_i32 : i32 to index
    %c0_92 = arith.constant 0 : index
    %c0_93 = arith.constant 0 : index
    %317 = vector.load %arg1[%316, %c0_92, %c0_93] : memref<8x8x512xbf16, #tpu.memory_space<vmem>>, vector<1x8x512xbf16>
    %318 = vector.shape_cast %317 : vector<1x8x512xbf16> to vector<8x512xbf16>
    %319 = arith.truncf %279 : vector<8x128xf32> to vector<8x128xbf16>
    %c0_94 = arith.constant 0 : index
    %c0_95 = arith.constant 0 : index
    %320 = vector.load %arg3[%c0_94, %c0_95] : memref<128x512xbf16, #tpu.memory_space<vmem>>, vector<128x512xbf16>
    %cst_96 = arith.constant dense<0.000000e+00> : vector<8x512xf32>
    %321 = tpu.matmul %319, %320, %cst_96 {dimension_numbers = #tpu.dot_dimension_numbers<[1], [0], [0], [1], [0, 0, 1, 1], [], []>} : vector<8x128xbf16>, vector<128x512xbf16>, vector<8x512xf32> -> vector<8x512xf32>
    %322 = arith.extf %318 : vector<8x512xbf16> to vector<8x512xf32>
    %323 = arith.addf %322, %321 : vector<8x512xf32>
    %324 = arith.index_cast %315 : i32 to index
    %c0_97 = arith.constant 0 : index
    %c0_98 = arith.constant 0 : index
    %325 = vector.load %arg2[%324, %c0_97, %c0_98] : memref<8x8x512xbf16, #tpu.memory_space<vmem>>, vector<1x8x512xbf16>
    %326 = vector.shape_cast %325 : vector<1x8x512xbf16> to vector<8x512xbf16>
    %327 = arith.truncf %304 : vector<8x128xf32> to vector<8x128xbf16>
    %c0_99 = arith.constant 0 : index
    %c0_100 = arith.constant 0 : index
    %328 = vector.load %arg4[%c0_99, %c0_100] : memref<128x512xbf16, #tpu.memory_space<vmem>>, vector<128x512xbf16>
    %cst_101 = arith.constant dense<0.000000e+00> : vector<8x512xf32>
    %329 = tpu.matmul %327, %328, %cst_101 {dimension_numbers = #tpu.dot_dimension_numbers<[1], [0], [0], [1], [0, 0, 1, 1], [], []>} : vector<8x128xbf16>, vector<128x512xbf16>, vector<8x512xf32> -> vector<8x512xf32>
    %330 = arith.extf %326 : vector<8x512xbf16> to vector<8x512xf32>
    %331 = arith.addf %330, %329 : vector<8x512xf32>
    %332 = vector.extract_strided_slice %323 {offsets = [0, 0], sizes = [8, 128], strides = [1, 1]} : vector<8x512xf32> to vector<8x128xf32>
    %333 = arith.negf %332 : vector<8x128xf32>
    %334 = math.exp %333 : vector<8x128xf32>
    %cst_102 = arith.constant 1.000000e+00 : f32
    %335 = vector.broadcast %cst_102 : f32 to vector<8x128xf32>
    %336 = arith.addf %335, %334 : vector<8x128xf32>
    %337 = arith.divf %335, %336 : vector<8x128xf32>
    %338 = vector.extract_strided_slice %323 {offsets = [0, 128], sizes = [8, 128], strides = [1, 1]} : vector<8x512xf32> to vector<8x128xf32>
    %339 = arith.negf %338 : vector<8x128xf32>
    %340 = math.exp %339 : vector<8x128xf32>
    %cst_103 = arith.constant 1.000000e+00 : f32
    %341 = vector.broadcast %cst_103 : f32 to vector<8x128xf32>
    %342 = arith.addf %341, %340 : vector<8x128xf32>
    %343 = arith.divf %341, %342 : vector<8x128xf32>
    %344 = vector.extract_strided_slice %323 {offsets = [0, 256], sizes = [8, 128], strides = [1, 1]} : vector<8x512xf32> to vector<8x128xf32>
    %345 = math.tanh %344 : vector<8x128xf32>
    %346 = vector.extract_strided_slice %323 {offsets = [0, 384], sizes = [8, 128], strides = [1, 1]} : vector<8x512xf32> to vector<8x128xf32>
    %347 = arith.negf %346 : vector<8x128xf32>
    %348 = math.exp %347 : vector<8x128xf32>
    %cst_104 = arith.constant 1.000000e+00 : f32
    %349 = vector.broadcast %cst_104 : f32 to vector<8x128xf32>
    %350 = arith.addf %349, %348 : vector<8x128xf32>
    %351 = arith.divf %349, %350 : vector<8x128xf32>
    %352 = arith.mulf %343, %277 : vector<8x128xf32>
    %353 = arith.mulf %337, %345 : vector<8x128xf32>
    %354 = arith.addf %352, %353 : vector<8x128xf32>
    %355 = math.tanh %354 : vector<8x128xf32>
    %356 = arith.mulf %351, %355 : vector<8x128xf32>
    %357 = vector.extract_strided_slice %331 {offsets = [0, 0], sizes = [8, 128], strides = [1, 1]} : vector<8x512xf32> to vector<8x128xf32>
    %358 = arith.negf %357 : vector<8x128xf32>
    %359 = math.exp %358 : vector<8x128xf32>
    %cst_105 = arith.constant 1.000000e+00 : f32
    %360 = vector.broadcast %cst_105 : f32 to vector<8x128xf32>
    %361 = arith.addf %360, %359 : vector<8x128xf32>
    %362 = arith.divf %360, %361 : vector<8x128xf32>
    %363 = vector.extract_strided_slice %331 {offsets = [0, 128], sizes = [8, 128], strides = [1, 1]} : vector<8x512xf32> to vector<8x128xf32>
    %364 = arith.negf %363 : vector<8x128xf32>
    %365 = math.exp %364 : vector<8x128xf32>
    %cst_106 = arith.constant 1.000000e+00 : f32
    %366 = vector.broadcast %cst_106 : f32 to vector<8x128xf32>
    %367 = arith.addf %366, %365 : vector<8x128xf32>
    %368 = arith.divf %366, %367 : vector<8x128xf32>
    %369 = vector.extract_strided_slice %331 {offsets = [0, 256], sizes = [8, 128], strides = [1, 1]} : vector<8x512xf32> to vector<8x128xf32>
    %370 = math.tanh %369 : vector<8x128xf32>
    %371 = vector.extract_strided_slice %331 {offsets = [0, 384], sizes = [8, 128], strides = [1, 1]} : vector<8x512xf32> to vector<8x128xf32>
    %372 = arith.negf %371 : vector<8x128xf32>
    %373 = math.exp %372 : vector<8x128xf32>
    %cst_107 = arith.constant 1.000000e+00 : f32
    %374 = vector.broadcast %cst_107 : f32 to vector<8x128xf32>
    %375 = arith.addf %374, %373 : vector<8x128xf32>
    %376 = arith.divf %374, %375 : vector<8x128xf32>
    %377 = arith.mulf %368, %302 : vector<8x128xf32>
    %378 = arith.mulf %362, %370 : vector<8x128xf32>
    %379 = arith.addf %377, %378 : vector<8x128xf32>
    %380 = math.tanh %379 : vector<8x128xf32>
    %381 = arith.mulf %376, %380 : vector<8x128xf32>
    %382 = arith.truncf %356 : vector<8x128xf32> to vector<8x128xbf16>
    %383 = arith.index_cast %c4_i32 : i32 to index
    %c0_108 = arith.constant 0 : index
    %c0_109 = arith.constant 0 : index
    %384 = vector.load %arg7[%383, %c0_108, %c0_109] : memref<8x8x128xbf16, #tpu.memory_space<vmem>>, vector<1x8x128xbf16>
    %385 = vector.shape_cast %384 : vector<1x8x128xbf16> to vector<8x128xbf16>
    %386 = vector.shape_cast %382 : vector<8x128xbf16> to vector<1x8x128xbf16>
    tpu.vector_store %arg7[%383, %c0_108, %c0_109], %386 {strides = array<i32>} : memref<8x8x128xbf16, #tpu.memory_space<vmem>>, vector<1x8x128xbf16>,
    %387 = arith.truncf %381 : vector<8x128xf32> to vector<8x128xbf16>
    %388 = arith.index_cast %315 : i32 to index
    %c0_110 = arith.constant 0 : index
    %c0_111 = arith.constant 0 : index
    %389 = vector.load %arg8[%388, %c0_110, %c0_111] : memref<8x8x128xbf16, #tpu.memory_space<vmem>>, vector<1x8x128xbf16>
    %390 = vector.shape_cast %389 : vector<1x8x128xbf16> to vector<8x128xbf16>
    %391 = vector.shape_cast %387 : vector<8x128xbf16> to vector<1x8x128xbf16>
    tpu.vector_store %arg8[%388, %c0_110, %c0_111], %391 {strides = array<i32>} : memref<8x8x128xbf16, #tpu.memory_space<vmem>>, vector<1x8x128xbf16>,
    %c5_i32 = arith.constant 5 : i32
    %c7_i32_112 = arith.constant 7 : i32
    %392 = arith.subi %c7_i32_112, %c5_i32 : i32
    %393 = arith.index_cast %c5_i32 : i32 to index
    %c0_113 = arith.constant 0 : index
    %c0_114 = arith.constant 0 : index
    %394 = vector.load %arg1[%393, %c0_113, %c0_114] : memref<8x8x512xbf16, #tpu.memory_space<vmem>>, vector<1x8x512xbf16>
    %395 = vector.shape_cast %394 : vector<1x8x512xbf16> to vector<8x512xbf16>
    %396 = arith.truncf %356 : vector<8x128xf32> to vector<8x128xbf16>
    %c0_115 = arith.constant 0 : index
    %c0_116 = arith.constant 0 : index
    %397 = vector.load %arg3[%c0_115, %c0_116] : memref<128x512xbf16, #tpu.memory_space<vmem>>, vector<128x512xbf16>
    %cst_117 = arith.constant dense<0.000000e+00> : vector<8x512xf32>
    %398 = tpu.matmul %396, %397, %cst_117 {dimension_numbers = #tpu.dot_dimension_numbers<[1], [0], [0], [1], [0, 0, 1, 1], [], []>} : vector<8x128xbf16>, vector<128x512xbf16>, vector<8x512xf32> -> vector<8x512xf32>
    %399 = arith.extf %395 : vector<8x512xbf16> to vector<8x512xf32>
    %400 = arith.addf %399, %398 : vector<8x512xf32>
    %401 = arith.index_cast %392 : i32 to index
    %c0_118 = arith.constant 0 : index
    %c0_119 = arith.constant 0 : index
    %402 = vector.load %arg2[%401, %c0_118, %c0_119] : memref<8x8x512xbf16, #tpu.memory_space<vmem>>, vector<1x8x512xbf16>
    %403 = vector.shape_cast %402 : vector<1x8x512xbf16> to vector<8x512xbf16>
    %404 = arith.truncf %381 : vector<8x128xf32> to vector<8x128xbf16>
    %c0_120 = arith.constant 0 : index
    %c0_121 = arith.constant 0 : index
    %405 = vector.load %arg4[%c0_120, %c0_121] : memref<128x512xbf16, #tpu.memory_space<vmem>>, vector<128x512xbf16>
    %cst_122 = arith.constant dense<0.000000e+00> : vector<8x512xf32>
    %406 = tpu.matmul %404, %405, %cst_122 {dimension_numbers = #tpu.dot_dimension_numbers<[1], [0], [0], [1], [0, 0, 1, 1], [], []>} : vector<8x128xbf16>, vector<128x512xbf16>, vector<8x512xf32> -> vector<8x512xf32>
    %407 = arith.extf %403 : vector<8x512xbf16> to vector<8x512xf32>
    %408 = arith.addf %407, %406 : vector<8x512xf32>
    %409 = vector.extract_strided_slice %400 {offsets = [0, 0], sizes = [8, 128], strides = [1, 1]} : vector<8x512xf32> to vector<8x128xf32>
    %410 = arith.negf %409 : vector<8x128xf32>
    %411 = math.exp %410 : vector<8x128xf32>
    %cst_123 = arith.constant 1.000000e+00 : f32
    %412 = vector.broadcast %cst_123 : f32 to vector<8x128xf32>
    %413 = arith.addf %412, %411 : vector<8x128xf32>
    %414 = arith.divf %412, %413 : vector<8x128xf32>
    %415 = vector.extract_strided_slice %400 {offsets = [0, 128], sizes = [8, 128], strides = [1, 1]} : vector<8x512xf32> to vector<8x128xf32>
    %416 = arith.negf %415 : vector<8x128xf32>
    %417 = math.exp %416 : vector<8x128xf32>
    %cst_124 = arith.constant 1.000000e+00 : f32
    %418 = vector.broadcast %cst_124 : f32 to vector<8x128xf32>
    %419 = arith.addf %418, %417 : vector<8x128xf32>
    %420 = arith.divf %418, %419 : vector<8x128xf32>
    %421 = vector.extract_strided_slice %400 {offsets = [0, 256], sizes = [8, 128], strides = [1, 1]} : vector<8x512xf32> to vector<8x128xf32>
    %422 = math.tanh %421 : vector<8x128xf32>
    %423 = vector.extract_strided_slice %400 {offsets = [0, 384], sizes = [8, 128], strides = [1, 1]} : vector<8x512xf32> to vector<8x128xf32>
    %424 = arith.negf %423 : vector<8x128xf32>
    %425 = math.exp %424 : vector<8x128xf32>
    %cst_125 = arith.constant 1.000000e+00 : f32
    %426 = vector.broadcast %cst_125 : f32 to vector<8x128xf32>
    %427 = arith.addf %426, %425 : vector<8x128xf32>
    %428 = arith.divf %426, %427 : vector<8x128xf32>
    %429 = arith.mulf %420, %354 : vector<8x128xf32>
    %430 = arith.mulf %414, %422 : vector<8x128xf32>
    %431 = arith.addf %429, %430 : vector<8x128xf32>
    %432 = math.tanh %431 : vector<8x128xf32>
    %433 = arith.mulf %428, %432 : vector<8x128xf32>
    %434 = vector.extract_strided_slice %408 {offsets = [0, 0], sizes = [8, 128], strides = [1, 1]} : vector<8x512xf32> to vector<8x128xf32>
    %435 = arith.negf %434 : vector<8x128xf32>
    %436 = math.exp %435 : vector<8x128xf32>
    %cst_126 = arith.constant 1.000000e+00 : f32
    %437 = vector.broadcast %cst_126 : f32 to vector<8x128xf32>
    %438 = arith.addf %437, %436 : vector<8x128xf32>
    %439 = arith.divf %437, %438 : vector<8x128xf32>
    %440 = vector.extract_strided_slice %408 {offsets = [0, 128], sizes = [8, 128], strides = [1, 1]} : vector<8x512xf32> to vector<8x128xf32>
    %441 = arith.negf %440 : vector<8x128xf32>
    %442 = math.exp %441 : vector<8x128xf32>
    %cst_127 = arith.constant 1.000000e+00 : f32
    %443 = vector.broadcast %cst_127 : f32 to vector<8x128xf32>
    %444 = arith.addf %443, %442 : vector<8x128xf32>
    %445 = arith.divf %443, %444 : vector<8x128xf32>
    %446 = vector.extract_strided_slice %408 {offsets = [0, 256], sizes = [8, 128], strides = [1, 1]} : vector<8x512xf32> to vector<8x128xf32>
    %447 = math.tanh %446 : vector<8x128xf32>
    %448 = vector.extract_strided_slice %408 {offsets = [0, 384], sizes = [8, 128], strides = [1, 1]} : vector<8x512xf32> to vector<8x128xf32>
    %449 = arith.negf %448 : vector<8x128xf32>
    %450 = math.exp %449 : vector<8x128xf32>
    %cst_128 = arith.constant 1.000000e+00 : f32
    %451 = vector.broadcast %cst_128 : f32 to vector<8x128xf32>
    %452 = arith.addf %451, %450 : vector<8x128xf32>
    %453 = arith.divf %451, %452 : vector<8x128xf32>
    %454 = arith.mulf %445, %379 : vector<8x128xf32>
    %455 = arith.mulf %439, %447 : vector<8x128xf32>
    %456 = arith.addf %454, %455 : vector<8x128xf32>
    %457 = math.tanh %456 : vector<8x128xf32>
    %458 = arith.mulf %453, %457 : vector<8x128xf32>
    %459 = arith.truncf %433 : vector<8x128xf32> to vector<8x128xbf16>
    %460 = arith.index_cast %c5_i32 : i32 to index
    %c0_129 = arith.constant 0 : index
    %c0_130 = arith.constant 0 : index
    %461 = vector.load %arg7[%460, %c0_129, %c0_130] : memref<8x8x128xbf16, #tpu.memory_space<vmem>>, vector<1x8x128xbf16>
    %462 = vector.shape_cast %461 : vector<1x8x128xbf16> to vector<8x128xbf16>
    %463 = vector.shape_cast %459 : vector<8x128xbf16> to vector<1x8x128xbf16>
    tpu.vector_store %arg7[%460, %c0_129, %c0_130], %463 {strides = array<i32>} : memref<8x8x128xbf16, #tpu.memory_space<vmem>>, vector<1x8x128xbf16>,
    %464 = arith.truncf %458 : vector<8x128xf32> to vector<8x128xbf16>
    %465 = arith.index_cast %392 : i32 to index
    %c0_131 = arith.constant 0 : index
    %c0_132 = arith.constant 0 : index
    %466 = vector.load %arg8[%465, %c0_131, %c0_132] : memref<8x8x128xbf16, #tpu.memory_space<vmem>>, vector<1x8x128xbf16>
    %467 = vector.shape_cast %466 : vector<1x8x128xbf16> to vector<8x128xbf16>
    %468 = vector.shape_cast %464 : vector<8x128xbf16> to vector<1x8x128xbf16>
    tpu.vector_store %arg8[%465, %c0_131, %c0_132], %468 {strides = array<i32>} : memref<8x8x128xbf16, #tpu.memory_space<vmem>>, vector<1x8x128xbf16>,
    %c6_i32 = arith.constant 6 : i32
    %c7_i32_133 = arith.constant 7 : i32
    %469 = arith.subi %c7_i32_133, %c6_i32 : i32
    %470 = arith.index_cast %c6_i32 : i32 to index
    %c0_134 = arith.constant 0 : index
    %c0_135 = arith.constant 0 : index
    %471 = vector.load %arg1[%470, %c0_134, %c0_135] : memref<8x8x512xbf16, #tpu.memory_space<vmem>>, vector<1x8x512xbf16>
    %472 = vector.shape_cast %471 : vector<1x8x512xbf16> to vector<8x512xbf16>
    %473 = arith.truncf %433 : vector<8x128xf32> to vector<8x128xbf16>
    %c0_136 = arith.constant 0 : index
    %c0_137 = arith.constant 0 : index
    %474 = vector.load %arg3[%c0_136, %c0_137] : memref<128x512xbf16, #tpu.memory_space<vmem>>, vector<128x512xbf16>
    %cst_138 = arith.constant dense<0.000000e+00> : vector<8x512xf32>
    %475 = tpu.matmul %473, %474, %cst_138 {dimension_numbers = #tpu.dot_dimension_numbers<[1], [0], [0], [1], [0, 0, 1, 1], [], []>} : vector<8x128xbf16>, vector<128x512xbf16>, vector<8x512xf32> -> vector<8x512xf32>
    %476 = arith.extf %472 : vector<8x512xbf16> to vector<8x512xf32>
    %477 = arith.addf %476, %475 : vector<8x512xf32>
    %478 = arith.index_cast %469 : i32 to index
    %c0_139 = arith.constant 0 : index
    %c0_140 = arith.constant 0 : index
    %479 = vector.load %arg2[%478, %c0_139, %c0_140] : memref<8x8x512xbf16, #tpu.memory_space<vmem>>, vector<1x8x512xbf16>
    %480 = vector.shape_cast %479 : vector<1x8x512xbf16> to vector<8x512xbf16>
    %481 = arith.truncf %458 : vector<8x128xf32> to vector<8x128xbf16>
    %c0_141 = arith.constant 0 : index
    %c0_142 = arith.constant 0 : index
    %482 = vector.load %arg4[%c0_141, %c0_142] : memref<128x512xbf16, #tpu.memory_space<vmem>>, vector<128x512xbf16>
    %cst_143 = arith.constant dense<0.000000e+00> : vector<8x512xf32>
    %483 = tpu.matmul %481, %482, %cst_143 {dimension_numbers = #tpu.dot_dimension_numbers<[1], [0], [0], [1], [0, 0, 1, 1], [], []>} : vector<8x128xbf16>, vector<128x512xbf16>, vector<8x512xf32> -> vector<8x512xf32>
    %484 = arith.extf %480 : vector<8x512xbf16> to vector<8x512xf32>
    %485 = arith.addf %484, %483 : vector<8x512xf32>
    %486 = vector.extract_strided_slice %477 {offsets = [0, 0], sizes = [8, 128], strides = [1, 1]} : vector<8x512xf32> to vector<8x128xf32>
    %487 = arith.negf %486 : vector<8x128xf32>
    %488 = math.exp %487 : vector<8x128xf32>
    %cst_144 = arith.constant 1.000000e+00 : f32
    %489 = vector.broadcast %cst_144 : f32 to vector<8x128xf32>
    %490 = arith.addf %489, %488 : vector<8x128xf32>
    %491 = arith.divf %489, %490 : vector<8x128xf32>
    %492 = vector.extract_strided_slice %477 {offsets = [0, 128], sizes = [8, 128], strides = [1, 1]} : vector<8x512xf32> to vector<8x128xf32>
    %493 = arith.negf %492 : vector<8x128xf32>
    %494 = math.exp %493 : vector<8x128xf32>
    %cst_145 = arith.constant 1.000000e+00 : f32
    %495 = vector.broadcast %cst_145 : f32 to vector<8x128xf32>
    %496 = arith.addf %495, %494 : vector<8x128xf32>
    %497 = arith.divf %495, %496 : vector<8x128xf32>
    %498 = vector.extract_strided_slice %477 {offsets = [0, 256], sizes = [8, 128], strides = [1, 1]} : vector<8x512xf32> to vector<8x128xf32>
    %499 = math.tanh %498 : vector<8x128xf32>
    %500 = vector.extract_strided_slice %477 {offsets = [0, 384], sizes = [8, 128], strides = [1, 1]} : vector<8x512xf32> to vector<8x128xf32>
    %501 = arith.negf %500 : vector<8x128xf32>
    %502 = math.exp %501 : vector<8x128xf32>
    %cst_146 = arith.constant 1.000000e+00 : f32
    %503 = vector.broadcast %cst_146 : f32 to vector<8x128xf32>
    %504 = arith.addf %503, %502 : vector<8x128xf32>
    %505 = arith.divf %503, %504 : vector<8x128xf32>
    %506 = arith.mulf %497, %431 : vector<8x128xf32>
    %507 = arith.mulf %491, %499 : vector<8x128xf32>
    %508 = arith.addf %506, %507 : vector<8x128xf32>
    %509 = math.tanh %508 : vector<8x128xf32>
    %510 = arith.mulf %505, %509 : vector<8x128xf32>
    %511 = vector.extract_strided_slice %485 {offsets = [0, 0], sizes = [8, 128], strides = [1, 1]} : vector<8x512xf32> to vector<8x128xf32>
    %512 = arith.negf %511 : vector<8x128xf32>
    %513 = math.exp %512 : vector<8x128xf32>
    %cst_147 = arith.constant 1.000000e+00 : f32
    %514 = vector.broadcast %cst_147 : f32 to vector<8x128xf32>
    %515 = arith.addf %514, %513 : vector<8x128xf32>
    %516 = arith.divf %514, %515 : vector<8x128xf32>
    %517 = vector.extract_strided_slice %485 {offsets = [0, 128], sizes = [8, 128], strides = [1, 1]} : vector<8x512xf32> to vector<8x128xf32>
    %518 = arith.negf %517 : vector<8x128xf32>
    %519 = math.exp %518 : vector<8x128xf32>
    %cst_148 = arith.constant 1.000000e+00 : f32
    %520 = vector.broadcast %cst_148 : f32 to vector<8x128xf32>
    %521 = arith.addf %520, %519 : vector<8x128xf32>
    %522 = arith.divf %520, %521 : vector<8x128xf32>
    %523 = vector.extract_strided_slice %485 {offsets = [0, 256], sizes = [8, 128], strides = [1, 1]} : vector<8x512xf32> to vector<8x128xf32>
    %524 = math.tanh %523 : vector<8x128xf32>
    %525 = vector.extract_strided_slice %485 {offsets = [0, 384], sizes = [8, 128], strides = [1, 1]} : vector<8x512xf32> to vector<8x128xf32>
    %526 = arith.negf %525 : vector<8x128xf32>
    %527 = math.exp %526 : vector<8x128xf32>
    %cst_149 = arith.constant 1.000000e+00 : f32
    %528 = vector.broadcast %cst_149 : f32 to vector<8x128xf32>
    %529 = arith.addf %528, %527 : vector<8x128xf32>
    %530 = arith.divf %528, %529 : vector<8x128xf32>
    %531 = arith.mulf %522, %456 : vector<8x128xf32>
    %532 = arith.mulf %516, %524 : vector<8x128xf32>
    %533 = arith.addf %531, %532 : vector<8x128xf32>
    %534 = math.tanh %533 : vector<8x128xf32>
    %535 = arith.mulf %530, %534 : vector<8x128xf32>
    %536 = arith.truncf %510 : vector<8x128xf32> to vector<8x128xbf16>
    %537 = arith.index_cast %c6_i32 : i32 to index
    %c0_150 = arith.constant 0 : index
    %c0_151 = arith.constant 0 : index
    %538 = vector.load %arg7[%537, %c0_150, %c0_151] : memref<8x8x128xbf16, #tpu.memory_space<vmem>>, vector<1x8x128xbf16>
    %539 = vector.shape_cast %538 : vector<1x8x128xbf16> to vector<8x128xbf16>
    %540 = vector.shape_cast %536 : vector<8x128xbf16> to vector<1x8x128xbf16>
    tpu.vector_store %arg7[%537, %c0_150, %c0_151], %540 {strides = array<i32>} : memref<8x8x128xbf16, #tpu.memory_space<vmem>>, vector<1x8x128xbf16>,
    %541 = arith.truncf %535 : vector<8x128xf32> to vector<8x128xbf16>
    %542 = arith.index_cast %469 : i32 to index
    %c0_152 = arith.constant 0 : index
    %c0_153 = arith.constant 0 : index
    %543 = vector.load %arg8[%542, %c0_152, %c0_153] : memref<8x8x128xbf16, #tpu.memory_space<vmem>>, vector<1x8x128xbf16>
    %544 = vector.shape_cast %543 : vector<1x8x128xbf16> to vector<8x128xbf16>
    %545 = vector.shape_cast %541 : vector<8x128xbf16> to vector<1x8x128xbf16>
    tpu.vector_store %arg8[%542, %c0_152, %c0_153], %545 {strides = array<i32>} : memref<8x8x128xbf16, #tpu.memory_space<vmem>>, vector<1x8x128xbf16>,
    %c7_i32_154 = arith.constant 7 : i32
    %c7_i32_155 = arith.constant 7 : i32
    %546 = arith.subi %c7_i32_155, %c7_i32_154 : i32
    %547 = arith.index_cast %c7_i32_154 : i32 to index
    %c0_156 = arith.constant 0 : index
    %c0_157 = arith.constant 0 : index
    %548 = vector.load %arg1[%547, %c0_156, %c0_157] : memref<8x8x512xbf16, #tpu.memory_space<vmem>>, vector<1x8x512xbf16>
    %549 = vector.shape_cast %548 : vector<1x8x512xbf16> to vector<8x512xbf16>
    %550 = arith.truncf %510 : vector<8x128xf32> to vector<8x128xbf16>
    %c0_158 = arith.constant 0 : index
    %c0_159 = arith.constant 0 : index
    %551 = vector.load %arg3[%c0_158, %c0_159] : memref<128x512xbf16, #tpu.memory_space<vmem>>, vector<128x512xbf16>
    %cst_160 = arith.constant dense<0.000000e+00> : vector<8x512xf32>
    %552 = tpu.matmul %550, %551, %cst_160 {dimension_numbers = #tpu.dot_dimension_numbers<[1], [0], [0], [1], [0, 0, 1, 1], [], []>} : vector<8x128xbf16>, vector<128x512xbf16>, vector<8x512xf32> -> vector<8x512xf32>
    %553 = arith.extf %549 : vector<8x512xbf16> to vector<8x512xf32>
    %554 = arith.addf %553, %552 : vector<8x512xf32>
    %555 = arith.index_cast %546 : i32 to index
    %c0_161 = arith.constant 0 : index
    %c0_162 = arith.constant 0 : index
    %556 = vector.load %arg2[%555, %c0_161, %c0_162] : memref<8x8x512xbf16, #tpu.memory_space<vmem>>, vector<1x8x512xbf16>
    %557 = vector.shape_cast %556 : vector<1x8x512xbf16> to vector<8x512xbf16>
    %558 = arith.truncf %535 : vector<8x128xf32> to vector<8x128xbf16>
    %c0_163 = arith.constant 0 : index
    %c0_164 = arith.constant 0 : index
    %559 = vector.load %arg4[%c0_163, %c0_164] : memref<128x512xbf16, #tpu.memory_space<vmem>>, vector<128x512xbf16>
    %cst_165 = arith.constant dense<0.000000e+00> : vector<8x512xf32>
    %560 = tpu.matmul %558, %559, %cst_165 {dimension_numbers = #tpu.dot_dimension_numbers<[1], [0], [0], [1], [0, 0, 1, 1], [], []>} : vector<8x128xbf16>, vector<128x512xbf16>, vector<8x512xf32> -> vector<8x512xf32>
    %561 = arith.extf %557 : vector<8x512xbf16> to vector<8x512xf32>
    %562 = arith.addf %561, %560 : vector<8x512xf32>
    %563 = vector.extract_strided_slice %554 {offsets = [0, 0], sizes = [8, 128], strides = [1, 1]} : vector<8x512xf32> to vector<8x128xf32>
    %564 = arith.negf %563 : vector<8x128xf32>
    %565 = math.exp %564 : vector<8x128xf32>
    %cst_166 = arith.constant 1.000000e+00 : f32
    %566 = vector.broadcast %cst_166 : f32 to vector<8x128xf32>
    %567 = arith.addf %566, %565 : vector<8x128xf32>
    %568 = arith.divf %566, %567 : vector<8x128xf32>
    %569 = vector.extract_strided_slice %554 {offsets = [0, 128], sizes = [8, 128], strides = [1, 1]} : vector<8x512xf32> to vector<8x128xf32>
    %570 = arith.negf %569 : vector<8x128xf32>
    %571 = math.exp %570 : vector<8x128xf32>
    %cst_167 = arith.constant 1.000000e+00 : f32
    %572 = vector.broadcast %cst_167 : f32 to vector<8x128xf32>
    %573 = arith.addf %572, %571 : vector<8x128xf32>
    %574 = arith.divf %572, %573 : vector<8x128xf32>
    %575 = vector.extract_strided_slice %554 {offsets = [0, 256], sizes = [8, 128], strides = [1, 1]} : vector<8x512xf32> to vector<8x128xf32>
    %576 = math.tanh %575 : vector<8x128xf32>
    %577 = vector.extract_strided_slice %554 {offsets = [0, 384], sizes = [8, 128], strides = [1, 1]} : vector<8x512xf32> to vector<8x128xf32>
    %578 = arith.negf %577 : vector<8x128xf32>
    %579 = math.exp %578 : vector<8x128xf32>
    %cst_168 = arith.constant 1.000000e+00 : f32
    %580 = vector.broadcast %cst_168 : f32 to vector<8x128xf32>
    %581 = arith.addf %580, %579 : vector<8x128xf32>
    %582 = arith.divf %580, %581 : vector<8x128xf32>
    %583 = arith.mulf %574, %508 : vector<8x128xf32>
    %584 = arith.mulf %568, %576 : vector<8x128xf32>
    %585 = arith.addf %583, %584 : vector<8x128xf32>
    %586 = math.tanh %585 : vector<8x128xf32>
    %587 = arith.mulf %582, %586 : vector<8x128xf32>
    %588 = vector.extract_strided_slice %562 {offsets = [0, 0], sizes = [8, 128], strides = [1, 1]} : vector<8x512xf32> to vector<8x128xf32>
    %589 = arith.negf %588 : vector<8x128xf32>
    %590 = math.exp %589 : vector<8x128xf32>
    %cst_169 = arith.constant 1.000000e+00 : f32
    %591 = vector.broadcast %cst_169 : f32 to vector<8x128xf32>
    %592 = arith.addf %591, %590 : vector<8x128xf32>
    %593 = arith.divf %591, %592 : vector<8x128xf32>
    %594 = vector.extract_strided_slice %562 {offsets = [0, 128], sizes = [8, 128], strides = [1, 1]} : vector<8x512xf32> to vector<8x128xf32>
    %595 = arith.negf %594 : vector<8x128xf32>
    %596 = math.exp %595 : vector<8x128xf32>
    %cst_170 = arith.constant 1.000000e+00 : f32
    %597 = vector.broadcast %cst_170 : f32 to vector<8x128xf32>
    %598 = arith.addf %597, %596 : vector<8x128xf32>
    %599 = arith.divf %597, %598 : vector<8x128xf32>
    %600 = vector.extract_strided_slice %562 {offsets = [0, 256], sizes = [8, 128], strides = [1, 1]} : vector<8x512xf32> to vector<8x128xf32>
    %601 = math.tanh %600 : vector<8x128xf32>
    %602 = vector.extract_strided_slice %562 {offsets = [0, 384], sizes = [8, 128], strides = [1, 1]} : vector<8x512xf32> to vector<8x128xf32>
    %603 = arith.negf %602 : vector<8x128xf32>
    %604 = math.exp %603 : vector<8x128xf32>
    %cst_171 = arith.constant 1.000000e+00 : f32
    %605 = vector.broadcast %cst_171 : f32 to vector<8x128xf32>
    %606 = arith.addf %605, %604 : vector<8x128xf32>
    %607 = arith.divf %605, %606 : vector<8x128xf32>
    %608 = arith.mulf %599, %533 : vector<8x128xf32>
    %609 = arith.mulf %593, %601 : vector<8x128xf32>
    %610 = arith.addf %608, %609 : vector<8x128xf32>
    %611 = math.tanh %610 : vector<8x128xf32>
    %612 = arith.mulf %607, %611 : vector<8x128xf32>
    %613 = arith.truncf %587 : vector<8x128xf32> to vector<8x128xbf16>
    %614 = arith.index_cast %c7_i32_154 : i32 to index
    %c0_172 = arith.constant 0 : index
    %c0_173 = arith.constant 0 : index
    %615 = vector.load %arg7[%614, %c0_172, %c0_173] : memref<8x8x128xbf16, #tpu.memory_space<vmem>>, vector<1x8x128xbf16>
    %616 = vector.shape_cast %615 : vector<1x8x128xbf16> to vector<8x128xbf16>
    %617 = vector.shape_cast %613 : vector<8x128xbf16> to vector<1x8x128xbf16>
    tpu.vector_store %arg7[%614, %c0_172, %c0_173], %617 {strides = array<i32>} : memref<8x8x128xbf16, #tpu.memory_space<vmem>>, vector<1x8x128xbf16>,
    %618 = arith.truncf %612 : vector<8x128xf32> to vector<8x128xbf16>
    %619 = arith.index_cast %546 : i32 to index
    %c0_174 = arith.constant 0 : index
    %c0_175 = arith.constant 0 : index
    %620 = vector.load %arg8[%619, %c0_174, %c0_175] : memref<8x8x128xbf16, #tpu.memory_space<vmem>>, vector<1x8x128xbf16>
    %621 = vector.shape_cast %620 : vector<1x8x128xbf16> to vector<8x128xbf16>
    %622 = vector.shape_cast %618 : vector<8x128xbf16> to vector<1x8x128xbf16>
    tpu.vector_store %arg8[%619, %c0_174, %c0_175], %622 {strides = array<i32>} : memref<8x8x128xbf16, #tpu.memory_space<vmem>>, vector<1x8x128xbf16>,
    %c8_i32 = arith.constant 8 : i32
    %c0_176 = arith.constant 0 : index
    %c0_177 = arith.constant 0 : index
    %623 = vector.load %arg10[%c0_176, %c0_177] : memref<8x128xf32, #tpu.memory_space<vmem>>, vector<8x128xf32>
    tpu.vector_store %arg10[%c0_176, %c0_177], %587 {strides = array<i32>} : memref<8x128xf32, #tpu.memory_space<vmem>>, vector<8x128xf32>,
    %c0_178 = arith.constant 0 : index
    %c0_179 = arith.constant 0 : index
    %624 = vector.load %arg11[%c0_178, %c0_179] : memref<8x128xf32, #tpu.memory_space<vmem>>, vector<8x128xf32>
    tpu.vector_store %arg11[%c0_178, %c0_179], %585 {strides = array<i32>} : memref<8x128xf32, #tpu.memory_space<vmem>>, vector<8x128xf32>,
    %c0_180 = arith.constant 0 : index
    %c0_181 = arith.constant 0 : index
    %625 = vector.load %arg12[%c0_180, %c0_181] : memref<8x128xf32, #tpu.memory_space<vmem>>, vector<8x128xf32>
    tpu.vector_store %arg12[%c0_180, %c0_181], %612 {strides = array<i32>} : memref<8x128xf32, #tpu.memory_space<vmem>>, vector<8x128xf32>,
    %c0_182 = arith.constant 0 : index
    %c0_183 = arith.constant 0 : index
    %626 = vector.load %arg13[%c0_182, %c0_183] : memref<8x128xf32, #tpu.memory_space<vmem>>, vector<8x128xf32>
    tpu.vector_store %arg13[%c0_182, %c0_183], %610 {strides = array<i32>} : memref<8x128xf32, #tpu.memory_space<vmem>>, vector<8x128xf32>,
    %c0_i32_184 = arith.constant 0 : i32
    %627 = arith.cmpi eq, %arg0, %c0_i32_184 : i32
    %628 = arith.extui %627 : i1 to i32
    %c0_i32_185 = arith.constant 0 : i32
    %629 = arith.cmpi ne, %628, %c0_i32_185 : i32
    scf.if %629 {
      %c0_186 = arith.constant 0 : index
      %c0_187 = arith.constant 0 : index
      %c0_188 = arith.constant 0 : index
      %630 = vector.load %arg9[%c0_186, %c0_187, %c0_188] : memref<2x8x128xf32, #tpu.memory_space<vmem>>, vector<1x8x128xf32>
      %631 = vector.shape_cast %630 : vector<1x8x128xf32> to vector<8x128xf32>
      %632 = vector.shape_cast %587 : vector<8x128xf32> to vector<1x8x128xf32>
      tpu.vector_store %arg9[%c0_186, %c0_187, %c0_188], %632 {strides = array<i32>} : memref<2x8x128xf32, #tpu.memory_space<vmem>>, vector<1x8x128xf32>,
      %c1 = arith.constant 1 : index
      %c0_189 = arith.constant 0 : index
      %c0_190 = arith.constant 0 : index
      %633 = vector.load %arg9[%c1, %c0_189, %c0_190] : memref<2x8x128xf32, #tpu.memory_space<vmem>>, vector<1x8x128xf32>
      %634 = vector.shape_cast %633 : vector<1x8x128xf32> to vector<8x128xf32>
      %635 = vector.shape_cast %612 : vector<8x128xf32> to vector<1x8x128xf32>
      tpu.vector_store %arg9[%c1, %c0_189, %c0_190], %635 {strides = array<i32>} : memref<2x8x128xf32, #tpu.memory_space<vmem>>, vector<1x8x128xf32>,
    } else {
    }
    return
  }
  func.func @transform_0(%arg0: i32) -> (i32, i32, i32) {
    %c0_i32 = arith.constant 0 : i32
    %c0_i32_0 = arith.constant 0 : i32
    %c0_i32_1 = arith.constant 0 : i32
    return %arg0, %c0_i32, %c0_i32_0 : i32, i32, i32
  }
  func.func @transform_1(%arg0: i32) -> (i32, i32, i32) {
    %c0_i32 = arith.constant 0 : i32
    %0 = arith.subi %c0_i32, %arg0 : i32
    %c0_i32_0 = arith.constant 0 : i32
    %c1_i32 = arith.constant 1 : i32
    %c0_i32_1 = arith.constant 0 : i32
    return %0, %c0_i32_0, %c1_i32 : i32, i32, i32
  }
  func.func @transform_2(%arg0: i32) -> (i32, i32) {
    %c0_i32 = arith.constant 0 : i32
    %c0_i32_0 = arith.constant 0 : i32
    %c0_i32_1 = arith.constant 0 : i32
    return %c0_i32, %c0_i32_0 : i32, i32
  }
  func.func @transform_3(%arg0: i32) -> (i32, i32) {
    %c0_i32 = arith.constant 0 : i32
    %c0_i32_0 = arith.constant 0 : i32
    %c0_i32_1 = arith.constant 0 : i32
    return %c0_i32, %c0_i32_0 : i32, i32
  }
  func.func @transform_4(%arg0: i32) -> (i32, i32, i32) {
    %c0_i32 = arith.constant 0 : i32
    %c0_i32_0 = arith.constant 0 : i32
    %c0_i32_1 = arith.constant 0 : i32
    %c0_i32_2 = arith.constant 0 : i32
    return %c0_i32, %c0_i32_0, %c0_i32_1 : i32, i32, i32
  }
  func.func @transform_5(%arg0: i32) -> (i32, i32, i32) {
    %c0_i32 = arith.constant 0 : i32
    %c0_i32_0 = arith.constant 0 : i32
    %c0_i32_1 = arith.constant 0 : i32
    %c0_i32_2 = arith.constant 0 : i32
    return %c0_i32, %c0_i32_0, %c0_i32_1 : i32, i32, i32
  }
  func.func @transform_6(%arg0: i32) -> (i32, i32, i32) {
    %c0_i32 = arith.constant 0 : i32
    %c0_i32_0 = arith.constant 0 : i32
    %c0_i32_1 = arith.constant 0 : i32
    return %arg0, %c0_i32, %c0_i32_0 : i32, i32, i32
  }
  func.func @transform_7(%arg0: i32) -> (i32, i32, i32) {
    %c0_i32 = arith.constant 0 : i32
    %0 = arith.subi %c0_i32, %arg0 : i32
    %c0_i32_0 = arith.constant 0 : i32
    %c0_i32_1 = arith.constant 0 : i32
    %c0_i32_2 = arith.constant 0 : i32
    return %0, %c0_i32_0, %c0_i32_1 : i32, i32, i32
  }
  func.func @transform_8(%arg0: i32) -> (i32, i32, i32) {
    %c0_i32 = arith.constant 0 : i32
    %c0_i32_0 = arith.constant 0 : i32
    %c0_i32_1 = arith.constant 0 : i32
    %c0_i32_2 = arith.constant 0 : i32
    return %c0_i32, %c0_i32_0, %c0_i32_1 : i32, i32, i32
  }
}

</mosaic_0001>

<bundles_post_ra>
// kernel: _lambda_.3
= control target key start
LH: loop header
LB: loop body
LE: loop exit
PB: predicated region body
PF: predicated region fallthrough
CT: control target
= control target key end

     0   :  { %8 = vsyncpa [#allocation3], 0  ;;  %s779_s12 = smov [#allocation2]   ;;  %s1061_s0 = inlined_call_operand.vmem [shape: f32[64,16], index: 0, kind: input, shape index: {}]   ;;  %s1062_s1 = inlined_call_operand.hbm [shape: bf16[16,1024], index: 1, kind: input, shape index: {}]   ;;  %s1063_s2 = inlined_call_operand.vmem [shape: f32[1,1024], index: 2, kind: input, shape index: {}]   ;;  %s1064_s3 = inlined_call_operand.vmem [shape: bf16[64,1024], index: 3, kind: output, shape index: {}]  }
   0x1   :  { %s16_s13 = sshll.u32 %s779_s12, 4  ;;  %s17_s13 = int_to_ptr.vmem [resolvable:$true] %s16_s13 }
   0x2   :  { %s765_s14 = scalar_lea.vmem %s17_s13, 1024  ;;  %p770_p1 = scmp.lt.s32.totalorder %s17_s13, %s17_s13 }
   0x3   :  { %p766_p0 = scmp.ne.s32.totalorder %s17_s13, %s765_s14  ;;  %p771_p2 = scmp.lt.s32.totalorder %s765_s14, %s765_s14 }
   0x5   :  { %p772_p3 = por %p771_p2, %p770_p1 }
   0x7   :  { %p773_p4 = pnand %p772_p3, %p766_p0 }
   0x9   :  { %776 = shalt.err (!%p773_p4)
}
   0xa   :  { %s780_s15 = smov 512   ;;  %s781_s16 = smov 32  }
   0xb   :  { %22 = dma.hbm_to_vmem [thread:$0]  %s1062_s1, 1024, %s17_s13, [#allocation3], %s780_s15, %s780_s15, %s781_s16  }
   0xc   :  { %777 = dma.done.wait [#allocation3], 1024  }
   0xd   :  { %778 = vsyncadd [#allocation3], 4294966272  ;;  %v782_v0 = vmov 0   ;;  %v41_v1 = vld [vmem:[#allocation2] sm:$0xff]  ;;  %v42_v3 = vld [vmem:[#allocation2 + $0x8] sm:$0xff]  ;;  %vm131_vm0 = vcmask 130048   ;;  %v51_v29 = vlaneseq }
   0xe   :  { %176 = vmatprep.mubr.bf16.mxu0 %v782_v0  ;;  %249 = vmatprep.mubr.bf16.mxu1 %v782_v0  ;;  %v45_v2 = vld [vmem:[#allocation2 + $0x20] sm:$0xff]  ;;  %v46_v5 = vld [vmem:[#allocation2 + $0x28] sm:$0xff]  ;;  %v43_v11 = vld [vmem:[#allocation2 + $0x10] sm:$0xff] }
   0xf   :  { %v666_v4 = vcombine.high %v41_v1, %v45_v2  ;;  %v665_v6 = vcombine.low %v41_v1, %v45_v2  ;;  %v29_v7 = vld [vmem:[%s1061_s0] sm:$0xff]  ;;  %v30_v8 = vld [vmem:[%s1061_s0 + $0x8] sm:$0xff]  ;;  %v668_v9 = vcombine.high %v42_v3, %v46_v5  ;;  %v667_v10 = vcombine.low %v42_v3, %v46_v5  ;;  %v47_v12 = vld [vmem:[#allocation2 + $0x30] sm:$0xff] }
  0x10   :  { %v44_v13 = vld [vmem:[#allocation2 + $0x18] sm:$0xff]  ;;  %v37_v14 = vpack.c.bf16 %v30_v8, %v29_v7  ;;  %v670_v15 = vcombine.high %v43_v11, %v47_v12  ;;  %v669_v17 = vcombine.low %v43_v11, %v47_v12  ;;  %v31_v20 = vld [vmem:[%s1061_s0 + $0x10] sm:$0xff]  ;;  %v33_v23 = vld [vmem:[%s1061_s0 + $0x20] sm:$0xff]  ;;  %v862_v30 = vshrl.u32 %v51_v29, 7 }
  0x11   :  { %158 = vmatprep.subr.bf16.mxu0 %v666_v4  ;;  %v48_v16 = vld [vmem:[#allocation2 + $0x38] sm:$0xff]  ;;  %231 = vmatprep.subr.bf16.mxu1 %v668_v9  ;;  %v34_v24 = vld [vmem:[%s1061_s0 + $0x28] sm:$0xff]  ;;  %v35_v26 = vld [vmem:[%s1061_s0 + $0x30] sm:$0xff] }
  0x12   :  { %159 = vmatpush1.bf16.msra.mxu0 %v665_v6  ;;  %v672_v18 = vcombine.high %v44_v13, %v48_v16  ;;  %232 = vmatpush1.bf16.msra.mxu1 %v667_v10  ;;  %v671_v19 = vcombine.low %v44_v13, %v48_v16  ;;  %v32_v21 = vld [vmem:[%s1061_s0 + $0x18] sm:$0xff]  ;;  %v39_v25 = vpack.c.bf16 %v34_v24, %v33_v23  ;;  %v53_v31 = vsub.s32 0, %v862_v30  ;;  %v869_v33 = vld [vmem:[%s1063_s2] sm:$0xff] }
  0x13   :  { %304 = vmatprep.subr.bf16.mxu0 %v670_v15  ;;  %v38_v22 = vpack.c.bf16 %v32_v21, %v31_v20  ;;  %v36_v27 = vld [vmem:[%s1061_s0 + $0x38] sm:$0xff]  ;;  %v57_v32 = vsub.s32 1, %v862_v30  ;;  %v61_v34 = vsub.s32 2, %v862_v30  ;;  %v65_v35 = vsub.s32 3, %v862_v30 }
  0x14   :  { %377 = vmatprep.subr.bf16.mxu1 %v672_v18  ;;  %v40_v28 = vpack.c.bf16 %v36_v27, %v35_v26  ;;  %v874_v36 = vrot.slane %v869_v33, %v53_v31 }
  0x15   :  { %673 = vmatmul.mubr.msk.bf16.vlgmr.msra.gmra.mxu0 %vm131_vm0, %v37_v14  ;;  %677 = vmatmul.mubr.msk.bf16.vlgmr.msra.gmra.mxu1 %vm131_vm0, %v37_v14  ;;  %v877_v37 = vrot.slane %v869_v33, %v57_v32  ;;  %v880_v39 = vrot.slane %v869_v33, %v61_v34  ;;  %v883_v40 = vrot.slane %v869_v33, %v65_v35 }
  0x16   :  { %305 = vmatpush1.bf16.msra.mxu0 %v669_v17  ;;  %378 = vmatpush1.bf16.msra.mxu1 %v671_v19 }
  0x17   :  { %186 = vmatprep.mubr.bf16.mxu0 %v782_v0  ;;  %259 = vmatprep.mubr.bf16.mxu1 %v782_v0 }
  0x1d   :  { %674 = vmatmul.mubr.msk.bf16.gmra.mxu0 %vm131_vm0, %v38_v22  ;;  %678 = vmatmul.mubr.msk.bf16.gmra.mxu1 %vm131_vm0, %v38_v22 }
  0x1e   :  { %196 = vmatprep.mubr.bf16.mxu0 %v782_v0  ;;  %269 = vmatprep.mubr.bf16.mxu1 %v782_v0 }
  0x25   :  { %675 = vmatmul.mubr.msk.bf16.gmra.mxu0 %vm131_vm0, %v39_v25  ;;  %679 = vmatmul.mubr.msk.bf16.gmra.mxu1 %vm131_vm0, %v39_v25 }
  0x26   :  { %206 = vmatprep.mubr.bf16.mxu0 %v782_v0  ;;  %279 = vmatprep.mubr.bf16.mxu1 %v782_v0 }
  0x2d   :  { %676 = vmatmul.mubr.msk.bf16.gmra.mxu0 %vm131_vm0, %v40_v28  ;;  %680 = vmatmul.mubr.msk.bf16.gmra.mxu1 %vm131_vm0, %v40_v28 }
  0x2e   :  { %322 = vmatprep.mubr.bf16.mxu0 %v782_v0  ;;  %395 = vmatprep.mubr.bf16.mxu1 %v782_v0 }
  0x35   :  { %681 = vmatmul.mubr.msk.bf16.vlgmr.msra.gmra.mxu0 %vm131_vm0, %v37_v14  ;;  %685 = vmatmul.mubr.msk.bf16.vlgmr.msra.gmra.mxu1 %vm131_vm0, %v37_v14 }
  0x36   :  { %332 = vmatprep.mubr.bf16.mxu0 %v782_v0  ;;  %405 = vmatprep.mubr.bf16.mxu1 %v782_v0 }
  0x3d   :  { %682 = vmatmul.mubr.msk.bf16.gmra.mxu0 %vm131_vm0, %v38_v22  ;;  %686 = vmatmul.mubr.msk.bf16.gmra.mxu1 %vm131_vm0, %v38_v22 }
  0x3e   :  { %342 = vmatprep.mubr.bf16.mxu0 %v782_v0  ;;  %415 = vmatprep.mubr.bf16.mxu1 %v782_v0 }
  0x45   :  { %683 = vmatmul.mubr.msk.bf16.gmra.mxu0 %vm131_vm0, %v39_v25  ;;  %687 = vmatmul.mubr.msk.bf16.gmra.mxu1 %vm131_vm0, %v39_v25 }
  0x46   :  { %352 = vmatprep.mubr.bf16.mxu0 %v782_v0  ;;  %425 = vmatprep.mubr.bf16.mxu1 %v782_v0 }
  0x4d   :  { %684 = vmatmul.mubr.msk.bf16.gmra.mxu0 %vm131_vm0, %v40_v28  ;;  %688 = vmatmul.mubr.msk.bf16.gmra.mxu1 %vm131_vm0, %v40_v28 }
  0xd5   :  { %v178_v38 = vpop.f32.mrf.mxu0  ;;  %v251_v41 = vpop.f32.mrf.mxu1 }
  0xd6   :  { %v179_v43 = vadd.f32 %v178_v38, %v874_v36  ;;  %v252_v46 = vadd.f32 %v251_v41, %v880_v39 }
  0xd7   :  { %v180_v42 = vpop.f32.mrf.mxu0  ;;  %v253_v45 = vpop.f32.mrf.mxu1 }
  0xd8   :  { %v181_v44 = vadd.f32 %v180_v42, %v877_v37  ;;  %v254_v47 = vadd.f32 %v253_v45, %v883_v40 }
  0xd9   :  { %v182_v48 = vpop.f32.mrf.mxu0  ;;  %v255_v50 = vpop.f32.mrf.mxu1 }
  0xda   :  { %v721_v49 = vpack.c.bf16 %v181_v44, %v179_v43  ;;  %v722_v51 = vpack.c.bf16 %v254_v47, %v252_v46  ;;  %v183_v53 = vadd.f32 %v182_v48, %v874_v36  ;;  %v256_v56 = vadd.f32 %v255_v50, %v880_v39 }
  0xdb   :  { %v184_v52 = vpop.f32.mrf.mxu0  ;;  %v257_v55 = vpop.f32.mrf.mxu1  ;;  %v69_v48 = vsub.s32 4, %v862_v30 }
  0xdc   :  { %628 = vst [vmem:[%s1064_s3] sm:$0xff] %v721_v49  ;;  %v185_v54 = vadd.f32 %v184_v52, %v877_v37  ;;  %629 = vst [vmem:[%s1064_s3 + $0x8] sm:$0xff] %v722_v51  ;;  %v258_v57 = vadd.f32 %v257_v55, %v883_v40  ;;  %v73_v49 = vsub.s32 5, %v862_v30 }
  0xdd   :  { %v188_v58 = vpop.f32.mrf.mxu0  ;;  %v261_v60 = vpop.f32.mrf.mxu1 }
  0xde   :  { %v725_v59 = vpack.c.bf16 %v185_v54, %v183_v53  ;;  %v726_v61 = vpack.c.bf16 %v258_v57, %v256_v56  ;;  %v189_v63 = vadd.f32 %v188_v58, %v874_v36  ;;  %v262_v2 = vadd.f32 %v261_v60, %v880_v39 }
  0xdf   :  { %v190_v62 = vpop.f32.mrf.mxu0  ;;  %v263_v1 = vpop.f32.mrf.mxu1  ;;  %v77_v53 = vsub.s32 6, %v862_v30  ;;  %v81_v54 = vsub.s32 7, %v862_v30 }
  0xe0   :  { %632 = vst [vmem:[%s1064_s3 + $0x20] sm:$0xff] %v725_v59  ;;  %v191_v0 = vadd.f32 %v190_v62, %v877_v37  ;;  %633 = vst [vmem:[%s1064_s3 + $0x28] sm:$0xff] %v726_v61  ;;  %v264_v3 = vadd.f32 %v263_v1, %v883_v40  ;;  %v959_v62 = vrot.slane %v869_v33, %v69_v48 }
  0xe1   :  { %v192_v4 = vpop.f32.mrf.mxu0  ;;  %v265_v6 = vpop.f32.mrf.mxu1 }
  0xe2   :  { %v729_v5 = vpack.c.bf16 %v191_v0, %v189_v63  ;;  %v730_v7 = vpack.c.bf16 %v264_v3, %v262_v2  ;;  %v193_v9 = vadd.f32 %v192_v4, %v874_v36  ;;  %v266_v12 = vadd.f32 %v265_v6, %v880_v39 }
  0xe3   :  { %v194_v8 = vpop.f32.mrf.mxu0  ;;  %v267_v11 = vpop.f32.mrf.mxu1  ;;  %v962_v63 = vrot.slane %v869_v33, %v73_v49 }
  0xe4   :  { %636 = vst [vmem:[%s1064_s3 + $0x40] sm:$0xff] %v729_v5  ;;  %v195_v10 = vadd.f32 %v194_v8, %v877_v37  ;;  %637 = vst [vmem:[%s1064_s3 + $0x48] sm:$0xff] %v730_v7  ;;  %v268_v13 = vadd.f32 %v267_v11, %v883_v40 }
  0xe5   :  { %v198_v14 = vpop.f32.mrf.mxu0  ;;  %v271_v16 = vpop.f32.mrf.mxu1 }
  0xe6   :  { %v733_v15 = vpack.c.bf16 %v195_v10, %v193_v9  ;;  %v734_v17 = vpack.c.bf16 %v268_v13, %v266_v12  ;;  %v199_v19 = vadd.f32 %v198_v14, %v874_v36  ;;  %v272_v22 = vadd.f32 %v271_v16, %v880_v39 }
  0xe7   :  { %v200_v18 = vpop.f32.mrf.mxu0  ;;  %v273_v21 = vpop.f32.mrf.mxu1 }
  0xe8   :  { %640 = vst [vmem:[%s1064_s3 + $0x60] sm:$0xff] %v733_v15  ;;  %v201_v20 = vadd.f32 %v200_v18, %v877_v37  ;;  %641 = vst [vmem:[%s1064_s3 + $0x68] sm:$0xff] %v734_v17  ;;  %v274_v23 = vadd.f32 %v273_v21, %v883_v40 }
  0xe9   :  { %v202_v24 = vpop.f32.mrf.mxu0  ;;  %v275_v26 = vpop.f32.mrf.mxu1 }
  0xea   :  { %v737_v25 = vpack.c.bf16 %v201_v20, %v199_v19  ;;  %v738_v27 = vpack.c.bf16 %v274_v23, %v272_v22  ;;  %v203_v29 = vadd.f32 %v202_v24, %v874_v36  ;;  %v276_v34 = vadd.f32 %v275_v26, %v880_v39 }
  0xeb   :  { %v204_v28 = vpop.f32.mrf.mxu0  ;;  %v277_v32 = vpop.f32.mrf.mxu1 }
  0xec   :  { %644 = vst [vmem:[%s1064_s3 + $0x80] sm:$0xff] %v737_v25  ;;  %v205_v31 = vadd.f32 %v204_v28, %v877_v37  ;;  %645 = vst [vmem:[%s1064_s3 + $0x88] sm:$0xff] %v738_v27  ;;  %v278_v35 = vadd.f32 %v277_v32, %v883_v40 }
  0xed   :  { %v208_v38 = vpop.f32.mrf.mxu0  ;;  %v281_v42 = vpop.f32.mrf.mxu1 }
  0xee   :  { %v741_v41 = vpack.c.bf16 %v205_v31, %v203_v29  ;;  %v742_v43 = vpack.c.bf16 %v278_v35, %v276_v34  ;;  %v209_v45 = vadd.f32 %v208_v38, %v874_v36  ;;  %v282_v50 = vadd.f32 %v281_v42, %v880_v39 }
  0xef   :  { %v210_v44 = vpop.f32.mrf.mxu0  ;;  %v283_v47 = vpop.f32.mrf.mxu1 }
  0xf0   :  { %648 = vst [vmem:[%s1064_s3 + $0xa0] sm:$0xff] %v741_v41  ;;  %v211_v46 = vadd.f32 %v210_v44, %v877_v37  ;;  %649 = vst [vmem:[%s1064_s3 + $0xa8] sm:$0xff] %v742_v43  ;;  %v284_v51 = vadd.f32 %v283_v47, %v883_v40 }
  0xf1   :  { %v212_v52 = vpop.f32.mrf.mxu0  ;;  %v285_v56 = vpop.f32.mrf.mxu1 }
  0xf2   :  { %v745_v55 = vpack.c.bf16 %v211_v46, %v209_v45  ;;  %v746_v57 = vpack.c.bf16 %v284_v51, %v282_v50  ;;  %v213_v59 = vadd.f32 %v212_v52, %v874_v36  ;;  %v286_v30 = vadd.f32 %v285_v56, %v880_v39 }
  0xf3   :  { %v214_v58 = vpop.f32.mrf.mxu0  ;;  %v287_v61 = vpop.f32.mrf.mxu1  ;;  %v970_v36 = vrot.slane %v869_v33, %v77_v53 }
  0xf4   :  { %652 = vst [vmem:[%s1064_s3 + $0xc0] sm:$0xff] %v745_v55  ;;  %v215_v60 = vadd.f32 %v214_v58, %v877_v37  ;;  %653 = vst [vmem:[%s1064_s3 + $0xc8] sm:$0xff] %v746_v57  ;;  %v288_v0 = vadd.f32 %v287_v61, %v883_v40  ;;  %v973_v37 = vrot.slane %v869_v33, %v81_v54 }
  0xf5   :  { %v324_v1 = vpop.f32.mrf.mxu0  ;;  %v397_v3 = vpop.f32.mrf.mxu1 }
  0xf6   :  { %v749_v2 = vpack.c.bf16 %v215_v60, %v213_v59  ;;  %v750_v4 = vpack.c.bf16 %v288_v0, %v286_v30  ;;  %v325_v6 = vadd.f32 %v324_v1, %v959_v62  ;;  %v398_v33 = vadd.f32 %v397_v3, %v970_v36 }
  0xf7   :  { %v326_v5 = vpop.f32.mrf.mxu0  ;;  %v399_v40 = vpop.f32.mrf.mxu1 }
  0xf8   :  { %656 = vst [vmem:[%s1064_s3 + $0xe0] sm:$0xff] %v749_v2  ;;  %v327_v39 = vadd.f32 %v326_v5, %v962_v63  ;;  %657 = vst [vmem:[%s1064_s3 + $0xe8] sm:$0xff] %v750_v4  ;;  %v400_v7 = vadd.f32 %v399_v40, %v973_v37 }
  0xf9   :  { %v328_v8 = vpop.f32.mrf.mxu0  ;;  %v401_v10 = vpop.f32.mrf.mxu1 }
  0xfa   :  { %v723_v9 = vpack.c.bf16 %v327_v39, %v325_v6  ;;  %v724_v11 = vpack.c.bf16 %v400_v7, %v398_v33  ;;  %v329_v13 = vadd.f32 %v328_v8, %v959_v62  ;;  %v402_v16 = vadd.f32 %v401_v10, %v970_v36 }
  0xfb   :  { %v330_v12 = vpop.f32.mrf.mxu0  ;;  %v403_v15 = vpop.f32.mrf.mxu1 }
  0xfc   :  { %630 = vst [vmem:[%s1064_s3 + $0x10] sm:$0xff] %v723_v9  ;;  %v331_v14 = vadd.f32 %v330_v12, %v962_v63  ;;  %631 = vst [vmem:[%s1064_s3 + $0x18] sm:$0xff] %v724_v11  ;;  %v404_v17 = vadd.f32 %v403_v15, %v973_v37 }
  0xfd   :  { %v334_v18 = vpop.f32.mrf.mxu0  ;;  %v407_v20 = vpop.f32.mrf.mxu1 }
  0xfe   :  { %v727_v19 = vpack.c.bf16 %v331_v14, %v329_v13  ;;  %v728_v21 = vpack.c.bf16 %v404_v17, %v402_v16  ;;  %v335_v23 = vadd.f32 %v334_v18, %v959_v62  ;;  %v408_v26 = vadd.f32 %v407_v20, %v970_v36 }
  0xff   :  { %v336_v22 = vpop.f32.mrf.mxu0  ;;  %v409_v25 = vpop.f32.mrf.mxu1 }
 0x100   :  { %634 = vst [vmem:[%s1064_s3 + $0x30] sm:$0xff] %v727_v19  ;;  %v337_v24 = vadd.f32 %v336_v22, %v962_v63  ;;  %635 = vst [vmem:[%s1064_s3 + $0x38] sm:$0xff] %v728_v21  ;;  %v410_v27 = vadd.f32 %v409_v25, %v973_v37 }
 0x101   :  { %v338_v28 = vpop.f32.mrf.mxu0  ;;  %v411_v31 = vpop.f32.mrf.mxu1 }
 0x102   :  { %v731_v29 = vpack.c.bf16 %v337_v24, %v335_v23  ;;  %v732_v32 = vpack.c.bf16 %v410_v27, %v408_v26  ;;  %v339_v35 = vadd.f32 %v338_v28, %v959_v62  ;;  %v412_v42 = vadd.f32 %v411_v31, %v970_v36 }
 0x103   :  { %v340_v34 = vpop.f32.mrf.mxu0  ;;  %v413_v41 = vpop.f32.mrf.mxu1 }
 0x104   :  { %638 = vst [vmem:[%s1064_s3 + $0x50] sm:$0xff] %v731_v29  ;;  %v341_v38 = vadd.f32 %v340_v34, %v962_v63  ;;  %639 = vst [vmem:[%s1064_s3 + $0x58] sm:$0xff] %v732_v32  ;;  %v414_v43 = vadd.f32 %v413_v41, %v973_v37 }
 0x105   :  { %v344_v44 = vpop.f32.mrf.mxu0  ;;  %v417_v46 = vpop.f32.mrf.mxu1 }
 0x106   :  { %v735_v45 = vpack.c.bf16 %v341_v38, %v339_v35  ;;  %v736_v47 = vpack.c.bf16 %v414_v43, %v412_v42  ;;  %v345_v49 = vadd.f32 %v344_v44, %v959_v62  ;;  %v418_v52 = vadd.f32 %v417_v46, %v970_v36 }
 0x107   :  { %v346_v48 = vpop.f32.mrf.mxu0  ;;  %v419_v51 = vpop.f32.mrf.mxu1 }
 0x108   :  { %642 = vst [vmem:[%s1064_s3 + $0x70] sm:$0xff] %v735_v45  ;;  %v347_v50 = vadd.f32 %v346_v48, %v962_v63  ;;  %643 = vst [vmem:[%s1064_s3 + $0x78] sm:$0xff] %v736_v47  ;;  %v420_v53 = vadd.f32 %v419_v51, %v973_v37 }
 0x109   :  { %v348_v54 = vpop.f32.mrf.mxu0  ;;  %v421_v56 = vpop.f32.mrf.mxu1 }
 0x10a   :  { %v739_v55 = vpack.c.bf16 %v347_v50, %v345_v49  ;;  %v740_v57 = vpack.c.bf16 %v420_v53, %v418_v52  ;;  %v349_v59 = vadd.f32 %v348_v54, %v959_v62  ;;  %v422_v30 = vadd.f32 %v421_v56, %v970_v36 }
 0x10b   :  { %v350_v58 = vpop.f32.mrf.mxu0  ;;  %v423_v61 = vpop.f32.mrf.mxu1 }
 0x10c   :  { %646 = vst [vmem:[%s1064_s3 + $0x90] sm:$0xff] %v739_v55  ;;  %v351_v60 = vadd.f32 %v350_v58, %v962_v63  ;;  %647 = vst [vmem:[%s1064_s3 + $0x98] sm:$0xff] %v740_v57  ;;  %v424_v0 = vadd.f32 %v423_v61, %v973_v37 }
 0x10d   :  { %v354_v1 = vpop.f32.mrf.mxu0  ;;  %v427_v3 = vpop.f32.mrf.mxu1 }
 0x10e   :  { %v743_v2 = vpack.c.bf16 %v351_v60, %v349_v59  ;;  %v744_v4 = vpack.c.bf16 %v424_v0, %v422_v30  ;;  %v355_v6 = vadd.f32 %v354_v1, %v959_v62  ;;  %v428_v33 = vadd.f32 %v427_v3, %v970_v36 }
 0x10f   :  { %v356_v5 = vpop.f32.mrf.mxu0  ;;  %v429_v40 = vpop.f32.mrf.mxu1 }
 0x110   :  { %650 = vst [vmem:[%s1064_s3 + $0xb0] sm:$0xff] %v743_v2  ;;  %v357_v39 = vadd.f32 %v356_v5, %v962_v63  ;;  %651 = vst [vmem:[%s1064_s3 + $0xb8] sm:$0xff] %v744_v4  ;;  %v430_v7 = vadd.f32 %v429_v40, %v973_v37 }
 0x111   :  { %v358_v8 = vpop.f32.mrf.mxu0  ;;  %v431_v10 = vpop.f32.mrf.mxu1 }
 0x112   :  { %v747_v9 = vpack.c.bf16 %v357_v39, %v355_v6  ;;  %v748_v11 = vpack.c.bf16 %v430_v7, %v428_v33  ;;  %v359_v13 = vadd.f32 %v358_v8, %v959_v62  ;;  %v432_v16 = vadd.f32 %v431_v10, %v970_v36 }
 0x113   :  { %v360_v12 = vpop.f32.mrf.mxu0  ;;  %v433_v15 = vpop.f32.mrf.mxu1 }
 0x114   :  { %654 = vst [vmem:[%s1064_s3 + $0xd0] sm:$0xff] %v747_v9  ;;  %v361_v14 = vadd.f32 %v360_v12, %v962_v63  ;;  %655 = vst [vmem:[%s1064_s3 + $0xd8] sm:$0xff] %v748_v11  ;;  %v434_v17 = vadd.f32 %v433_v15, %v973_v37 }
 0x116   :  { %v751_v18 = vpack.c.bf16 %v361_v14, %v359_v13  ;;  %v752_v19 = vpack.c.bf16 %v434_v17, %v432_v16 }
 0x118   :  { %658 = vst [vmem:[%s1064_s3 + $0xf0] sm:$0xff] %v751_v18  ;;  %659 = vst [vmem:[%s1064_s3 + $0xf8] sm:$0xff] %v752_v19 }
 0x119   :  { %664 = vsyncpa [#allocation3], 1 }

// kernel: _lambda_.5
= control target key start
LH: loop header
LB: loop body
LE: loop exit
PB: predicated region body
PF: predicated region fallthrough
CT: control target
= control target key end

     0   :  { %s628_s3 = inlined_call_operand.vmem [shape: bf16[128,128], index: 3, kind: input, shape index: {}]   ;;  %s629_s2 = inlined_call_operand.vmem [shape: bf16[128,128], index: 2, kind: input, shape index: {}]   ;;  %s630_s1 = inlined_call_operand.vmem [shape: bf16[64,128], index: 1, kind: input, shape index: {}]   ;;  %s631_s0 = inlined_call_operand.vmem [shape: bf16[64,128], index: 0, kind: input, shape index: {}]   ;;  %s632_s4 = inlined_call_operand.vmem [shape: f32[1,128], index: 4, kind: input, shape index: {}]   ;;  %s633_s5 = inlined_call_operand.vmem [shape: f32[64,128], index: 5, kind: output, shape index: {}]  }
   0x1   :  { %v475_v0 = vld [vmem:[%s628_s3 + $0x38] sm:$0xff]   ;;  %v477_v2 = vld [vmem:[%s628_s3 + $0x30] sm:$0xff]   ;;  %v479_v4 = vld [vmem:[%s628_s3 + $0x28] sm:$0xff]  }
   0x2   :  { %v476_v1 = vld [vmem:[%s629_s2 + $0x38] sm:$0xff]   ;;  %427 = vmatprep.subr.bf16.mxu0 %v475_v0  ;;  %v478_v3 = vld [vmem:[%s629_s2 + $0x30] sm:$0xff]   ;;  %v480_v5 = vld [vmem:[%s629_s2 + $0x28] sm:$0xff]  }
   0x3   :  { %451 = vmatprep.subr.bf16.mxu1 %v476_v1  ;;  %428 = vmatpush3.bf16.msra.mxu0 %v475_v0  ;;  %v481_v6 = vld [vmem:[%s628_s3 + $0x20] sm:$0xff]   ;;  %v483_v8 = vld [vmem:[%s628_s3 + $0x18] sm:$0xff]   ;;  %v485_v10 = vld [vmem:[%s628_s3 + $0x10] sm:$0xff]  }
   0x4   :  { %452 = vmatpush3.bf16.msra.mxu1 %v476_v1  ;;  %429 = vmatprep.subr.bf16.mxu0 %v477_v2  ;;  %v482_v7 = vld [vmem:[%s629_s2 + $0x20] sm:$0xff]   ;;  %v484_v9 = vld [vmem:[%s629_s2 + $0x18] sm:$0xff]   ;;  %v486_v11 = vld [vmem:[%s629_s2 + $0x10] sm:$0xff]  }
   0x5   :  { %453 = vmatprep.subr.bf16.mxu1 %v478_v3  ;;  %v491_v12 = vld [vmem:[%s630_s1] sm:$0xff]   ;;  %v487_v14 = vld [vmem:[%s628_s3 + $0x8] sm:$0xff]   ;;  %v495_v20 = vld [vmem:[%s630_s1 + $0x10] sm:$0xff]  }
   0x6   :  { %v492_v13 = vld [vmem:[%s631_s0] sm:$0xff]   ;;  %443 = vmatprep.mubr.bf16.mxu0 %v491_v12  ;;  %v488_v15 = vld [vmem:[%s629_s2 + $0x8] sm:$0xff]   ;;  %v496_v21 = vld [vmem:[%s631_s0 + $0x10] sm:$0xff]  }
   0x7   :  { %430 = vmatpush3.bf16.msra.mxu0 %v477_v2  ;;  %467 = vmatprep.mubr.bf16.mxu1 %v492_v13  ;;  %v489_v16 = vld [vmem:[%s628_s3] sm:$0xff]   ;;  %v493_v18 = vld [vmem:[%s630_s1 + $0x8] sm:$0xff]   ;;  %v497_v22 = vld [vmem:[%s630_s1 + $0x18] sm:$0xff]  }
   0x8   :  { %454 = vmatpush3.bf16.msra.mxu1 %v478_v3  ;;  %431 = vmatprep.subr.bf16.mxu0 %v479_v4  ;;  %v490_v17 = vld [vmem:[%s629_s2] sm:$0xff]   ;;  %v494_v19 = vld [vmem:[%s631_s0 + $0x8] sm:$0xff]   ;;  %v498_v23 = vld [vmem:[%s631_s0 + $0x18] sm:$0xff]  }
   0x9   :  { %455 = vmatprep.subr.bf16.mxu1 %v480_v5  ;;  %v402_v26 = vld [vmem:[%s632_s4] ss:$0 sm:$0xff] }
   0xb   :  { %432 = vmatpush3.bf16.msra.mxu0 %v479_v4 }
   0xc   :  { %456 = vmatpush3.bf16.msra.mxu1 %v480_v5  ;;  %433 = vmatprep.subr.bf16.mxu0 %v481_v6 }
   0xd   :  { %457 = vmatprep.subr.bf16.mxu1 %v482_v7 }
   0xf   :  { %434 = vmatpush3.bf16.msra.mxu0 %v481_v6 }
  0x10   :  { %458 = vmatpush3.bf16.msra.mxu1 %v482_v7  ;;  %435 = vmatprep.subr.bf16.mxu0 %v483_v8 }
  0x11   :  { %459 = vmatprep.subr.bf16.mxu1 %v484_v9 }
  0x13   :  { %436 = vmatpush3.bf16.msra.mxu0 %v483_v8 }
  0x14   :  { %460 = vmatpush3.bf16.msra.mxu1 %v484_v9  ;;  %437 = vmatprep.subr.bf16.mxu0 %v485_v10 }
  0x15   :  { %461 = vmatprep.subr.bf16.mxu1 %v486_v11 }
  0x17   :  { %438 = vmatpush3.bf16.msra.mxu0 %v485_v10 }
  0x18   :  { %462 = vmatpush3.bf16.msra.mxu1 %v486_v11  ;;  %439 = vmatprep.subr.bf16.mxu0 %v487_v14 }
  0x19   :  { %463 = vmatprep.subr.bf16.mxu1 %v488_v15 }
  0x1b   :  { %440 = vmatpush3.bf16.msra.mxu0 %v487_v14 }
  0x1c   :  { %464 = vmatpush3.bf16.msra.mxu1 %v488_v15  ;;  %441 = vmatprep.subr.bf16.mxu0 %v489_v16 }
  0x1d   :  { %465 = vmatprep.subr.bf16.mxu1 %v490_v17 }
  0x1f   :  { %442 = vmatpush3.bf16.msra.mxu0 %v489_v16 }
  0x20   :  { %466 = vmatpush3.bf16.msra.mxu1 %v490_v17 }
  0x22   :  { %444 = vmatmul.mubr.bf16.vlgmr.msra.gmra.mxu0 %v493_v18 }
  0x23   :  { %468 = vmatmul.mubr.bf16.vlgmr.msra.gmra.mxu1 %v494_v19  ;;  %447 = vmatprep.mubr.bf16.mxu0 %v495_v20 }
  0x24   :  { %471 = vmatprep.mubr.bf16.mxu1 %v496_v21 }
  0x2a   :  { %448 = vmatmul.mubr.bf16.gmra.mxu0 %v497_v22 }
  0x2b   :  { %472 = vmatmul.mubr.bf16.gmra.mxu1 %v498_v23 }
  0xe2   :  { %v445_v24 = vpop.f32.mrf.mxu0 }
  0xe3   :  { %v469_v25 = vpop.f32.mrf.mxu1 }
  0xe4   :  { %v321_v27 = vadd.f32 %v469_v25, %v445_v24  ;;  %v175_v28 = vpop.f32.mrf.mxu0 }
  0xe5   :  { %v312_v29 = vpop.f32.mrf.mxu1 }
  0xe6   :  { %v352_v30 = vadd.f32 %v402_v26, %v321_v27  ;;  %v313_v31 = vadd.f32 %v312_v29, %v175_v28  ;;  %v446_v32 = vpop.f32.mrf.mxu0 }
  0xe7   :  { %v470_v33 = vpop.f32.mrf.mxu1 }
  0xe8   :  { %v360_v34 = vmax.f32 %v352_v30, 0.0  ;;  %v350_v35 = vadd.f32 %v402_v26, %v313_v31  ;;  %v324_v36 = vadd.f32 %v470_v33, %v446_v32  ;;  %v178_v37 = vpop.f32.mrf.mxu0 }
  0xe9   :  { %v315_v38 = vpop.f32.mrf.mxu1 }
  0xea   :  { %368 = vst [vmem:[%s633_s5 + $0x10] sm:$0xff] %v360_v34  ;;  %v358_v39 = vmax.f32 %v350_v35, 0.0  ;;  %v353_v40 = vadd.f32 %v402_v26, %v324_v36  ;;  %v316_v41 = vadd.f32 %v315_v38, %v178_v37  ;;  %v449_v42 = vpop.f32.mrf.mxu0 }
  0xeb   :  { %v473_v43 = vpop.f32.mrf.mxu1 }
  0xec   :  { %366 = vst [vmem:[%s633_s5] sm:$0xff] %v358_v39  ;;  %v361_v44 = vmax.f32 %v353_v40, 0.0  ;;  %v351_v45 = vadd.f32 %v402_v26, %v316_v41  ;;  %v337_v46 = vadd.f32 %v473_v43, %v449_v42  ;;  %v191_v47 = vpop.f32.mrf.mxu0 }
  0xed   :  { %v328_v48 = vpop.f32.mrf.mxu1 }
  0xee   :  { %369 = vst [vmem:[%s633_s5 + $0x18] sm:$0xff] %v361_v44  ;;  %v359_v49 = vmax.f32 %v351_v45, 0.0  ;;  %v356_v50 = vadd.f32 %v402_v26, %v337_v46  ;;  %v329_v51 = vadd.f32 %v328_v48, %v191_v47  ;;  %v450_v52 = vpop.f32.mrf.mxu0 }
  0xef   :  { %v474_v53 = vpop.f32.mrf.mxu1 }
  0xf0   :  { %367 = vst [vmem:[%s633_s5 + $0x8] sm:$0xff] %v359_v49  ;;  %v364_v54 = vmax.f32 %v356_v50, 0.0  ;;  %v354_v55 = vadd.f32 %v402_v26, %v329_v51  ;;  %v340_v56 = vadd.f32 %v474_v53, %v450_v52  ;;  %v194_v57 = vpop.f32.mrf.mxu0 }
  0xf1   :  { %v331_v58 = vpop.f32.mrf.mxu1 }
  0xf2   :  { %372 = vst [vmem:[%s633_s5 + $0x30] sm:$0xff] %v364_v54  ;;  %v362_v59 = vmax.f32 %v354_v55, 0.0  ;;  %v357_v60 = vadd.f32 %v402_v26, %v340_v56  ;;  %v332_v61 = vadd.f32 %v331_v58, %v194_v57 }
  0xf4   :  { %370 = vst [vmem:[%s633_s5 + $0x20] sm:$0xff] %v362_v59  ;;  %v365_v62 = vmax.f32 %v357_v60, 0.0  ;;  %v355_v63 = vadd.f32 %v402_v26, %v332_v61 }
  0xf6   :  { %373 = vst [vmem:[%s633_s5 + $0x38] sm:$0xff] %v365_v62  ;;  %v363_v0 = vmax.f32 %v355_v63, 0.0 }
  0xf8   :  { %371 = vst [vmem:[%s633_s5 + $0x28] sm:$0xff] %v363_v0 }

// kernel: _lambda_.4
= control target key start
LH: loop header
LB: loop body
LE: loop exit
PB: predicated region body
PF: predicated region fallthrough
CT: control target
= control target key end

     0   :  { %v8542_v2 = vmov 0   ;;  %s8533_s0 = inlined_call_operand.vmem [shape: bf16[8,8,1024], index: 0, kind: input, shape index: {}, may-alias: {0,1}]   ;;  %s8534_s1 = inlined_call_operand.vmem [shape: bf16[8,8,1024], index: 1, kind: input, shape index: {}, may-alias: {0,1}]   ;;  %s8535_s2 = inlined_call_operand.vmem [shape: bf16[128,512], index: 2, kind: input, shape index: {}]   ;;  %s8536_s3 = inlined_call_operand.vmem [shape: bf16[128,512], index: 3, kind: input, shape index: {}]   ;;  %s8537_s4 = inlined_call_operand.vmem [shape: f32[2,8,128], index: 4, kind: input, shape index: {}]   ;;  %s8538_s5 = inlined_call_operand.vmem [shape: f32[2,8,128], index: 5, kind: input, shape index: {}]   ;;  %s8539_s6 = inlined_call_operand.vmem [shape: bf16[8,8,128], index: 6, kind: output, shape index: {0}]   ;;  %s8540_s7 = inlined_call_operand.vmem [shape: bf16[8,8,128], index: 7, kind: output, shape index: {1}]   ;;  %s8541_s8 = inlined_call_operand.vmem [shape: f32[2,8,128], index: 8, kind: output, shape index: {2}]  }
   0x1   :  { %v6498_v0 = vld [vmem:[%s8535_s2 + $0xe4] ss:$16 sps:$4 sm:$0xff]   ;;  %v6503_v1 = vld [vmem:[%s8535_s2 + $0xe0] ss:$16 sps:$4 sm:$0xff]   ;;  %392 = vmatprep.mubr.bf16.mxu0 %v8542_v2  ;;  %433 = vmatprep.mubr.bf16.mxu1 %v8542_v2  ;;  %v6528_v6 = vld [vmem:[%s8535_s2 + $0xec] ss:$16 sps:$4 sm:$0xff]  }
   0x2   :  { %360 = vmatprep.subr.bf16.mxu0 %v6498_v0  ;;  %v6511_v3 = vld [vmem:[%s8535_s2 + $0xc4] ss:$16 sps:$4 sm:$0xff]   ;;  %v6517_v4 = vld [vmem:[%s8535_s2 + $0xc0] ss:$16 sps:$4 sm:$0xff]   ;;  %v6533_v7 = vld [vmem:[%s8535_s2 + $0xe8] ss:$16 sps:$4 sm:$0xff]   ;;  %401 = vmatprep.subr.bf16.mxu1 %v6528_v6 }
   0x3   :  { %361 = vmatpush1.bf16.msra.mxu0 %v6503_v1  ;;  %v6523_v5 = vld [vmem:[%s8535_s2 + $0xa4] ss:$16 sps:$4 sm:$0xff]   ;;  %v6539_v8 = vld [vmem:[%s8535_s2 + $0xa0] ss:$16 sps:$4 sm:$0xff]   ;;  %402 = vmatpush1.bf16.msra.mxu1 %v6533_v7  ;;  %v6552_v10 = vld [vmem:[%s8535_s2 + $0xcc] ss:$16 sps:$4 sm:$0xff]  }
   0x4   :  { %362 = vmatprep.subr.bf16.mxu0 %v6511_v3  ;;  %v6546_v9 = vld [vmem:[%s8535_s2 + $0x84] ss:$16 sps:$4 sm:$0xff]   ;;  %v6557_v11 = vld [vmem:[%s8535_s2 + $0xc8] ss:$16 sps:$4 sm:$0xff]   ;;  %403 = vmatprep.subr.bf16.mxu1 %v6552_v10  ;;  %v6564_v12 = vld [vmem:[%s8535_s2 + $0x80] ss:$16 sps:$4 sm:$0xff]  }
   0x5   :  { %v6569_v13 = vld [vmem:[%s8535_s2 + $0x64] ss:$16 sps:$4 sm:$0xff]   ;;  %v6574_v14 = vld [vmem:[%s8535_s2 + $0xac] ss:$16 sps:$4 sm:$0xff]   ;;  %v6581_v15 = vld [vmem:[%s8535_s2 + $0xa8] ss:$16 sps:$4 sm:$0xff]  }
   0x6   :  { %v6587_v16 = vld [vmem:[%s8535_s2 + $0x8c] ss:$16 sps:$4 sm:$0xff]   ;;  %v6593_v17 = vld [vmem:[%s8535_s2 + $0x60] ss:$16 sps:$4 sm:$0xff]   ;;  %v6599_v18 = vld [vmem:[%s8535_s2 + $0x44] ss:$16 sps:$4 sm:$0xff]  }
   0x7   :  { %363 = vmatpush1.bf16.msra.mxu0 %v6517_v4  ;;  %404 = vmatpush1.bf16.msra.mxu1 %v6557_v11  ;;  %v6605_v19 = vld [vmem:[%s8535_s2 + $0x88] ss:$16 sps:$4 sm:$0xff]   ;;  %v6611_v20 = vld [vmem:[%s8535_s2 + $0x6c] ss:$16 sps:$4 sm:$0xff]   ;;  %v6617_v21 = vld [vmem:[%s8535_s2 + $0x40] ss:$16 sps:$4 sm:$0xff]  }
   0x8   :  { %364 = vmatprep.subr.bf16.mxu0 %v6523_v5  ;;  %405 = vmatprep.subr.bf16.mxu1 %v6574_v14  ;;  %v6622_v22 = vld [vmem:[%s8535_s2 + $0x24] ss:$16 sps:$4 sm:$0xff]   ;;  %v6629_v23 = vld [vmem:[%s8535_s2 + $0x68] ss:$16 sps:$4 sm:$0xff]   ;;  %v6635_v24 = vld [vmem:[%s8535_s2 + $0x4c] ss:$16 sps:$4 sm:$0xff]  }
   0x9   :  { %v6640_v25 = vld [vmem:[%s8535_s2 + $0x20] ss:$16 sps:$4 sm:$0xff]   ;;  %v6646_v26 = vld [vmem:[%s8535_s2 + $0x4] ss:$16 sps:$4 sm:$0xff]   ;;  %v6653_v27 = vld [vmem:[%s8535_s2 + $0x48] ss:$16 sps:$4 sm:$0xff]  }
   0xa   :  { %v6659_v28 = vld [vmem:[%s8535_s2 + $0x2c] ss:$16 sps:$4 sm:$0xff]   ;;  %v6664_v29 = vld [vmem:[%s8535_s2] ss:$16 sps:$4 sm:$0xff]   ;;  %v6673_v31 = vld [vmem:[%s8536_s3 + $0xe4] ss:$16 sps:$4 sm:$0xff]  }
   0xb   :  { %365 = vmatpush1.bf16.msra.mxu0 %v6539_v8  ;;  %406 = vmatpush1.bf16.msra.mxu1 %v6581_v15  ;;  %v151_v30 = vld [vmem:[%s8537_s4] sm:$0xff]  ;;  %v6680_v32 = vld [vmem:[%s8535_s2 + $0x28] ss:$16 sps:$4 sm:$0xff]   ;;  %v6686_v33 = vld [vmem:[%s8535_s2 + $0xc] ss:$16 sps:$4 sm:$0xff]  }
   0xc   :  { %366 = vmatprep.subr.bf16.mxu0 %v6546_v9  ;;  %407 = vmatprep.subr.bf16.mxu1 %v6587_v16  ;;  %v167_v34 = vpack.c.bf16 %v151_v30, %v151_v30  ;;  %v6691_v35 = vld [vmem:[%s8536_s3 + $0xe0] ss:$16 sps:$4 sm:$0xff]   ;;  %v6697_v36 = vld [vmem:[%s8536_s3 + $0xc4] ss:$16 sps:$4 sm:$0xff]   ;;  %v6704_v37 = vld [vmem:[%s8535_s2 + $0x8] ss:$16 sps:$4 sm:$0xff]  }
   0xd   :  { %v6710_v38 = vld [vmem:[%s8536_s3 + $0xec] ss:$16 sps:$4 sm:$0xff]   ;;  %v6715_v39 = vld [vmem:[%s8536_s3 + $0xc0] ss:$16 sps:$4 sm:$0xff]   ;;  %v6721_v40 = vld [vmem:[%s8536_s3 + $0xa4] ss:$16 sps:$4 sm:$0xff]  }
   0xe   :  { %v6729_v41 = vld [vmem:[%s8536_s3 + $0xe8] ss:$16 sps:$4 sm:$0xff]   ;;  %v6735_v42 = vld [vmem:[%s8536_s3 + $0xcc] ss:$16 sps:$4 sm:$0xff]   ;;  %v6741_v43 = vld [vmem:[%s8536_s3 + $0xa0] ss:$16 sps:$4 sm:$0xff]  }
   0xf   :  { %367 = vmatpush1.bf16.msra.mxu0 %v6564_v12  ;;  %408 = vmatpush1.bf16.msra.mxu1 %v6605_v19  ;;  %v6747_v44 = vld [vmem:[%s8536_s3 + $0x84] ss:$16 sps:$4 sm:$0xff]   ;;  %v6753_v45 = vld [vmem:[%s8536_s3 + $0xc8] ss:$16 sps:$4 sm:$0xff]   ;;  %v6758_v46 = vld [vmem:[%s8536_s3 + $0x80] ss:$16 sps:$4 sm:$0xff]  }
  0x10   :  { %368 = vmatprep.subr.bf16.mxu0 %v6569_v13  ;;  %409 = vmatprep.subr.bf16.mxu1 %v6611_v20  ;;  %v6764_v47 = vld [vmem:[%s8536_s3 + $0xac] ss:$16 sps:$4 sm:$0xff]   ;;  %v6770_v48 = vld [vmem:[%s8536_s3 + $0x64] ss:$16 sps:$4 sm:$0xff]   ;;  %v6776_v49 = vld [vmem:[%s8536_s3 + $0xa8] ss:$16 sps:$4 sm:$0xff]  }
  0x11   :  { %v6781_v50 = vld [vmem:[%s8536_s3 + $0x8c] ss:$16 sps:$4 sm:$0xff]   ;;  %v6788_v51 = vld [vmem:[%s8536_s3 + $0x60] ss:$16 sps:$4 sm:$0xff]   ;;  %v6794_v52 = vld [vmem:[%s8536_s3 + $0x44] ss:$16 sps:$4 sm:$0xff]  }
  0x12   :  { %v6799_v53 = vld [vmem:[%s8536_s3 + $0x88] ss:$16 sps:$4 sm:$0xff]   ;;  %v6805_v54 = vld [vmem:[%s8536_s3 + $0x6c] ss:$16 sps:$4 sm:$0xff]   ;;  %v6812_v55 = vld [vmem:[%s8536_s3 + $0x40] ss:$16 sps:$4 sm:$0xff]  }
  0x13   :  { %369 = vmatpush1.bf16.msra.mxu0 %v6593_v17  ;;  %410 = vmatpush1.bf16.msra.mxu1 %v6629_v23  ;;  %8556 = vst [vmem:[#allocation8_spill] sm:$0xff] %v6812_v55  ;;  %v6818_v56 = vld [vmem:[%s8536_s3 + $0x24] ss:$16 sps:$4 sm:$0xff]   ;;  %v6823_v57 = vld [vmem:[%s8536_s3 + $0x68] ss:$16 sps:$4 sm:$0xff]  }
  0x14   :  { %370 = vmatprep.subr.bf16.mxu0 %v6599_v18  ;;  %411 = vmatprep.subr.bf16.mxu1 %v6635_v24  ;;  %8557 = vst [vmem:[#allocation9_spill] sm:$0xff] %v6818_v56  ;;  %v6829_v58 = vld [vmem:[%s8536_s3 + $0x4c] ss:$16 sps:$4 sm:$0xff]   ;;  %v6836_v59 = vld [vmem:[%s8536_s3 + $0x20] ss:$16 sps:$4 sm:$0xff]  }
  0x15   :  { %v6842_v60 = vld [vmem:[%s8536_s3 + $0x4] ss:$16 sps:$4 sm:$0xff]   ;;  %v6847_v61 = vld [vmem:[%s8536_s3 + $0x48] ss:$16 sps:$4 sm:$0xff]   ;;  %v6853_v62 = vld [vmem:[%s8536_s3 + $0x2c] ss:$16 sps:$4 sm:$0xff]  }
  0x16   :  { %8558 = vst [vmem:[#allocation10_spill] sm:$0xff] %v6842_v60  ;;  %v6860_v63 = vld [vmem:[%s8536_s3] ss:$16 sps:$4 sm:$0xff]   ;;  %v5227_v30 = vld [vmem:[%s8537_s4 + $0x8] sm:$0xff] }
  0x17   :  { %371 = vmatpush1.bf16.msra.mxu0 %v6617_v21  ;;  %412 = vmatpush1.bf16.msra.mxu1 %v6653_v27 }
  0x18   :  { %372 = vmatprep.subr.bf16.mxu0 %v6622_v22  ;;  %413 = vmatprep.subr.bf16.mxu1 %v6659_v28 }
  0x1b   :  { %373 = vmatpush1.bf16.msra.mxu0 %v6640_v25  ;;  %414 = vmatpush1.bf16.msra.mxu1 %v6680_v32 }
  0x1c   :  { %374 = vmatprep.subr.bf16.mxu0 %v6646_v26  ;;  %415 = vmatprep.subr.bf16.mxu1 %v6686_v33 }
  0x1f   :  { %375 = vmatpush1.bf16.msra.mxu0 %v6664_v29  ;;  %416 = vmatpush1.bf16.msra.mxu1 %v6704_v37 }
  0x20   :  { %646 = vmatprep.subr.bf16.mxu0 %v6673_v31  ;;  %687 = vmatprep.subr.bf16.mxu1 %v6710_v38 }
  0x22   :  { %393 = vmatmul.mubr.bf16.vlgmr.msra.gmra.mxu0 %v167_v34  ;;  %434 = vmatmul.mubr.bf16.vlgmr.msra.gmra.mxu1 %v167_v34  ;;  %v6869_v34 = vld [vmem:[%s8536_s3 + $0x28] ss:$16 sps:$4 sm:$0xff]  }
  0x23   :  { %647 = vmatpush1.bf16.msra.mxu0 %v6691_v35  ;;  %678 = vmatprep.mubr.bf16.mxu0 %v8542_v2 }
  0x24   :  { %648 = vmatprep.subr.bf16.mxu0 %v6697_v36  ;;  %688 = vmatpush1.bf16.msra.mxu1 %v6729_v41 }
  0x25   :  { %689 = vmatprep.subr.bf16.mxu1 %v6735_v42  ;;  %719 = vmatprep.mubr.bf16.mxu1 %v8542_v2  ;;  %v6875_v2 = vld [vmem:[%s8536_s3 + $0xc] ss:$16 sps:$4 sm:$0xff]  }
  0x27   :  { %649 = vmatpush1.bf16.msra.mxu0 %v6715_v39 }
  0x28   :  { %650 = vmatprep.subr.bf16.mxu0 %v6721_v40  ;;  %690 = vmatpush1.bf16.msra.mxu1 %v6753_v45 }
  0x29   :  { %691 = vmatprep.subr.bf16.mxu1 %v6764_v47 }
  0x2b   :  { %651 = vmatpush1.bf16.msra.mxu0 %v6741_v43 }
  0x2c   :  { %652 = vmatprep.subr.bf16.mxu0 %v6747_v44  ;;  %692 = vmatpush1.bf16.msra.mxu1 %v6776_v49 }
  0x2d   :  { %693 = vmatprep.subr.bf16.mxu1 %v6781_v50 }
  0x2f   :  { %653 = vmatpush1.bf16.msra.mxu0 %v6758_v46 }
  0x30   :  { %654 = vmatprep.subr.bf16.mxu0 %v6770_v48  ;;  %694 = vmatpush1.bf16.msra.mxu1 %v6799_v53 }
  0x31   :  { %695 = vmatprep.subr.bf16.mxu1 %v6805_v54 }
  0x33   :  { %655 = vmatpush1.bf16.msra.mxu0 %v6788_v51 }
  0x34   :  { %656 = vmatprep.subr.bf16.mxu0 %v6794_v52  ;;  %696 = vmatpush1.bf16.msra.mxu1 %v6823_v57 }
  0x35   :  { %697 = vmatprep.subr.bf16.mxu1 %v6829_v58 }
  0x37   :  { %657 = vmatpush1.bf16.msra.mxu0 %v6812_v55  ;;  %v6883_v55 = vld [vmem:[%s8536_s3 + $0x8] ss:$16 sps:$4 sm:$0xff]  }
  0x38   :  { %658 = vmatprep.subr.bf16.mxu0 %v6818_v56  ;;  %698 = vmatpush1.bf16.msra.mxu1 %v6847_v61  ;;  %v453_v56 = vpack.c.bf16 %v5227_v30, %v5227_v30 }
  0x39   :  { %699 = vmatprep.subr.bf16.mxu1 %v6853_v62 }
  0x3b   :  { %659 = vmatpush1.bf16.msra.mxu0 %v6836_v59 }
  0x3c   :  { %660 = vmatprep.subr.bf16.mxu0 %v6842_v60  ;;  %700 = vmatpush1.bf16.msra.mxu1 %v6869_v34  ;;  %v8559_v60 = vmov 0  }
  0x3d   :  { %701 = vmatprep.subr.bf16.mxu1 %v6875_v2 }
  0x3f   :  { %661 = vmatpush1.bf16.msra.mxu0 %v6860_v63 }
  0x40   :  { %984 = vmatprep.subr.bf16.mxu0 %v6498_v0  ;;  %702 = vmatpush1.bf16.msra.mxu1 %v6883_v55  ;;  %v28_v0 = vld [vmem:[%s8533_s0] sm:$0xff] }
  0x41   :  { %1025 = vmatprep.subr.bf16.mxu1 %v6528_v6 }
  0x42   :  { %679 = vmatmul.mubr.bf16.vlgmr.msra.gmra.mxu0 %v453_v56 }
  0x43   :  { %985 = vmatpush1.bf16.msra.mxu0 %v6503_v1  ;;  %1016 = vmatprep.mubr.bf16.mxu0 %v8559_v60  ;;  %v442_v1 = vunpack.c.l.bf16 %v28_v0 }
  0x44   :  { %986 = vmatprep.subr.bf16.mxu0 %v6511_v3  ;;  %720 = vmatmul.mubr.bf16.vlgmr.msra.gmra.mxu1 %v453_v56  ;;  %v443_v3 = vunpack.c.h.bf16 %v28_v0 }
  0x45   :  { %1026 = vmatpush1.bf16.msra.mxu1 %v6533_v7  ;;  %1057 = vmatprep.mubr.bf16.mxu1 %v8559_v60 }
  0x46   :  { %1027 = vmatprep.subr.bf16.mxu1 %v6552_v10 }
  0x47   :  { %987 = vmatpush1.bf16.msra.mxu0 %v6517_v4 }
  0x48   :  { %988 = vmatprep.subr.bf16.mxu0 %v6523_v5 }
  0x49   :  { %1028 = vmatpush1.bf16.msra.mxu1 %v6557_v11 }
  0x4a   :  { %1029 = vmatprep.subr.bf16.mxu1 %v6574_v14 }
  0x4b   :  { %989 = vmatpush1.bf16.msra.mxu0 %v6539_v8 }
  0x4c   :  { %990 = vmatprep.subr.bf16.mxu0 %v6546_v9  ;;  %v30_v9 = vld [vmem:[%s8533_s0 + $0x8] sm:$0xff] }
  0x4d   :  { %1030 = vmatpush1.bf16.msra.mxu1 %v6581_v15  ;;  %v445_v14 = vunpack.c.h.bf16 %v30_v9 }
  0x4e   :  { %1031 = vmatprep.subr.bf16.mxu1 %v6587_v16 }
  0x4f   :  { %991 = vmatpush1.bf16.msra.mxu0 %v6564_v12 }
  0x50   :  { %992 = vmatprep.subr.bf16.mxu0 %v6569_v13 }
  0x51   :  { %1032 = vmatpush1.bf16.msra.mxu1 %v6605_v19 }
  0x52   :  { %1033 = vmatprep.subr.bf16.mxu1 %v6611_v20 }
  0x53   :  { %993 = vmatpush1.bf16.msra.mxu0 %v6593_v17 }
  0x54   :  { %994 = vmatprep.subr.bf16.mxu0 %v6599_v18  ;;  %v444_v18 = vunpack.c.l.bf16 %v30_v9 }
  0x55   :  { %1034 = vmatpush1.bf16.msra.mxu1 %v6629_v23 }
  0x56   :  { %1035 = vmatprep.subr.bf16.mxu1 %v6635_v24 }
  0x57   :  { %995 = vmatpush1.bf16.msra.mxu0 %v6617_v21 }
  0x58   :  { %996 = vmatprep.subr.bf16.mxu0 %v6622_v22 }
  0x59   :  { %1036 = vmatpush1.bf16.msra.mxu1 %v6653_v27 }
  0x5a   :  { %1037 = vmatprep.subr.bf16.mxu1 %v6659_v28 }
  0x5b   :  { %997 = vmatpush1.bf16.msra.mxu0 %v6640_v25 }
  0x5c   :  { %998 = vmatprep.subr.bf16.mxu0 %v6646_v26  ;;  %v5225_v26 = vld [vmem:[%s8534_s1 + $0xf0] sm:$0xff] }
  0x5d   :  { %1038 = vmatpush1.bf16.msra.mxu1 %v6680_v32  ;;  %v728_v27 = vunpack.c.l.bf16 %v5225_v26 }
  0x5e   :  { %1039 = vmatprep.subr.bf16.mxu1 %v6686_v33 }
  0x5f   :  { %999 = vmatpush1.bf16.msra.mxu0 %v6664_v29  ;;  %v729_v29 = vunpack.c.h.bf16 %v5225_v26 }
  0x60   :  { %1269 = vmatprep.subr.bf16.mxu0 %v6673_v31 }
  0x61   :  { %1040 = vmatpush1.bf16.msra.mxu1 %v6704_v37 }
  0x62   :  { %1310 = vmatprep.subr.bf16.mxu1 %v6710_v38  ;;  %v153_v38 = vld [vmem:[%s8538_s5] sm:$0xff] }
  0xe2   :  { %v394_v4 = vpop.f32.mrf.mxu0  ;;  %v435_v12 = vpop.f32.mrf.mxu1 }
  0xe3   :  { %v446_v5 = vadd.f32 %v442_v1, %v394_v4  ;;  %v448_v21 = vadd.f32 %v444_v18, %v435_v12 }
  0xe4   :  { %v396_v6 = vpop.f32.mrf.mxu0  ;;  %v437_v15 = vpop.f32.mrf.mxu1 }
  0xe5   :  { %v5293_v7 = vmul.f32 -1.442695, %v446_v5  ;;  %v447_v8 = vadd.f32 %v443_v3, %v396_v6  ;;  %v449_v17 = vadd.f32 %v445_v14, %v437_v15 }
  0xe6   :  { %v398_v10 = vpop.f32.mrf.mxu0  ;;  %v439_v16 = vpop.f32.mrf.mxu1 }
  0xe7   :  { %6189 = vpow2.f32 %v5293_v7  ;;  %v5294_v11 = vmul.f32 -1.442695, %v447_v8  ;;  %v5295_v20 = vmul.f32 -1.442695, %v449_v17  ;;  %v5226_v8 = vld [vmem:[%s8534_s1 + $0xf8] sm:$0xff] }
  0xe8   :  { %v399_v13 = vpop.f32.mrf.mxu0  ;;  %v440_v19 = vpop.f32.mrf.mxu1  ;;  %v730_v15 = vunpack.c.l.bf16 %v5226_v8 }
  0xe9   :  { %6191 = vpow2.f32 %v5294_v11  ;;  %v731_v13 = vunpack.c.h.bf16 %v5226_v8  ;;  %v7139_v8 = vld [vmem:[%s8535_s2 + $0x28] ss:$16 sps:$4 sm:$0xff]  }
  0xea   :  { %6193 = vpow2.f32 %v5295_v20 }
  0xeb   :  { %6195 = vtanh.f32 %v448_v21 }
  0xf4   :  { %v6190_v22 = vpop.eup %6189 }
  0xf5   :  { %v739_v23 = vadd.f32 1.0, %v6190_v22 }
  0xf6   :  { %v6192_v24 = vpop.eup %6191 }
  0xf7   :  { %6197 = vrcp.f32 %v739_v23  ;;  %v745_v25 = vadd.f32 1.0, %v6192_v24  ;;  %v6194_v28 = vpop.eup %6193 }
  0xf8   :  { %v6196_v31 = vpop.eup %6195  ;;  %v752_v56 = vadd.f32 1.0, %v6194_v28 }
  0xf9   :  { %6199 = vrcp.f32 %v745_v25 }
 0x102   :  { %v680_v32 = vpop.f32.mrf.mxu0 }
 0x103   :  { %v732_v33 = vadd.f32 %v728_v27, %v680_v32  ;;  %v7062_v32 = vld [vmem:[%s8535_s2 + $0x80] ss:$16 sps:$4 sm:$0xff]  }
 0x104   :  { %v6198_v37 = vpop.eup %6197  ;;  %v682_v30 = vpop.f32.mrf.mxu0 }
 0x105   :  { %v756_v0 = vmul.f32 %v6198_v37, %v6196_v31  ;;  %v5296_v1 = vmul.f32 -1.442695, %v732_v33  ;;  %v733_v3 = vadd.f32 %v729_v29, %v682_v30  ;;  %v721_v9 = vpop.f32.mrf.mxu1  ;;  %v7067_v33 = vld [vmem:[%s8535_s2 + $0x88] ss:$16 sps:$4 sm:$0xff]   ;;  %v7076_v37 = vld [vmem:[%s8535_s2 + $0x64] ss:$16 sps:$4 sm:$0xff]  }
 0x106   :  { %v6200_v4 = vpop.eup %6199  ;;  %v684_v5 = vpop.f32.mrf.mxu0  ;;  %v734_v18 = vadd.f32 %v730_v15, %v721_v9  ;;  %v7091_v30 = vld [vmem:[%s8535_s2 + $0x68] ss:$16 sps:$4 sm:$0xff]   ;;  %v7148_v9 = vld [vmem:[%s8535_s2 + $0x4] ss:$16 sps:$4 sm:$0xff]   ;;  %v7177_v15 = vld [vmem:[%s8536_s3 + $0xec] ss:$16 sps:$4 sm:$0xff]  }
 0x107   :  { %v755_v6 = vmul.f32 %v6200_v4, %v153_v38  ;;  %6201 = vpow2.f32 %v5296_v1  ;;  %v5297_v7 = vmul.f32 -1.442695, %v733_v3  ;;  %v723_v12 = vpop.f32.mrf.mxu1  ;;  %v7081_v38 = vld [vmem:[%s8535_s2 + $0x6c] ss:$16 sps:$4 sm:$0xff]   ;;  %v7110_v3 = vld [vmem:[%s8535_s2 + $0x40] ss:$16 sps:$4 sm:$0xff]  }
 0x108   :  { %6203 = vrcp.f32 %v752_v56  ;;  %v685_v10 = vpop.f32.mrf.mxu0  ;;  %v735_v17 = vadd.f32 %v731_v13, %v723_v12  ;;  %v7086_v56 = vld [vmem:[%s8535_s2 + $0x60] ss:$16 sps:$4 sm:$0xff]   ;;  %v7105_v1 = vld [vmem:[%s8535_s2 + $0x4c] ss:$16 sps:$4 sm:$0xff]   ;;  %v7115_v4 = vld [vmem:[%s8535_s2 + $0x48] ss:$16 sps:$4 sm:$0xff]  }
 0x109   :  { %v6940_v11 = vadd.f32 %v756_v0, %v755_v6  ;;  %6205 = vpow2.f32 %v5297_v7  ;;  %v725_v14 = vpop.f32.mrf.mxu1  ;;  %v7100_v0 = vld [vmem:[%s8535_s2 + $0x44] ss:$16 sps:$4 sm:$0xff]   ;;  %v7129_v6 = vld [vmem:[%s8535_s2 + $0x2c] ss:$16 sps:$4 sm:$0xff]   ;;  %v7134_v7 = vld [vmem:[%s8535_s2 + $0x20] ss:$16 sps:$4 sm:$0xff]  }
 0x10a   :  { %v5298_v19 = vmul.f32 -1.442695, %v735_v17  ;;  %v7124_v5 = vld [vmem:[%s8535_s2 + $0x24] ss:$16 sps:$4 sm:$0xff]   ;;  %v7153_v10 = vld [vmem:[%s8535_s2 + $0xc] ss:$16 sps:$4 sm:$0xff]  }
 0x10b   :  { %6207 = vtanh.f32 %v6940_v11  ;;  %v726_v16 = vpop.f32.mrf.mxu1  ;;  %v7158_v12 = vld [vmem:[%s8535_s2] ss:$16 sps:$4 sm:$0xff]   ;;  %v7163_v13 = vld [vmem:[%s8535_s2 + $0x8] ss:$16 sps:$4 sm:$0xff]   ;;  %v7172_v14 = vld [vmem:[%s8536_s3 + $0xe4] ss:$16 sps:$4 sm:$0xff]  }
 0x10c   :  { %6209 = vtanh.f32 %v734_v18  ;;  %v32_v16 = vld [vmem:[%s8533_s0 + $0x20] sm:$0xff] }
 0x10d   :  { %6211 = vpow2.f32 %v5298_v19  ;;  %v1066_v17 = vunpack.c.l.bf16 %v32_v16  ;;  %v1067_v18 = vunpack.c.h.bf16 %v32_v16 }
 0x114   :  { %v6202_v20 = vpop.eup %6201 }
 0x115   :  { %v6204_v21 = vpop.eup %6203  ;;  %v763_v22 = vadd.f32 1.0, %v6202_v20 }
 0x116   :  { %v6206_v23 = vpop.eup %6205 }
 0x117   :  { %6213 = vrcp.f32 %v763_v22  ;;  %v769_v24 = vadd.f32 1.0, %v6206_v23 }
 0x118   :  { %v6208_v25 = vpop.eup %6207 }
 0x119   :  { %6215 = vrcp.f32 %v769_v24  ;;  %v759_v26 = vmul.f32 %v6208_v25, %v6204_v21  ;;  %v6210_v28 = vpop.eup %6209 }
 0x11a   :  { %v6212_v29 = vpop.eup %6211 }
 0x11b   :  { %v784_v27 = vpack.c.bf16 %v759_v26, %v759_v26 }
 0x11d   :  { %785 = vst [vmem:[%s8539_s6] sm:$0xf] %v784_v27  ;;  %1017 = vmatmul.mubr.bf16.vlgmr.msra.gmra.mxu0 %v784_v27  ;;  %1058 = vmatmul.mubr.bf16.vlgmr.msra.gmra.mxu1 %v784_v27 }
 0x11e   :  { %1270 = vmatpush1.bf16.msra.mxu0 %v6691_v35  ;;  %1311 = vmatpush1.bf16.msra.mxu1 %v6729_v41 }
 0x11f   :  { %1271 = vmatprep.subr.bf16.mxu0 %v6697_v36  ;;  %1312 = vmatprep.subr.bf16.mxu1 %v6735_v42  ;;  %v5228_v36 = vld [vmem:[%s8538_s5 + $0x8] sm:$0xff]  ;;  %v776_v42 = vadd.f32 1.0, %v6212_v29 }
 0x120   :  { %1301 = vmatprep.mubr.bf16.mxu0 %v8559_v60  ;;  %1342 = vmatprep.mubr.bf16.mxu1 %v8559_v60 }
 0x121   :  { %6217 = vrcp.f32 %v776_v42 }
 0x122   :  { %1272 = vmatpush1.bf16.msra.mxu0 %v6715_v39  ;;  %1313 = vmatpush1.bf16.msra.mxu1 %v6753_v45 }
 0x123   :  { %1273 = vmatprep.subr.bf16.mxu0 %v6721_v40  ;;  %1314 = vmatprep.subr.bf16.mxu1 %v6764_v47 }
 0x124   :  { %v6214_v35 = vpop.eup %6213 }
 0x125   :  { %v780_v39 = vmul.f32 %v6214_v35, %v6210_v28 }
 0x126   :  { %v6216_v41 = vpop.eup %6215  ;;  %1274 = vmatpush1.bf16.msra.mxu0 %v6741_v43  ;;  %1315 = vmatpush1.bf16.msra.mxu1 %v6776_v49  ;;  %v8560_v43 = vld [vmem:[#allocation8_spill] sm:$0xff] }
 0x127   :  { %v779_v31 = vmul.f32 %v6216_v41, %v5228_v36  ;;  %1275 = vmatprep.subr.bf16.mxu0 %v6747_v44  ;;  %1316 = vmatprep.subr.bf16.mxu1 %v6781_v50  ;;  %v8561_v44 = vld [vmem:[#allocation9_spill] sm:$0xff] }
 0x128   :  { %v6445_v50 = vld [vmem:[%s8535_s2 + $0xec] ss:$16 sps:$4 sm:$0xff]  }
 0x129   :  { %v6963_v40 = vadd.f32 %v780_v39, %v779_v31  ;;  %v34_v36 = vld [vmem:[%s8533_s0 + $0x28] sm:$0xff] }
 0x12a   :  { %1276 = vmatpush1.bf16.msra.mxu0 %v6758_v46  ;;  %1317 = vmatpush1.bf16.msra.mxu1 %v6799_v53  ;;  %v8562_v46 = vld [vmem:[#allocation10_spill] sm:$0xff]  ;;  %v1069_v41 = vunpack.c.h.bf16 %v34_v36  ;;  %v1068_v31 = vunpack.c.l.bf16 %v34_v36 }
 0x12b   :  { %6219 = vtanh.f32 %v6963_v40  ;;  %1277 = vmatprep.subr.bf16.mxu0 %v6770_v48  ;;  %1318 = vmatprep.subr.bf16.mxu1 %v6805_v54  ;;  %v7004_v53 = vld [vmem:[%s8535_s2 + $0xe4] ss:$16 sps:$4 sm:$0xff]   ;;  %v7009_v54 = vld [vmem:[%s8535_s2 + $0xe0] ss:$16 sps:$4 sm:$0xff]  }
 0x12e   :  { %1278 = vmatpush1.bf16.msra.mxu0 %v6788_v51  ;;  %1319 = vmatpush1.bf16.msra.mxu1 %v6823_v57  ;;  %v6218_v45 = vpop.eup %6217  ;;  %v6447_v51 = vld [vmem:[%s8535_s2 + $0xcc] ss:$16 sps:$4 sm:$0xff]   ;;  %v7021_v57 = vld [vmem:[%s8535_s2 + $0xc0] ss:$16 sps:$4 sm:$0xff]  }
 0x12f   :  { %1279 = vmatprep.subr.bf16.mxu0 %v6794_v52  ;;  %1320 = vmatprep.subr.bf16.mxu1 %v6829_v58  ;;  %v6448_v52 = vld [vmem:[%s8535_s2 + $0xc8] ss:$16 sps:$4 sm:$0xff]   ;;  %v7028_v58 = vld [vmem:[%s8535_s2 + $0xa4] ss:$16 sps:$4 sm:$0xff]  }
 0x132   :  { %1280 = vmatpush1.bf16.msra.mxu0 %v8560_v43  ;;  %1321 = vmatpush1.bf16.msra.mxu1 %v6847_v61  ;;  %v7038_v61 = vld [vmem:[%s8535_s2 + $0xa0] ss:$16 sps:$4 sm:$0xff]  }
 0x133   :  { %1281 = vmatprep.subr.bf16.mxu0 %v8561_v44  ;;  %1322 = vmatprep.subr.bf16.mxu1 %v6853_v62  ;;  %v7043_v62 = vld [vmem:[%s8535_s2 + $0xa8] ss:$16 sps:$4 sm:$0xff]  }
 0x136   :  { %1282 = vmatpush1.bf16.msra.mxu0 %v6836_v59  ;;  %1323 = vmatpush1.bf16.msra.mxu1 %v6869_v34  ;;  %v7033_v59 = vld [vmem:[%s8535_s2 + $0xac] ss:$16 sps:$4 sm:$0xff]  }
 0x137   :  { %1283 = vmatprep.subr.bf16.mxu0 %v8562_v46  ;;  %1324 = vmatprep.subr.bf16.mxu1 %v6875_v2  ;;  %v6446_v2 = vld [vmem:[%s8535_s2 + $0xe8] ss:$16 sps:$4 sm:$0xff]   ;;  %v7057_v34 = vld [vmem:[%s8535_s2 + $0x8c] ss:$16 sps:$4 sm:$0xff]  }
 0x138   :  { %v6220_v47 = vpop.eup %6219 }
 0x139   :  { %v783_v48 = vmul.f32 %v6220_v47, %v6218_v45 }
 0x13a   :  { %1284 = vmatpush1.bf16.msra.mxu0 %v6860_v63  ;;  %1325 = vmatpush1.bf16.msra.mxu1 %v6883_v55  ;;  %v7016_v55 = vld [vmem:[%s8535_s2 + $0xc4] ss:$16 sps:$4 sm:$0xff]  }
 0x13b   :  { %v786_v49 = vpack.c.bf16 %v783_v48, %v783_v48  ;;  %1649 = vmatprep.subr.bf16.mxu1 %v6445_v50  ;;  %1608 = vmatprep.subr.bf16.mxu0 %v7004_v53  ;;  %v7052_v63 = vld [vmem:[%s8535_s2 + $0x84] ss:$16 sps:$4 sm:$0xff]  }
 0x13c   :  { %v5223_v48 = vld [vmem:[%s8534_s1 + $0xd0] sm:$0xff] }
 0x13d   :  { %5299 = vst [vmem:[%s8540_s7 + $0x1c] sm:$0xf] %v786_v49  ;;  %1302 = vmatmul.mubr.bf16.vlgmr.msra.gmra.mxu0 %v786_v49  ;;  %1343 = vmatmul.mubr.bf16.vlgmr.msra.gmra.mxu1 %v786_v49  ;;  %v1351_v49 = vunpack.c.l.bf16 %v5223_v48  ;;  %v1352_v50 = vunpack.c.h.bf16 %v5223_v48 }
 0x13e   :  { %1650 = vmatpush1.bf16.msra.mxu1 %v6446_v2  ;;  %1640 = vmatprep.mubr.bf16.mxu0 %v8559_v60 }
 0x13f   :  { %1651 = vmatprep.subr.bf16.mxu1 %v6447_v51  ;;  %1681 = vmatprep.mubr.bf16.mxu1 %v8559_v60 }
 0x140   :  { %1609 = vmatpush1.bf16.msra.mxu0 %v7009_v54 }
 0x141   :  { %1610 = vmatprep.subr.bf16.mxu0 %v7016_v55 }
 0x142   :  { %1652 = vmatpush1.bf16.msra.mxu1 %v6448_v52 }
 0x143   :  { %1653 = vmatprep.subr.bf16.mxu1 %v7033_v59 }
 0x144   :  { %1611 = vmatpush1.bf16.msra.mxu0 %v7021_v57 }
 0x145   :  { %1612 = vmatprep.subr.bf16.mxu0 %v7028_v58 }
 0x146   :  { %1654 = vmatpush1.bf16.msra.mxu1 %v7043_v62 }
 0x147   :  { %1655 = vmatprep.subr.bf16.mxu1 %v7057_v34 }
 0x148   :  { %1613 = vmatpush1.bf16.msra.mxu0 %v7038_v61 }
 0x149   :  { %1614 = vmatprep.subr.bf16.mxu0 %v7052_v63 }
 0x14a   :  { %1656 = vmatpush1.bf16.msra.mxu1 %v7067_v33 }
 0x14b   :  { %1657 = vmatprep.subr.bf16.mxu1 %v7081_v38 }
 0x14c   :  { %1615 = vmatpush1.bf16.msra.mxu0 %v7062_v32 }
 0x14d   :  { %1616 = vmatprep.subr.bf16.mxu0 %v7076_v37 }
 0x14e   :  { %1658 = vmatpush1.bf16.msra.mxu1 %v7091_v30 }
 0x14f   :  { %1659 = vmatprep.subr.bf16.mxu1 %v7105_v1 }
 0x150   :  { %1617 = vmatpush1.bf16.msra.mxu0 %v7086_v56 }
 0x151   :  { %1618 = vmatprep.subr.bf16.mxu0 %v7100_v0 }
 0x152   :  { %1660 = vmatpush1.bf16.msra.mxu1 %v7115_v4 }
 0x153   :  { %1661 = vmatprep.subr.bf16.mxu1 %v7129_v6 }
 0x154   :  { %1619 = vmatpush1.bf16.msra.mxu0 %v7110_v3 }
 0x155   :  { %1620 = vmatprep.subr.bf16.mxu0 %v7124_v5 }
 0x156   :  { %1662 = vmatpush1.bf16.msra.mxu1 %v7139_v8 }
 0x157   :  { %1663 = vmatprep.subr.bf16.mxu1 %v7153_v10 }
 0x158   :  { %1621 = vmatpush1.bf16.msra.mxu0 %v7134_v7 }
 0x159   :  { %1622 = vmatprep.subr.bf16.mxu0 %v7148_v9 }
 0x15a   :  { %1664 = vmatpush1.bf16.msra.mxu1 %v7163_v13 }
 0x15b   :  { %1934 = vmatprep.subr.bf16.mxu1 %v7177_v15 }
 0x15c   :  { %1623 = vmatpush1.bf16.msra.mxu0 %v7158_v12 }
 0x15d   :  { %1893 = vmatprep.subr.bf16.mxu0 %v7172_v14 }
 0x1dd   :  { %v1018_v19 = vpop.f32.mrf.mxu0  ;;  %v1059_v20 = vpop.f32.mrf.mxu1 }
 0x1de   :  { %v1070_v21 = vadd.f32 %v1066_v17, %v1018_v19  ;;  %v1072_v44 = vadd.f32 %v1068_v31, %v1059_v20 }
 0x1df   :  { %v1020_v22 = vpop.f32.mrf.mxu0  ;;  %v1061_v23 = vpop.f32.mrf.mxu1 }
 0x1e0   :  { %v5364_v24 = vmul.f32 -1.442695, %v1070_v21  ;;  %v1071_v25 = vadd.f32 %v1067_v18, %v1020_v22  ;;  %v1073_v42 = vadd.f32 %v1069_v41, %v1061_v23 }
 0x1e1   :  { %v1022_v26 = vpop.f32.mrf.mxu0  ;;  %v1063_v27 = vpop.f32.mrf.mxu1 }
 0x1e2   :  { %6221 = vpow2.f32 %v5364_v24  ;;  %v5365_v28 = vmul.f32 -1.442695, %v1071_v25  ;;  %v5366_v39 = vmul.f32 -1.442695, %v1073_v42  ;;  %v5224_v42 = vld [vmem:[%s8534_s1 + $0xd8] sm:$0xff] }
 0x1e3   :  { %v1023_v29 = vpop.f32.mrf.mxu0  ;;  %v1064_v35 = vpop.f32.mrf.mxu1  ;;  %v1354_v31 = vunpack.c.h.bf16 %v5224_v42 }
 0x1e4   :  { %6223 = vpow2.f32 %v5365_v28 }
 0x1e5   :  { %6225 = vpow2.f32 %v5366_v39 }
 0x1ef   :  { %v6222_v43 = vpop.eup %6221 }
 0x1f0   :  { %v1362_v45 = vadd.f32 1.0, %v6222_v43  ;;  %v1353_v43 = vunpack.c.l.bf16 %v5224_v42  ;;  %v7275_v42 = vld [vmem:[%s8536_s3 + $0x80] ss:$16 sps:$4 sm:$0xff]  }
 0x1f1   :  { %v6224_v46 = vpop.eup %6223 }
 0x1f2   :  { %6227 = vrcp.f32 %v1362_v45  ;;  %v1368_v47 = vadd.f32 1.0, %v6224_v46  ;;  %v6226_v52 = vpop.eup %6225 }
 0x1f3   :  { %6229 = vtanh.f32 %v1072_v44  ;;  %v1375_v24 = vadd.f32 1.0, %v6226_v52  ;;  %v7200_v52 = vld [vmem:[%s8536_s3 + $0xe0] ss:$16 sps:$4 sm:$0xff]  }
 0x1f4   :  { %6231 = vrcp.f32 %v1368_v47 }
 0x1fd   :  { %v1303_v2 = vpop.f32.mrf.mxu0  ;;  %v1344_v51 = vpop.f32.mrf.mxu1 }
 0x1fe   :  { %v1355_v16 = vadd.f32 %v1351_v49, %v1303_v2 }
 0x1ff   :  { %v6228_v17 = vpop.eup %6227  ;;  %v1305_v18 = vpop.f32.mrf.mxu0 }
 0x200   :  { %v1346_v19 = vpop.f32.mrf.mxu1  ;;  %v6230_v20 = vpop.eup %6229  ;;  %v5367_v21 = vmul.f32 -1.442695, %v1355_v16  ;;  %v1356_v22 = vadd.f32 %v1352_v50, %v1305_v18  ;;  %v7205_v16 = vld [vmem:[%s8536_s3 + $0xe8] ss:$16 sps:$4 sm:$0xff]   ;;  %v7215_v18 = vld [vmem:[%s8536_s3 + $0xcc] ss:$16 sps:$4 sm:$0xff]  }
 0x201   :  { %v6232_v23 = vpop.eup %6231  ;;  %v1307_v25 = vpop.f32.mrf.mxu0  ;;  %v1379_v27 = vmul.f32 %v6230_v20, %v6228_v17  ;;  %v1358_v39 = vadd.f32 %v1354_v31, %v1346_v19  ;;  %v7210_v17 = vld [vmem:[%s8536_s3 + $0xc4] ss:$16 sps:$4 sm:$0xff]   ;;  %v7225_v19 = vld [vmem:[%s8536_s3 + $0xc0] ss:$16 sps:$4 sm:$0xff]   ;;  %v7230_v20 = vld [vmem:[%s8536_s3 + $0xc8] ss:$16 sps:$4 sm:$0xff]  }
 0x202   :  { %v1348_v26 = vpop.f32.mrf.mxu1  ;;  %v1378_v28 = vmul.f32 %v6232_v23, %v6940_v11  ;;  %6233 = vpow2.f32 %v5367_v21  ;;  %v5368_v29 = vmul.f32 -1.442695, %v1356_v22  ;;  %v1357_v11 = vadd.f32 %v1353_v43, %v1344_v51  ;;  %v7237_v21 = vld [vmem:[%s8536_s3 + $0xa4] ss:$16 sps:$4 sm:$0xff]   ;;  %v7242_v22 = vld [vmem:[%s8536_s3 + $0xac] ss:$16 sps:$4 sm:$0xff]  }
 0x203   :  { %v1308_v35 = vpop.f32.mrf.mxu0  ;;  %v5369_v44 = vmul.f32 -1.442695, %v1358_v39  ;;  %v7251_v23 = vld [vmem:[%s8536_s3 + $0xa0] ss:$16 sps:$4 sm:$0xff]   ;;  %v7263_v26 = vld [vmem:[%s8536_s3 + $0x84] ss:$16 sps:$4 sm:$0xff]  }
 0x204   :  { %v1349_v36 = vpop.f32.mrf.mxu1  ;;  %v7191_v41 = vadd.f32 %v1379_v27, %v1378_v28  ;;  %6235 = vpow2.f32 %v5368_v29  ;;  %v7268_v27 = vld [vmem:[%s8536_s3 + $0x8c] ss:$16 sps:$4 sm:$0xff]   ;;  %v7280_v31 = vld [vmem:[%s8536_s3 + $0x88] ss:$16 sps:$4 sm:$0xff]  }
 0x205   :  { %6237 = vrcp.f32 %v1375_v24  ;;  %v7256_v24 = vld [vmem:[%s8536_s3 + $0xa8] ss:$16 sps:$4 sm:$0xff]  }
 0x206   :  { %6239 = vtanh.f32 %v7191_v41 }
 0x207   :  { %6241 = vpow2.f32 %v5369_v44  ;;  %v7288_v44 = vld [vmem:[%s8536_s3 + $0x64] ss:$16 sps:$4 sm:$0xff]  }
 0x20f   :  { %v6234_v45 = vpop.eup %6233 }
 0x210   :  { %v1386_v46 = vadd.f32 1.0, %v6234_v45  ;;  %v7293_v45 = vld [vmem:[%s8536_s3 + $0x6c] ss:$16 sps:$4 sm:$0xff]  }
 0x211   :  { %v6236_v47 = vpop.eup %6235 }
 0x212   :  { %v6238_v48 = vpop.eup %6237  ;;  %6243 = vrcp.f32 %v1386_v46  ;;  %v1392_v49 = vadd.f32 1.0, %v6236_v47  ;;  %v7307_v46 = vld [vmem:[%s8536_s3 + $0x68] ss:$16 sps:$4 sm:$0xff]   ;;  %v7314_v47 = vld [vmem:[%s8536_s3 + $0x44] ss:$16 sps:$4 sm:$0xff]  }
 0x213   :  { %v6240_v50 = vpop.eup %6239  ;;  %6245 = vtanh.f32 %v1357_v11 }
 0x214   :  { %6247 = vrcp.f32 %v1392_v49  ;;  %v1382_v2 = vmul.f32 %v6240_v50, %v6238_v48  ;;  %v6242_v25 = vpop.eup %6241  ;;  %v7319_v48 = vld [vmem:[%s8536_s3 + $0x4c] ss:$16 sps:$4 sm:$0xff]   ;;  %v7327_v49 = vld [vmem:[%s8536_s3 + $0x40] ss:$16 sps:$4 sm:$0xff]   ;;  %v7332_v50 = vld [vmem:[%s8536_s3 + $0x48] ss:$16 sps:$4 sm:$0xff]  }
 0x215   :  { %v1399_v36 = vadd.f32 1.0, %v6242_v25  ;;  %v7351_v25 = vld [vmem:[%s8536_s3 + $0x20] ss:$16 sps:$4 sm:$0xff]  }
 0x216   :  { %v1407_v51 = vpack.c.bf16 %v1382_v2, %v1382_v2  ;;  %v7339_v2 = vld [vmem:[%s8536_s3 + $0x24] ss:$16 sps:$4 sm:$0xff]  }
 0x217   :  { %6249 = vrcp.f32 %v1399_v36  ;;  %8563 = vst [vmem:[#allocation8_spill] sm:$0xff] %v7339_v2  ;;  %v7375_v36 = vld [vmem:[%s8536_s3] ss:$16 sps:$4 sm:$0xff]  }
 0x218   :  { %5370 = vst [vmem:[%s8539_s6 + $0x4] sm:$0xf] %v1407_v51  ;;  %1641 = vmatmul.mubr.bf16.vlgmr.msra.gmra.mxu0 %v1407_v51  ;;  %1682 = vmatmul.mubr.bf16.vlgmr.msra.gmra.mxu1 %v1407_v51  ;;  %v7344_v51 = vld [vmem:[%s8536_s3 + $0x2c] ss:$16 sps:$4 sm:$0xff]  }
 0x219   :  { %1894 = vmatpush1.bf16.msra.mxu0 %v7200_v52  ;;  %1935 = vmatpush1.bf16.msra.mxu1 %v7205_v16  ;;  %8564 = vst [vmem:[#allocation9_spill] sm:$0xff] %v7344_v51 }
 0x21a   :  { %1895 = vmatprep.subr.bf16.mxu0 %v7210_v17  ;;  %1936 = vmatprep.subr.bf16.mxu1 %v7215_v18 }
 0x21b   :  { %1925 = vmatprep.mubr.bf16.mxu0 %v8559_v60  ;;  %1966 = vmatprep.mubr.bf16.mxu1 %v8559_v60 }
 0x21d   :  { %1896 = vmatpush1.bf16.msra.mxu0 %v7225_v19  ;;  %1937 = vmatpush1.bf16.msra.mxu1 %v7230_v20 }
 0x21e   :  { %1897 = vmatprep.subr.bf16.mxu0 %v7237_v21  ;;  %1938 = vmatprep.subr.bf16.mxu1 %v7242_v22 }
 0x21f   :  { %v6244_v28 = vpop.eup %6243 }
 0x220   :  { %v6246_v29 = vpop.eup %6245 }
 0x221   :  { %v6248_v35 = vpop.eup %6247  ;;  %1898 = vmatpush1.bf16.msra.mxu0 %v7251_v23  ;;  %1939 = vmatpush1.bf16.msra.mxu1 %v7256_v24  ;;  %v1403_v39 = vmul.f32 %v6246_v29, %v6244_v28  ;;  %v7356_v28 = vld [vmem:[%s8536_s3 + $0x28] ss:$16 sps:$4 sm:$0xff]   ;;  %v7363_v29 = vld [vmem:[%s8536_s3 + $0x4] ss:$16 sps:$4 sm:$0xff]  }
 0x222   :  { %v1402_v43 = vmul.f32 %v6248_v35, %v6963_v40  ;;  %1899 = vmatprep.subr.bf16.mxu0 %v7263_v26  ;;  %1940 = vmatprep.subr.bf16.mxu1 %v7268_v27  ;;  %v7302_v40 = vld [vmem:[%s8536_s3 + $0x60] ss:$16 sps:$4 sm:$0xff]   ;;  %8565 = vst [vmem:[#allocation10_spill] sm:$0xff] %v7356_v28  ;;  %v7368_v35 = vld [vmem:[%s8536_s3 + $0xc] ss:$16 sps:$4 sm:$0xff]  }
 0x224   :  { %v7295_v11 = vadd.f32 %v1403_v39, %v1402_v43  ;;  %v7380_v39 = vld [vmem:[%s8536_s3 + $0x8] ss:$16 sps:$4 sm:$0xff]   ;;  %v6250_v43 = vpop.eup %6249 }
 0x225   :  { %1900 = vmatpush1.bf16.msra.mxu0 %v7275_v42  ;;  %1941 = vmatpush1.bf16.msra.mxu1 %v7280_v31 }
 0x226   :  { %1901 = vmatprep.subr.bf16.mxu0 %v7288_v44  ;;  %1942 = vmatprep.subr.bf16.mxu1 %v7293_v45  ;;  %6251 = vtanh.f32 %v7295_v11 }
 0x229   :  { %1902 = vmatpush1.bf16.msra.mxu0 %v7302_v40  ;;  %1943 = vmatpush1.bf16.msra.mxu1 %v7307_v46 }
 0x22a   :  { %1903 = vmatprep.subr.bf16.mxu0 %v7314_v47  ;;  %1944 = vmatprep.subr.bf16.mxu1 %v7319_v48 }
 0x22d   :  { %1904 = vmatpush1.bf16.msra.mxu0 %v7327_v49  ;;  %1945 = vmatpush1.bf16.msra.mxu1 %v7332_v50 }
 0x22e   :  { %1905 = vmatprep.subr.bf16.mxu0 %v7339_v2  ;;  %1946 = vmatprep.subr.bf16.mxu1 %v7344_v51 }
 0x231   :  { %1906 = vmatpush1.bf16.msra.mxu0 %v7351_v25  ;;  %1947 = vmatpush1.bf16.msra.mxu1 %v7356_v28 }
 0x232   :  { %1907 = vmatprep.subr.bf16.mxu0 %v7363_v29  ;;  %1948 = vmatprep.subr.bf16.mxu1 %v7368_v35 }
 0x233   :  { %v6252_v51 = vpop.eup %6251 }
 0x234   :  { %v1406_v2 = vmul.f32 %v6252_v51, %v6250_v43 }
 0x235   :  { %1908 = vmatpush1.bf16.msra.mxu0 %v7375_v36  ;;  %1949 = vmatpush1.bf16.msra.mxu1 %v7380_v39 }
 0x236   :  { %v1410_v28 = vpack.c.bf16 %v1406_v2, %v1406_v2  ;;  %2232 = vmatprep.subr.bf16.mxu0 %v7004_v53  ;;  %v7411_v53 = vld [vmem:[%s8535_s2 + $0xec] ss:$16 sps:$4 sm:$0xff]  }
 0x237   :  { %2273 = vmatprep.subr.bf16.mxu1 %v7411_v53 }
 0x238   :  { %5371 = vst [vmem:[%s8540_s7 + $0x18] sm:$0xf] %v1410_v28  ;;  %1926 = vmatmul.mubr.bf16.vlgmr.msra.gmra.mxu0 %v1410_v28  ;;  %1967 = vmatmul.mubr.bf16.vlgmr.msra.gmra.mxu1 %v1410_v28 }
 0x239   :  { %2233 = vmatpush1.bf16.msra.mxu0 %v7009_v54  ;;  %2264 = vmatprep.mubr.bf16.mxu0 %v8559_v60  ;;  %v7416_v54 = vld [vmem:[%s8535_s2 + $0xe8] ss:$16 sps:$4 sm:$0xff]  }
 0x23a   :  { %2234 = vmatprep.subr.bf16.mxu0 %v7016_v55  ;;  %2305 = vmatprep.mubr.bf16.mxu1 %v8559_v60  ;;  %v7423_v55 = vld [vmem:[%s8535_s2 + $0xcc] ss:$16 sps:$4 sm:$0xff]  }
 0x23b   :  { %2274 = vmatpush1.bf16.msra.mxu1 %v7416_v54 }
 0x23c   :  { %2275 = vmatprep.subr.bf16.mxu1 %v7423_v55 }
 0x23d   :  { %2235 = vmatpush1.bf16.msra.mxu0 %v7021_v57  ;;  %v7428_v57 = vld [vmem:[%s8535_s2 + $0xc8] ss:$16 sps:$4 sm:$0xff]  }
 0x23e   :  { %2236 = vmatprep.subr.bf16.mxu0 %v7028_v58  ;;  %v36_v58 = vld [vmem:[%s8533_s0 + $0x40] sm:$0xff] }
 0x23f   :  { %2276 = vmatpush1.bf16.msra.mxu1 %v7428_v57 }
 0x240   :  { %2277 = vmatprep.subr.bf16.mxu1 %v7033_v59  ;;  %v1690_v59 = vunpack.c.l.bf16 %v36_v58 }
 0x241   :  { %2237 = vmatpush1.bf16.msra.mxu0 %v7038_v61  ;;  %v1691_v61 = vunpack.c.h.bf16 %v36_v58 }
 0x242   :  { %2238 = vmatprep.subr.bf16.mxu0 %v7052_v63 }
 0x243   :  { %2278 = vmatpush1.bf16.msra.mxu1 %v7043_v62 }
 0x244   :  { %2279 = vmatprep.subr.bf16.mxu1 %v7057_v34 }
 0x245   :  { %2239 = vmatpush1.bf16.msra.mxu0 %v7062_v32 }
 0x246   :  { %2240 = vmatprep.subr.bf16.mxu0 %v7076_v37 }
 0x247   :  { %2280 = vmatpush1.bf16.msra.mxu1 %v7067_v33 }
 0x248   :  { %2281 = vmatprep.subr.bf16.mxu1 %v7081_v38 }
 0x249   :  { %2241 = vmatpush1.bf16.msra.mxu0 %v7086_v56 }
 0x24a   :  { %2242 = vmatprep.subr.bf16.mxu0 %v7100_v0 }
 0x24b   :  { %2282 = vmatpush1.bf16.msra.mxu1 %v7091_v30 }
 0x24c   :  { %2283 = vmatprep.subr.bf16.mxu1 %v7105_v1 }
 0x24d   :  { %2243 = vmatpush1.bf16.msra.mxu0 %v7110_v3 }
 0x24e   :  { %2244 = vmatprep.subr.bf16.mxu0 %v7124_v5 }
 0x24f   :  { %2284 = vmatpush1.bf16.msra.mxu1 %v7115_v4  ;;  %v38_v4 = vld [vmem:[%s8533_s0 + $0x48] sm:$0xff] }
 0x250   :  { %2285 = vmatprep.subr.bf16.mxu1 %v7129_v6  ;;  %v1693_v5 = vunpack.c.h.bf16 %v38_v4 }
 0x251   :  { %2245 = vmatpush1.bf16.msra.mxu0 %v7134_v7  ;;  %v1692_v7 = vunpack.c.l.bf16 %v38_v4 }
 0x252   :  { %2246 = vmatprep.subr.bf16.mxu0 %v7148_v9 }
 0x253   :  { %2286 = vmatpush1.bf16.msra.mxu1 %v7139_v8 }
 0x254   :  { %2287 = vmatprep.subr.bf16.mxu1 %v7153_v10 }
 0x255   :  { %2247 = vmatpush1.bf16.msra.mxu0 %v7158_v12 }
 0x256   :  { %2517 = vmatprep.subr.bf16.mxu0 %v7172_v14 }
 0x257   :  { %2288 = vmatpush1.bf16.msra.mxu1 %v7163_v13 }
 0x258   :  { %2558 = vmatprep.subr.bf16.mxu1 %v7177_v15  ;;  %v5221_v15 = vld [vmem:[%s8534_s1 + $0xb0] sm:$0xff] }
 0x259   :  { %v1975_v2 = vunpack.c.l.bf16 %v5221_v15  ;;  %v1976_v51 = vunpack.c.h.bf16 %v5221_v15 }
 0x2d8   :  { %v1642_v62 = vpop.f32.mrf.mxu0  ;;  %v1683_v63 = vpop.f32.mrf.mxu1 }
 0x2d9   :  { %v1694_v34 = vadd.f32 %v1690_v59, %v1642_v62  ;;  %v1696_v10 = vadd.f32 %v1692_v7, %v1683_v63  ;;  %v5222_v7 = vld [vmem:[%s8534_s1 + $0xb8] sm:$0xff] }
 0x2da   :  { %v1644_v32 = vpop.f32.mrf.mxu0  ;;  %v1685_v33 = vpop.f32.mrf.mxu1 }
 0x2db   :  { %v5436_v37 = vmul.f32 -1.442695, %v1694_v34  ;;  %v1695_v38 = vadd.f32 %v1691_v61, %v1644_v32  ;;  %v1697_v6 = vadd.f32 %v1693_v5, %v1685_v33 }
 0x2dc   :  { %v1646_v56 = vpop.f32.mrf.mxu0  ;;  %v1687_v30 = vpop.f32.mrf.mxu1 }
 0x2dd   :  { %6253 = vpow2.f32 %v5436_v37  ;;  %v5437_v0 = vmul.f32 -1.442695, %v1695_v38  ;;  %v5438_v8 = vmul.f32 -1.442695, %v1697_v6 }
 0x2de   :  { %v1647_v1 = vpop.f32.mrf.mxu0  ;;  %v1688_v3 = vpop.f32.mrf.mxu1 }
 0x2df   :  { %6255 = vpow2.f32 %v5437_v0 }
 0x2e0   :  { %6257 = vpow2.f32 %v5438_v8  ;;  %v1978_v8 = vunpack.c.h.bf16 %v5222_v7 }
 0x2ea   :  { %v6254_v9 = vpop.eup %6253 }
 0x2eb   :  { %v1986_v12 = vadd.f32 1.0, %v6254_v9 }
 0x2ec   :  { %v6256_v13 = vpop.eup %6255 }
 0x2ed   :  { %6259 = vrcp.f32 %v1986_v12  ;;  %v1992_v14 = vadd.f32 1.0, %v6256_v13  ;;  %v6258_v58 = vpop.eup %6257 }
 0x2ee   :  { %6261 = vtanh.f32 %v1696_v10  ;;  %v1999_v38 = vadd.f32 1.0, %v6258_v58  ;;  %v1977_v10 = vunpack.c.l.bf16 %v5222_v7 }
 0x2ef   :  { %6263 = vrcp.f32 %v1992_v14 }
 0x2f8   :  { %v1927_v28 = vpop.f32.mrf.mxu0  ;;  %v1968_v43 = vpop.f32.mrf.mxu1 }
 0x2f9   :  { %v1979_v59 = vadd.f32 %v1975_v2, %v1927_v28 }
 0x2fa   :  { %v6260_v61 = vpop.eup %6259  ;;  %v1929_v62 = vpop.f32.mrf.mxu0 }
 0x2fb   :  { %v1970_v63 = vpop.f32.mrf.mxu1  ;;  %v6262_v34 = vpop.eup %6261  ;;  %v5439_v32 = vmul.f32 -1.442695, %v1979_v59  ;;  %v1980_v33 = vadd.f32 %v1976_v51, %v1929_v62 }
 0x2fc   :  { %v6264_v37 = vpop.eup %6263  ;;  %v1931_v56 = vpop.f32.mrf.mxu0  ;;  %v2003_v0 = vmul.f32 %v6262_v34, %v6260_v61  ;;  %v1982_v9 = vadd.f32 %v1978_v8, %v1970_v63  ;;  %v7632_v63 = vld [vmem:[%s8535_s2 + $0x24] ss:$16 sps:$4 sm:$0xff]   ;;  %v7637_v34 = vld [vmem:[%s8535_s2 + $0x2c] ss:$16 sps:$4 sm:$0xff]  }
 0x2fd   :  { %v1972_v30 = vpop.f32.mrf.mxu1  ;;  %v2002_v1 = vmul.f32 %v6264_v37, %v7191_v41  ;;  %6265 = vpow2.f32 %v5439_v32  ;;  %v5440_v3 = vmul.f32 -1.442695, %v1980_v33  ;;  %v1981_v41 = vadd.f32 %v1977_v10, %v1968_v43  ;;  %v7642_v32 = vld [vmem:[%s8535_s2 + $0x20] ss:$16 sps:$4 sm:$0xff]   ;;  %v7647_v33 = vld [vmem:[%s8535_s2 + $0x28] ss:$16 sps:$4 sm:$0xff]  }
 0x2fe   :  { %v1932_v4 = vpop.f32.mrf.mxu0  ;;  %v5441_v12 = vmul.f32 -1.442695, %v1982_v9  ;;  %v7656_v37 = vld [vmem:[%s8535_s2 + $0x4] ss:$16 sps:$4 sm:$0xff]   ;;  %v7666_v56 = vld [vmem:[%s8535_s2] ss:$16 sps:$4 sm:$0xff]  }
 0x2ff   :  { %v1973_v5 = vpop.f32.mrf.mxu1  ;;  %v7455_v6 = vadd.f32 %v2003_v0, %v2002_v1  ;;  %6267 = vpow2.f32 %v5440_v3  ;;  %v7671_v30 = vld [vmem:[%s8535_s2 + $0x8] ss:$16 sps:$4 sm:$0xff]   ;;  %v7680_v0 = vld [vmem:[%s8536_s3 + $0xe4] ss:$16 sps:$4 sm:$0xff]   ;;  %v7685_v1 = vld [vmem:[%s8536_s3 + $0xec] ss:$16 sps:$4 sm:$0xff]  }
 0x300   :  { %6269 = vrcp.f32 %v1999_v38  ;;  %v7661_v38 = vld [vmem:[%s8535_s2 + $0xc] ss:$16 sps:$4 sm:$0xff]   ;;  %v40_v3 = vld [vmem:[%s8533_s0 + $0x60] sm:$0xff] }
 0x301   :  { %6271 = vtanh.f32 %v7455_v6  ;;  %v2314_v4 = vunpack.c.l.bf16 %v40_v3  ;;  %v2315_v5 = vunpack.c.h.bf16 %v40_v3 }
 0x302   :  { %6273 = vpow2.f32 %v5441_v12 }
 0x30a   :  { %v6266_v13 = vpop.eup %6265 }
 0x30b   :  { %v2010_v14 = vadd.f32 1.0, %v6266_v13 }
 0x30c   :  { %v6268_v15 = vpop.eup %6267 }
 0x30d   :  { %v6270_v2 = vpop.eup %6269  ;;  %6275 = vrcp.f32 %v2010_v14  ;;  %v2016_v51 = vadd.f32 1.0, %v6268_v15 }
 0x30e   :  { %v6272_v28 = vpop.eup %6271  ;;  %6277 = vtanh.f32 %v1981_v41 }
 0x30f   :  { %6279 = vrcp.f32 %v2016_v51  ;;  %v2006_v58 = vmul.f32 %v6272_v28, %v6270_v2  ;;  %v6274_v43 = vpop.eup %6273 }
 0x310   :  { %v2023_v62 = vadd.f32 1.0, %v6274_v43 }
 0x311   :  { %v2031_v59 = vpack.c.bf16 %v2006_v58, %v2006_v58  ;;  %v42_v58 = vld [vmem:[%s8533_s0 + $0x68] sm:$0xff] }
 0x312   :  { %6281 = vrcp.f32 %v2023_v62 }
 0x313   :  { %5442 = vst [vmem:[%s8539_s6 + $0x8] sm:$0xf] %v2031_v59  ;;  %2265 = vmatmul.mubr.bf16.vlgmr.msra.gmra.mxu0 %v2031_v59  ;;  %2306 = vmatmul.mubr.bf16.vlgmr.msra.gmra.mxu1 %v2031_v59  ;;  %v2317_v59 = vunpack.c.h.bf16 %v42_v58 }
 0x314   :  { %2518 = vmatpush1.bf16.msra.mxu0 %v7200_v52  ;;  %2559 = vmatpush1.bf16.msra.mxu1 %v7205_v16 }
 0x315   :  { %2519 = vmatprep.subr.bf16.mxu0 %v7210_v17  ;;  %2560 = vmatprep.subr.bf16.mxu1 %v7215_v18 }
 0x316   :  { %2549 = vmatprep.mubr.bf16.mxu0 %v8559_v60  ;;  %2590 = vmatprep.mubr.bf16.mxu1 %v8559_v60 }
 0x318   :  { %2520 = vmatpush1.bf16.msra.mxu0 %v7225_v19  ;;  %2561 = vmatpush1.bf16.msra.mxu1 %v7230_v20  ;;  %v8566_v20 = vld [vmem:[#allocation8_spill] sm:$0xff] }
 0x319   :  { %2521 = vmatprep.subr.bf16.mxu0 %v7237_v21  ;;  %2562 = vmatprep.subr.bf16.mxu1 %v7242_v22  ;;  %v8567_v21 = vld [vmem:[#allocation9_spill] sm:$0xff]  ;;  %v8568_v22 = vld [vmem:[#allocation10_spill] sm:$0xff] }
 0x31a   :  { %v6276_v52 = vpop.eup %6275 }
 0x31b   :  { %v6278_v61 = vpop.eup %6277 }
 0x31c   :  { %v6280_v16 = vpop.eup %6279  ;;  %2522 = vmatpush1.bf16.msra.mxu0 %v7251_v23  ;;  %2563 = vmatpush1.bf16.msra.mxu1 %v7256_v24  ;;  %v2027_v17 = vmul.f32 %v6278_v61, %v6276_v52  ;;  %v2316_v52 = vunpack.c.l.bf16 %v42_v58 }
 0x31d   :  { %v2026_v18 = vmul.f32 %v6280_v16, %v7295_v11  ;;  %2523 = vmatprep.subr.bf16.mxu0 %v7263_v26  ;;  %2564 = vmatprep.subr.bf16.mxu1 %v7268_v27  ;;  %v7536_v11 = vld [vmem:[%s8535_s2 + $0xa4] ss:$16 sps:$4 sm:$0xff]  }
 0x31f   :  { %v7479_v19 = vadd.f32 %v2027_v17, %v2026_v18  ;;  %v6282_v23 = vpop.eup %6281 }
 0x320   :  { %2524 = vmatpush1.bf16.msra.mxu0 %v7275_v42  ;;  %2565 = vmatpush1.bf16.msra.mxu1 %v7280_v31  ;;  %v7512_v42 = vld [vmem:[%s8535_s2 + $0xe4] ss:$16 sps:$4 sm:$0xff]   ;;  %v7517_v31 = vld [vmem:[%s8535_s2 + $0xe0] ss:$16 sps:$4 sm:$0xff]  }
 0x321   :  { %2525 = vmatprep.subr.bf16.mxu0 %v7288_v44  ;;  %2566 = vmatprep.subr.bf16.mxu1 %v7293_v45  ;;  %6283 = vtanh.f32 %v7479_v19  ;;  %v7524_v44 = vld [vmem:[%s8535_s2 + $0xc4] ss:$16 sps:$4 sm:$0xff]   ;;  %v7529_v45 = vld [vmem:[%s8535_s2 + $0xc0] ss:$16 sps:$4 sm:$0xff]  }
 0x324   :  { %2526 = vmatpush1.bf16.msra.mxu0 %v7302_v40  ;;  %2567 = vmatpush1.bf16.msra.mxu1 %v7307_v46  ;;  %v7541_v40 = vld [vmem:[%s8535_s2 + $0xac] ss:$16 sps:$4 sm:$0xff]   ;;  %v7546_v46 = vld [vmem:[%s8535_s2 + $0xa0] ss:$16 sps:$4 sm:$0xff]  }
 0x325   :  { %2527 = vmatprep.subr.bf16.mxu0 %v7314_v47  ;;  %2568 = vmatprep.subr.bf16.mxu1 %v7319_v48  ;;  %v7551_v47 = vld [vmem:[%s8535_s2 + $0xa8] ss:$16 sps:$4 sm:$0xff]   ;;  %v7560_v48 = vld [vmem:[%s8535_s2 + $0x84] ss:$16 sps:$4 sm:$0xff]  }
 0x328   :  { %2528 = vmatpush1.bf16.msra.mxu0 %v7327_v49  ;;  %2569 = vmatpush1.bf16.msra.mxu1 %v7332_v50  ;;  %v7565_v49 = vld [vmem:[%s8535_s2 + $0x8c] ss:$16 sps:$4 sm:$0xff]   ;;  %v7570_v50 = vld [vmem:[%s8535_s2 + $0x80] ss:$16 sps:$4 sm:$0xff]  }
 0x329   :  { %2529 = vmatprep.subr.bf16.mxu0 %v8566_v20  ;;  %2570 = vmatprep.subr.bf16.mxu1 %v8567_v21  ;;  %v5219_v21 = vld [vmem:[%s8534_s1 + $0x90] sm:$0xff] }
 0x32c   :  { %2530 = vmatpush1.bf16.msra.mxu0 %v7351_v25  ;;  %2571 = vmatpush1.bf16.msra.mxu1 %v8568_v22  ;;  %v7575_v25 = vld [vmem:[%s8535_s2 + $0x88] ss:$16 sps:$4 sm:$0xff]   ;;  %v2599_v22 = vunpack.c.l.bf16 %v5219_v21 }
 0x32d   :  { %2531 = vmatprep.subr.bf16.mxu0 %v7363_v29  ;;  %2572 = vmatprep.subr.bf16.mxu1 %v7368_v35  ;;  %v7584_v29 = vld [vmem:[%s8535_s2 + $0x64] ss:$16 sps:$4 sm:$0xff]   ;;  %v7589_v35 = vld [vmem:[%s8535_s2 + $0x6c] ss:$16 sps:$4 sm:$0xff]  }
 0x32e   :  { %v6284_v24 = vpop.eup %6283 }
 0x32f   :  { %v2030_v26 = vmul.f32 %v6284_v24, %v6282_v23  ;;  %v2600_v23 = vunpack.c.h.bf16 %v5219_v21 }
 0x330   :  { %2532 = vmatpush1.bf16.msra.mxu0 %v7375_v36  ;;  %2573 = vmatpush1.bf16.msra.mxu1 %v7380_v39  ;;  %v7594_v36 = vld [vmem:[%s8535_s2 + $0x60] ss:$16 sps:$4 sm:$0xff]   ;;  %v7599_v39 = vld [vmem:[%s8535_s2 + $0x68] ss:$16 sps:$4 sm:$0xff]  }
 0x331   :  { %v2034_v27 = vpack.c.bf16 %v2030_v26, %v2030_v26  ;;  %2897 = vmatprep.subr.bf16.mxu1 %v7411_v53  ;;  %2856 = vmatprep.subr.bf16.mxu0 %v7512_v42  ;;  %v7608_v53 = vld [vmem:[%s8535_s2 + $0x44] ss:$16 sps:$4 sm:$0xff]  }
 0x333   :  { %5443 = vst [vmem:[%s8540_s7 + $0x14] sm:$0xf] %v2034_v27  ;;  %2550 = vmatmul.mubr.bf16.vlgmr.msra.gmra.mxu0 %v2034_v27  ;;  %2591 = vmatmul.mubr.bf16.vlgmr.msra.gmra.mxu1 %v2034_v27 }
 0x334   :  { %2898 = vmatpush1.bf16.msra.mxu1 %v7416_v54  ;;  %2888 = vmatprep.mubr.bf16.mxu0 %v8559_v60  ;;  %v7613_v54 = vld [vmem:[%s8535_s2 + $0x4c] ss:$16 sps:$4 sm:$0xff]  }
 0x335   :  { %2899 = vmatprep.subr.bf16.mxu1 %v7423_v55  ;;  %2929 = vmatprep.mubr.bf16.mxu1 %v8559_v60  ;;  %v7618_v55 = vld [vmem:[%s8535_s2 + $0x40] ss:$16 sps:$4 sm:$0xff]  }
 0x336   :  { %2857 = vmatpush1.bf16.msra.mxu0 %v7517_v31 }
 0x337   :  { %2858 = vmatprep.subr.bf16.mxu0 %v7524_v44 }
 0x338   :  { %2900 = vmatpush1.bf16.msra.mxu1 %v7428_v57  ;;  %v7623_v57 = vld [vmem:[%s8535_s2 + $0x48] ss:$16 sps:$4 sm:$0xff]  }
 0x339   :  { %2901 = vmatprep.subr.bf16.mxu1 %v7541_v40 }
 0x33a   :  { %2859 = vmatpush1.bf16.msra.mxu0 %v7529_v45 }
 0x33b   :  { %2860 = vmatprep.subr.bf16.mxu0 %v7536_v11 }
 0x33c   :  { %2902 = vmatpush1.bf16.msra.mxu1 %v7551_v47 }
 0x33d   :  { %2903 = vmatprep.subr.bf16.mxu1 %v7565_v49 }
 0x33e   :  { %2861 = vmatpush1.bf16.msra.mxu0 %v7546_v46 }
 0x33f   :  { %2862 = vmatprep.subr.bf16.mxu0 %v7560_v48 }
 0x340   :  { %2904 = vmatpush1.bf16.msra.mxu1 %v7575_v25 }
 0x341   :  { %2905 = vmatprep.subr.bf16.mxu1 %v7589_v35 }
 0x342   :  { %2863 = vmatpush1.bf16.msra.mxu0 %v7570_v50 }
 0x343   :  { %2864 = vmatprep.subr.bf16.mxu0 %v7584_v29 }
 0x344   :  { %2906 = vmatpush1.bf16.msra.mxu1 %v7599_v39 }
 0x345   :  { %2907 = vmatprep.subr.bf16.mxu1 %v7613_v54 }
 0x346   :  { %2865 = vmatpush1.bf16.msra.mxu0 %v7594_v36 }
 0x347   :  { %2866 = vmatprep.subr.bf16.mxu0 %v7608_v53 }
 0x348   :  { %2908 = vmatpush1.bf16.msra.mxu1 %v7623_v57 }
 0x349   :  { %2909 = vmatprep.subr.bf16.mxu1 %v7637_v34 }
 0x34a   :  { %2867 = vmatpush1.bf16.msra.mxu0 %v7618_v55 }
 0x34b   :  { %2868 = vmatprep.subr.bf16.mxu0 %v7632_v63 }
 0x34c   :  { %2910 = vmatpush1.bf16.msra.mxu1 %v7647_v33 }
 0x34d   :  { %2911 = vmatprep.subr.bf16.mxu1 %v7661_v38 }
 0x34e   :  { %2869 = vmatpush1.bf16.msra.mxu0 %v7642_v32 }
 0x34f   :  { %2870 = vmatprep.subr.bf16.mxu0 %v7656_v37 }
 0x350   :  { %2912 = vmatpush1.bf16.msra.mxu1 %v7671_v30 }
 0x351   :  { %3182 = vmatprep.subr.bf16.mxu1 %v7685_v1 }
 0x352   :  { %2871 = vmatpush1.bf16.msra.mxu0 %v7666_v56 }
 0x353   :  { %3141 = vmatprep.subr.bf16.mxu0 %v7680_v0 }
 0x3d3   :  { %v2266_v7 = vpop.f32.mrf.mxu0  ;;  %v2307_v8 = vpop.f32.mrf.mxu1 }
 0x3d4   :  { %v2318_v9 = vadd.f32 %v2314_v4, %v2266_v7  ;;  %v2320_v62 = vadd.f32 %v2316_v52, %v2307_v8 }
 0x3d5   :  { %v2268_v10 = vpop.f32.mrf.mxu0  ;;  %v2309_v12 = vpop.f32.mrf.mxu1 }
 0x3d6   :  { %v5508_v13 = vmul.f32 -1.442695, %v2318_v9  ;;  %v2319_v41 = vadd.f32 %v2315_v5, %v2268_v10  ;;  %v2321_v43 = vadd.f32 %v2317_v59, %v2309_v12 }
 0x3d7   :  { %v2270_v14 = vpop.f32.mrf.mxu0  ;;  %v2311_v15 = vpop.f32.mrf.mxu1 }
 0x3d8   :  { %6285 = vpow2.f32 %v5508_v13  ;;  %v5509_v2 = vmul.f32 -1.442695, %v2319_v41  ;;  %v5510_v61 = vmul.f32 -1.442695, %v2321_v43  ;;  %v5220_v43 = vld [vmem:[%s8534_s1 + $0x98] sm:$0xff] }
 0x3d9   :  { %v2271_v51 = vpop.f32.mrf.mxu0  ;;  %v2312_v28 = vpop.f32.mrf.mxu1  ;;  %v2602_v52 = vunpack.c.h.bf16 %v5220_v43 }
 0x3da   :  { %6287 = vpow2.f32 %v5509_v2 }
 0x3db   :  { %6289 = vpow2.f32 %v5510_v61 }
 0x3e5   :  { %v6286_v16 = vpop.eup %6285 }
 0x3e6   :  { %v2610_v17 = vadd.f32 1.0, %v6286_v16  ;;  %v2601_v16 = vunpack.c.l.bf16 %v5220_v43  ;;  %v7783_v43 = vld [vmem:[%s8536_s3 + $0x80] ss:$16 sps:$4 sm:$0xff]  }
 0x3e7   :  { %v6288_v18 = vpop.eup %6287 }
 0x3e8   :  { %6291 = vrcp.f32 %v2610_v17  ;;  %v2616_v20 = vadd.f32 1.0, %v6288_v18  ;;  %v6290_v27 = vpop.eup %6289 }
 0x3e9   :  { %6293 = vtanh.f32 %v2320_v62  ;;  %v2623_v13 = vadd.f32 1.0, %v6290_v27  ;;  %v7708_v27 = vld [vmem:[%s8536_s3 + $0xe0] ss:$16 sps:$4 sm:$0xff]  }
 0x3ea   :  { %6295 = vrcp.f32 %v2616_v20 }
 0x3f3   :  { %v2551_v24 = vpop.f32.mrf.mxu0  ;;  %v2592_v26 = vpop.f32.mrf.mxu1 }
 0x3f4   :  { %v2603_v3 = vadd.f32 %v2599_v22, %v2551_v24 }
 0x3f5   :  { %v6292_v4 = vpop.eup %6291  ;;  %v2553_v5 = vpop.f32.mrf.mxu0 }
 0x3f6   :  { %v2594_v7 = vpop.f32.mrf.mxu1  ;;  %v6294_v8 = vpop.eup %6293  ;;  %v5511_v9 = vmul.f32 -1.442695, %v2603_v3  ;;  %v2604_v10 = vadd.f32 %v2600_v23, %v2553_v5  ;;  %v7713_v3 = vld [vmem:[%s8536_s3 + $0xe8] ss:$16 sps:$4 sm:$0xff]   ;;  %v7723_v5 = vld [vmem:[%s8536_s3 + $0xcc] ss:$16 sps:$4 sm:$0xff]  }
 0x3f7   :  { %v6296_v12 = vpop.eup %6295  ;;  %v2555_v41 = vpop.f32.mrf.mxu0  ;;  %v2627_v15 = vmul.f32 %v6294_v8, %v6292_v4  ;;  %v2606_v61 = vadd.f32 %v2602_v52, %v2594_v7  ;;  %v7718_v4 = vld [vmem:[%s8536_s3 + $0xc4] ss:$16 sps:$4 sm:$0xff]   ;;  %v7733_v7 = vld [vmem:[%s8536_s3 + $0xc0] ss:$16 sps:$4 sm:$0xff]   ;;  %v7738_v8 = vld [vmem:[%s8536_s3 + $0xc8] ss:$16 sps:$4 sm:$0xff]  }
 0x3f8   :  { %v2596_v14 = vpop.f32.mrf.mxu1  ;;  %v2626_v2 = vmul.f32 %v6296_v12, %v7455_v6  ;;  %6297 = vpow2.f32 %v5511_v9  ;;  %v5512_v51 = vmul.f32 -1.442695, %v2604_v10  ;;  %v2605_v6 = vadd.f32 %v2601_v16, %v2592_v26  ;;  %v7745_v9 = vld [vmem:[%s8536_s3 + $0xa4] ss:$16 sps:$4 sm:$0xff]   ;;  %v7750_v10 = vld [vmem:[%s8536_s3 + $0xac] ss:$16 sps:$4 sm:$0xff]  }
 0x3f9   :  { %v2556_v28 = vpop.f32.mrf.mxu0  ;;  %v5513_v62 = vmul.f32 -1.442695, %v2606_v61  ;;  %v7759_v12 = vld [vmem:[%s8536_s3 + $0xa0] ss:$16 sps:$4 sm:$0xff]   ;;  %v7771_v14 = vld [vmem:[%s8536_s3 + $0x84] ss:$16 sps:$4 sm:$0xff]  }
 0x3fa   :  { %v2597_v58 = vpop.f32.mrf.mxu1  ;;  %v7699_v59 = vadd.f32 %v2627_v15, %v2626_v2  ;;  %6299 = vpow2.f32 %v5512_v51  ;;  %v7776_v15 = vld [vmem:[%s8536_s3 + $0x8c] ss:$16 sps:$4 sm:$0xff]   ;;  %v7788_v52 = vld [vmem:[%s8536_s3 + $0x88] ss:$16 sps:$4 sm:$0xff]  }
 0x3fb   :  { %6301 = vrcp.f32 %v2623_v13  ;;  %v7764_v13 = vld [vmem:[%s8536_s3 + $0xa8] ss:$16 sps:$4 sm:$0xff]  }
 0x3fc   :  { %6303 = vtanh.f32 %v7699_v59 }
 0x3fd   :  { %6305 = vpow2.f32 %v5513_v62  ;;  %v7796_v62 = vld [vmem:[%s8536_s3 + $0x64] ss:$16 sps:$4 sm:$0xff]  }
 0x405   :  { %v6298_v17 = vpop.eup %6297 }
 0x406   :  { %v2634_v18 = vadd.f32 1.0, %v6298_v17  ;;  %v7801_v17 = vld [vmem:[%s8536_s3 + $0x6c] ss:$16 sps:$4 sm:$0xff]  }
 0x407   :  { %v6300_v20 = vpop.eup %6299 }
 0x408   :  { %v6302_v21 = vpop.eup %6301  ;;  %6307 = vrcp.f32 %v2634_v18  ;;  %v2640_v22 = vadd.f32 1.0, %v6300_v20  ;;  %v7815_v18 = vld [vmem:[%s8536_s3 + $0x68] ss:$16 sps:$4 sm:$0xff]   ;;  %v7822_v20 = vld [vmem:[%s8536_s3 + $0x44] ss:$16 sps:$4 sm:$0xff]  }
 0x409   :  { %v6304_v23 = vpop.eup %6303  ;;  %6309 = vtanh.f32 %v2605_v6 }
 0x40a   :  { %6311 = vrcp.f32 %v2640_v22  ;;  %v2630_v24 = vmul.f32 %v6304_v23, %v6302_v21  ;;  %v6306_v41 = vpop.eup %6305  ;;  %v7827_v21 = vld [vmem:[%s8536_s3 + $0x4c] ss:$16 sps:$4 sm:$0xff]   ;;  %v7835_v22 = vld [vmem:[%s8536_s3 + $0x40] ss:$16 sps:$4 sm:$0xff]   ;;  %v7840_v23 = vld [vmem:[%s8536_s3 + $0x48] ss:$16 sps:$4 sm:$0xff]  }
 0x40b   :  { %v2647_v58 = vadd.f32 1.0, %v6306_v41  ;;  %v7859_v41 = vld [vmem:[%s8536_s3 + $0x20] ss:$16 sps:$4 sm:$0xff]  }
 0x40c   :  { %v2655_v26 = vpack.c.bf16 %v2630_v24, %v2630_v24  ;;  %v7847_v24 = vld [vmem:[%s8536_s3 + $0x24] ss:$16 sps:$4 sm:$0xff]  }
 0x40d   :  { %6313 = vrcp.f32 %v2647_v58  ;;  %8569 = vst [vmem:[#allocation8_spill] sm:$0xff] %v7847_v24  ;;  %v7883_v58 = vld [vmem:[%s8536_s3] ss:$16 sps:$4 sm:$0xff]  }
 0x40e   :  { %5514 = vst [vmem:[%s8539_s6 + $0xc] sm:$0xf] %v2655_v26  ;;  %2889 = vmatmul.mubr.bf16.vlgmr.msra.gmra.mxu0 %v2655_v26  ;;  %2930 = vmatmul.mubr.bf16.vlgmr.msra.gmra.mxu1 %v2655_v26  ;;  %v7852_v26 = vld [vmem:[%s8536_s3 + $0x2c] ss:$16 sps:$4 sm:$0xff]  }
 0x40f   :  { %3142 = vmatpush1.bf16.msra.mxu0 %v7708_v27  ;;  %3183 = vmatpush1.bf16.msra.mxu1 %v7713_v3  ;;  %8570 = vst [vmem:[#allocation9_spill] sm:$0xff] %v7852_v26 }
 0x410   :  { %3143 = vmatprep.subr.bf16.mxu0 %v7718_v4  ;;  %3184 = vmatprep.subr.bf16.mxu1 %v7723_v5 }
 0x411   :  { %3173 = vmatprep.mubr.bf16.mxu0 %v8559_v60  ;;  %3214 = vmatprep.mubr.bf16.mxu1 %v8559_v60 }
 0x413   :  { %3144 = vmatpush1.bf16.msra.mxu0 %v7733_v7  ;;  %3185 = vmatpush1.bf16.msra.mxu1 %v7738_v8 }
 0x414   :  { %3145 = vmatprep.subr.bf16.mxu0 %v7745_v9  ;;  %3186 = vmatprep.subr.bf16.mxu1 %v7750_v10 }
 0x415   :  { %v6308_v2 = vpop.eup %6307 }
 0x416   :  { %v6310_v51 = vpop.eup %6309 }
 0x417   :  { %v6312_v28 = vpop.eup %6311  ;;  %3146 = vmatpush1.bf16.msra.mxu0 %v7759_v12  ;;  %3187 = vmatpush1.bf16.msra.mxu1 %v7764_v13  ;;  %v2651_v61 = vmul.f32 %v6310_v51, %v6308_v2  ;;  %v7864_v2 = vld [vmem:[%s8536_s3 + $0x28] ss:$16 sps:$4 sm:$0xff]   ;;  %v7871_v51 = vld [vmem:[%s8536_s3 + $0x4] ss:$16 sps:$4 sm:$0xff]  }
 0x418   :  { %v2650_v16 = vmul.f32 %v6312_v28, %v7479_v19  ;;  %3147 = vmatprep.subr.bf16.mxu0 %v7771_v14  ;;  %3188 = vmatprep.subr.bf16.mxu1 %v7776_v15  ;;  %v7810_v19 = vld [vmem:[%s8536_s3 + $0x60] ss:$16 sps:$4 sm:$0xff]   ;;  %8571 = vst [vmem:[#allocation10_spill] sm:$0xff] %v7864_v2  ;;  %v7876_v28 = vld [vmem:[%s8536_s3 + $0xc] ss:$16 sps:$4 sm:$0xff]  }
 0x41a   :  { %v7803_v6 = vadd.f32 %v2651_v61, %v2650_v16  ;;  %v7888_v61 = vld [vmem:[%s8536_s3 + $0x8] ss:$16 sps:$4 sm:$0xff]   ;;  %v6314_v16 = vpop.eup %6313 }
 0x41b   :  { %3148 = vmatpush1.bf16.msra.mxu0 %v7783_v43  ;;  %3189 = vmatpush1.bf16.msra.mxu1 %v7788_v52 }
 0x41c   :  { %3149 = vmatprep.subr.bf16.mxu0 %v7796_v62  ;;  %3190 = vmatprep.subr.bf16.mxu1 %v7801_v17  ;;  %6315 = vtanh.f32 %v7803_v6 }
 0x41f   :  { %3150 = vmatpush1.bf16.msra.mxu0 %v7810_v19  ;;  %3191 = vmatpush1.bf16.msra.mxu1 %v7815_v18 }
 0x420   :  { %3151 = vmatprep.subr.bf16.mxu0 %v7822_v20  ;;  %3192 = vmatprep.subr.bf16.mxu1 %v7827_v21 }
 0x423   :  { %3152 = vmatpush1.bf16.msra.mxu0 %v7835_v22  ;;  %3193 = vmatpush1.bf16.msra.mxu1 %v7840_v23 }
 0x424   :  { %3153 = vmatprep.subr.bf16.mxu0 %v7847_v24  ;;  %3194 = vmatprep.subr.bf16.mxu1 %v7852_v26 }
 0x427   :  { %3154 = vmatpush1.bf16.msra.mxu0 %v7859_v41  ;;  %3195 = vmatpush1.bf16.msra.mxu1 %v7864_v2 }
 0x428   :  { %3155 = vmatprep.subr.bf16.mxu0 %v7871_v51  ;;  %3196 = vmatprep.subr.bf16.mxu1 %v7876_v28 }
 0x429   :  { %v6316_v26 = vpop.eup %6315 }
 0x42a   :  { %v2654_v24 = vmul.f32 %v6316_v26, %v6314_v16 }
 0x42b   :  { %3156 = vmatpush1.bf16.msra.mxu0 %v7883_v58  ;;  %3197 = vmatpush1.bf16.msra.mxu1 %v7888_v61 }
 0x42c   :  { %v2658_v2 = vpack.c.bf16 %v2654_v24, %v2654_v24  ;;  %3480 = vmatprep.subr.bf16.mxu0 %v7512_v42  ;;  %v7919_v42 = vld [vmem:[%s8535_s2 + $0xec] ss:$16 sps:$4 sm:$0xff]  }
 0x42d   :  { %3521 = vmatprep.subr.bf16.mxu1 %v7919_v42 }
 0x42e   :  { %5515 = vst [vmem:[%s8540_s7 + $0x10] sm:$0xf] %v2658_v2  ;;  %3174 = vmatmul.mubr.bf16.vlgmr.msra.gmra.mxu0 %v2658_v2  ;;  %3215 = vmatmul.mubr.bf16.vlgmr.msra.gmra.mxu1 %v2658_v2 }
 0x42f   :  { %3481 = vmatpush1.bf16.msra.mxu0 %v7517_v31  ;;  %3512 = vmatprep.mubr.bf16.mxu0 %v8559_v60  ;;  %v7924_v31 = vld [vmem:[%s8535_s2 + $0xe8] ss:$16 sps:$4 sm:$0xff]  }
 0x430   :  { %3482 = vmatprep.subr.bf16.mxu0 %v7524_v44  ;;  %3553 = vmatprep.mubr.bf16.mxu1 %v8559_v60  ;;  %v7931_v44 = vld [vmem:[%s8535_s2 + $0xcc] ss:$16 sps:$4 sm:$0xff]  }
 0x431   :  { %3522 = vmatpush1.bf16.msra.mxu1 %v7924_v31 }
 0x432   :  { %3523 = vmatprep.subr.bf16.mxu1 %v7931_v44 }
 0x433   :  { %3483 = vmatpush1.bf16.msra.mxu0 %v7529_v45  ;;  %v7936_v45 = vld [vmem:[%s8535_s2 + $0xc8] ss:$16 sps:$4 sm:$0xff]  }
 0x434   :  { %3484 = vmatprep.subr.bf16.mxu0 %v7536_v11  ;;  %v44_v11 = vld [vmem:[%s8533_s0 + $0x80] sm:$0xff] }
 0x435   :  { %3524 = vmatpush1.bf16.msra.mxu1 %v7936_v45 }
 0x436   :  { %3525 = vmatprep.subr.bf16.mxu1 %v7541_v40  ;;  %v2938_v40 = vunpack.c.l.bf16 %v44_v11 }
 0x437   :  { %3485 = vmatpush1.bf16.msra.mxu0 %v7546_v46  ;;  %v2939_v46 = vunpack.c.h.bf16 %v44_v11 }
 0x438   :  { %3486 = vmatprep.subr.bf16.mxu0 %v7560_v48 }
 0x439   :  { %3526 = vmatpush1.bf16.msra.mxu1 %v7551_v47 }
 0x43a   :  { %3527 = vmatprep.subr.bf16.mxu1 %v7565_v49 }
 0x43b   :  { %3487 = vmatpush1.bf16.msra.mxu0 %v7570_v50 }
 0x43c   :  { %3488 = vmatprep.subr.bf16.mxu0 %v7584_v29 }
 0x43d   :  { %3528 = vmatpush1.bf16.msra.mxu1 %v7575_v25 }
 0x43e   :  { %3529 = vmatprep.subr.bf16.mxu1 %v7589_v35 }
 0x43f   :  { %3489 = vmatpush1.bf16.msra.mxu0 %v7594_v36 }
 0x440   :  { %3490 = vmatprep.subr.bf16.mxu0 %v7608_v53 }
 0x441   :  { %3530 = vmatpush1.bf16.msra.mxu1 %v7599_v39 }
 0x442   :  { %3531 = vmatprep.subr.bf16.mxu1 %v7613_v54 }
 0x443   :  { %3491 = vmatpush1.bf16.msra.mxu0 %v7618_v55 }
 0x444   :  { %3492 = vmatprep.subr.bf16.mxu0 %v7632_v63 }
 0x445   :  { %3532 = vmatpush1.bf16.msra.mxu1 %v7623_v57  ;;  %v46_v57 = vld [vmem:[%s8533_s0 + $0x88] sm:$0xff] }
 0x446   :  { %3533 = vmatprep.subr.bf16.mxu1 %v7637_v34  ;;  %v2941_v63 = vunpack.c.h.bf16 %v46_v57 }
 0x447   :  { %3493 = vmatpush1.bf16.msra.mxu0 %v7642_v32  ;;  %v2940_v32 = vunpack.c.l.bf16 %v46_v57 }
 0x448   :  { %3494 = vmatprep.subr.bf16.mxu0 %v7656_v37 }
 0x449   :  { %3534 = vmatpush1.bf16.msra.mxu1 %v7647_v33 }
 0x44a   :  { %3535 = vmatprep.subr.bf16.mxu1 %v7661_v38 }
 0x44b   :  { %3495 = vmatpush1.bf16.msra.mxu0 %v7666_v56 }
 0x44c   :  { %3765 = vmatprep.subr.bf16.mxu0 %v7680_v0 }
 0x44d   :  { %3536 = vmatpush1.bf16.msra.mxu1 %v7671_v30 }
 0x44e   :  { %3806 = vmatprep.subr.bf16.mxu1 %v7685_v1  ;;  %v5217_v1 = vld [vmem:[%s8534_s1 + $0x70] sm:$0xff] }
 0x44f   :  { %v3223_v24 = vunpack.c.l.bf16 %v5217_v1  ;;  %v3224_v26 = vunpack.c.h.bf16 %v5217_v1 }
 0x4ce   :  { %v2890_v47 = vpop.f32.mrf.mxu0  ;;  %v2931_v48 = vpop.f32.mrf.mxu1 }
 0x4cf   :  { %v2942_v49 = vadd.f32 %v2938_v40, %v2890_v47  ;;  %v2944_v38 = vadd.f32 %v2940_v32, %v2931_v48  ;;  %v5218_v32 = vld [vmem:[%s8534_s1 + $0x78] sm:$0xff] }
 0x4d0   :  { %v2892_v50 = vpop.f32.mrf.mxu0  ;;  %v2933_v25 = vpop.f32.mrf.mxu1 }
 0x4d1   :  { %v5580_v29 = vmul.f32 -1.442695, %v2942_v49  ;;  %v2943_v35 = vadd.f32 %v2939_v46, %v2892_v50  ;;  %v2945_v34 = vadd.f32 %v2941_v63, %v2933_v25 }
 0x4d2   :  { %v2894_v36 = vpop.f32.mrf.mxu0  ;;  %v2935_v39 = vpop.f32.mrf.mxu1 }
 0x4d3   :  { %6317 = vpow2.f32 %v5580_v29  ;;  %v5581_v53 = vmul.f32 -1.442695, %v2943_v35  ;;  %v5582_v33 = vmul.f32 -1.442695, %v2945_v34 }
 0x4d4   :  { %v2895_v54 = vpop.f32.mrf.mxu0  ;;  %v2936_v55 = vpop.f32.mrf.mxu1 }
 0x4d5   :  { %6319 = vpow2.f32 %v5581_v53 }
 0x4d6   :  { %6321 = vpow2.f32 %v5582_v33  ;;  %v3226_v33 = vunpack.c.h.bf16 %v5218_v32 }
 0x4e0   :  { %v6318_v37 = vpop.eup %6317 }
 0x4e1   :  { %v3234_v56 = vadd.f32 1.0, %v6318_v37 }
 0x4e2   :  { %v6320_v30 = vpop.eup %6319 }
 0x4e3   :  { %6323 = vrcp.f32 %v3234_v56  ;;  %v3240_v0 = vadd.f32 1.0, %v6320_v30  ;;  %v6322_v11 = vpop.eup %6321 }
 0x4e4   :  { %6325 = vtanh.f32 %v2944_v38  ;;  %v3247_v35 = vadd.f32 1.0, %v6322_v11  ;;  %v3225_v38 = vunpack.c.l.bf16 %v5218_v32 }
 0x4e5   :  { %6327 = vrcp.f32 %v3240_v0 }
 0x4ee   :  { %v3175_v2 = vpop.f32.mrf.mxu0  ;;  %v3216_v16 = vpop.f32.mrf.mxu1 }
 0x4ef   :  { %v3227_v40 = vadd.f32 %v3223_v24, %v3175_v2 }
 0x4f0   :  { %v6324_v46 = vpop.eup %6323  ;;  %v3177_v47 = vpop.f32.mrf.mxu0 }
 0x4f1   :  { %v3218_v48 = vpop.f32.mrf.mxu1  ;;  %v6326_v49 = vpop.eup %6325  ;;  %v5583_v50 = vmul.f32 -1.442695, %v3227_v40  ;;  %v3228_v25 = vadd.f32 %v3224_v26, %v3177_v47 }
 0x4f2   :  { %v6328_v29 = vpop.eup %6327  ;;  %v3179_v36 = vpop.f32.mrf.mxu0  ;;  %v3251_v53 = vmul.f32 %v6326_v49, %v6324_v46  ;;  %v3230_v37 = vadd.f32 %v3226_v33, %v3218_v48  ;;  %v8140_v48 = vld [vmem:[%s8535_s2 + $0x24] ss:$16 sps:$4 sm:$0xff]   ;;  %v8145_v49 = vld [vmem:[%s8535_s2 + $0x2c] ss:$16 sps:$4 sm:$0xff]  }
 0x4f3   :  { %v3220_v39 = vpop.f32.mrf.mxu1  ;;  %v3250_v54 = vmul.f32 %v6328_v29, %v7699_v59  ;;  %6329 = vpow2.f32 %v5583_v50  ;;  %v5584_v55 = vmul.f32 -1.442695, %v3228_v25  ;;  %v3229_v59 = vadd.f32 %v3225_v38, %v3216_v16  ;;  %v8150_v50 = vld [vmem:[%s8535_s2 + $0x20] ss:$16 sps:$4 sm:$0xff]   ;;  %v8155_v25 = vld [vmem:[%s8535_s2 + $0x28] ss:$16 sps:$4 sm:$0xff]  }
 0x4f4   :  { %v3180_v57 = vpop.f32.mrf.mxu0  ;;  %v5585_v56 = vmul.f32 -1.442695, %v3230_v37  ;;  %v8164_v29 = vld [vmem:[%s8535_s2 + $0x4] ss:$16 sps:$4 sm:$0xff]   ;;  %v8174_v36 = vld [vmem:[%s8535_s2] ss:$16 sps:$4 sm:$0xff]  }
 0x4f5   :  { %v3221_v63 = vpop.f32.mrf.mxu1  ;;  %v7963_v34 = vadd.f32 %v3251_v53, %v3250_v54  ;;  %6331 = vpow2.f32 %v5584_v55  ;;  %v8179_v39 = vld [vmem:[%s8535_s2 + $0x8] ss:$16 sps:$4 sm:$0xff]   ;;  %v8188_v53 = vld [vmem:[%s8536_s3 + $0xe4] ss:$16 sps:$4 sm:$0xff]   ;;  %v8193_v54 = vld [vmem:[%s8536_s3 + $0xec] ss:$16 sps:$4 sm:$0xff]  }
 0x4f6   :  { %6333 = vrcp.f32 %v3247_v35  ;;  %v8169_v35 = vld [vmem:[%s8535_s2 + $0xc] ss:$16 sps:$4 sm:$0xff]   ;;  %v48_v55 = vld [vmem:[%s8533_s0 + $0xa0] sm:$0xff] }
 0x4f7   :  { %6335 = vtanh.f32 %v7963_v34  ;;  %v3562_v57 = vunpack.c.l.bf16 %v48_v55  ;;  %v3563_v63 = vunpack.c.h.bf16 %v48_v55 }
 0x4f8   :  { %6337 = vpow2.f32 %v5585_v56 }
 0x500   :  { %v6330_v30 = vpop.eup %6329 }
 0x501   :  { %v3258_v0 = vadd.f32 1.0, %v6330_v30 }
 0x502   :  { %v6332_v1 = vpop.eup %6331 }
 0x503   :  { %v6334_v24 = vpop.eup %6333  ;;  %6339 = vrcp.f32 %v3258_v0  ;;  %v3264_v26 = vadd.f32 1.0, %v6332_v1 }
 0x504   :  { %v6336_v2 = vpop.eup %6335  ;;  %6341 = vtanh.f32 %v3229_v59 }
 0x505   :  { %6343 = vrcp.f32 %v3264_v26  ;;  %v3254_v11 = vmul.f32 %v6336_v2, %v6334_v24  ;;  %v6338_v16 = vpop.eup %6337 }
 0x506   :  { %v3271_v47 = vadd.f32 1.0, %v6338_v16 }
 0x507   :  { %v3279_v40 = vpack.c.bf16 %v3254_v11, %v3254_v11  ;;  %v50_v11 = vld [vmem:[%s8533_s0 + $0xa8] sm:$0xff] }
 0x508   :  { %6345 = vrcp.f32 %v3271_v47 }
 0x509   :  { %5586 = vst [vmem:[%s8539_s6 + $0x10] sm:$0xf] %v3279_v40  ;;  %3513 = vmatmul.mubr.bf16.vlgmr.msra.gmra.mxu0 %v3279_v40  ;;  %3554 = vmatmul.mubr.bf16.vlgmr.msra.gmra.mxu1 %v3279_v40  ;;  %v3565_v40 = vunpack.c.h.bf16 %v50_v11 }
 0x50a   :  { %3766 = vmatpush1.bf16.msra.mxu0 %v7708_v27  ;;  %3807 = vmatpush1.bf16.msra.mxu1 %v7713_v3 }
 0x50b   :  { %3767 = vmatprep.subr.bf16.mxu0 %v7718_v4  ;;  %3808 = vmatprep.subr.bf16.mxu1 %v7723_v5 }
 0x50c   :  { %3797 = vmatprep.mubr.bf16.mxu0 %v8559_v60  ;;  %3838 = vmatprep.mubr.bf16.mxu1 %v8559_v60 }
 0x50e   :  { %3768 = vmatpush1.bf16.msra.mxu0 %v7733_v7  ;;  %3809 = vmatpush1.bf16.msra.mxu1 %v7738_v8  ;;  %v8572_v8 = vld [vmem:[#allocation8_spill] sm:$0xff] }
 0x50f   :  { %3769 = vmatprep.subr.bf16.mxu0 %v7745_v9  ;;  %3810 = vmatprep.subr.bf16.mxu1 %v7750_v10  ;;  %v8573_v9 = vld [vmem:[#allocation9_spill] sm:$0xff]  ;;  %v8574_v10 = vld [vmem:[#allocation10_spill] sm:$0xff] }
 0x510   :  { %v6340_v27 = vpop.eup %6339 }
 0x511   :  { %v6342_v46 = vpop.eup %6341 }
 0x512   :  { %v6344_v3 = vpop.eup %6343  ;;  %3770 = vmatpush1.bf16.msra.mxu0 %v7759_v12  ;;  %3811 = vmatpush1.bf16.msra.mxu1 %v7764_v13  ;;  %v3275_v4 = vmul.f32 %v6342_v46, %v6340_v27  ;;  %v3564_v27 = vunpack.c.l.bf16 %v50_v11 }
 0x513   :  { %v3274_v5 = vmul.f32 %v6344_v3, %v7803_v6  ;;  %3771 = vmatprep.subr.bf16.mxu0 %v7771_v14  ;;  %3812 = vmatprep.subr.bf16.mxu1 %v7776_v15  ;;  %v8044_v6 = vld [vmem:[%s8535_s2 + $0xa4] ss:$16 sps:$4 sm:$0xff]  }
 0x515   :  { %v7987_v7 = vadd.f32 %v3275_v4, %v3274_v5  ;;  %v6346_v12 = vpop.eup %6345 }
 0x516   :  { %3772 = vmatpush1.bf16.msra.mxu0 %v7783_v43  ;;  %3813 = vmatpush1.bf16.msra.mxu1 %v7788_v52  ;;  %v8020_v43 = vld [vmem:[%s8535_s2 + $0xe4] ss:$16 sps:$4 sm:$0xff]   ;;  %v8025_v52 = vld [vmem:[%s8535_s2 + $0xe0] ss:$16 sps:$4 sm:$0xff]  }
 0x517   :  { %3773 = vmatprep.subr.bf16.mxu0 %v7796_v62  ;;  %3814 = vmatprep.subr.bf16.mxu1 %v7801_v17  ;;  %6347 = vtanh.f32 %v7987_v7  ;;  %v8032_v62 = vld [vmem:[%s8535_s2 + $0xc4] ss:$16 sps:$4 sm:$0xff]   ;;  %v8037_v17 = vld [vmem:[%s8535_s2 + $0xc0] ss:$16 sps:$4 sm:$0xff]  }
 0x51a   :  { %3774 = vmatpush1.bf16.msra.mxu0 %v7810_v19  ;;  %3815 = vmatpush1.bf16.msra.mxu1 %v7815_v18  ;;  %v8049_v19 = vld [vmem:[%s8535_s2 + $0xac] ss:$16 sps:$4 sm:$0xff]   ;;  %v8054_v18 = vld [vmem:[%s8535_s2 + $0xa0] ss:$16 sps:$4 sm:$0xff]  }
 0x51b   :  { %3775 = vmatprep.subr.bf16.mxu0 %v7822_v20  ;;  %3816 = vmatprep.subr.bf16.mxu1 %v7827_v21  ;;  %v8059_v20 = vld [vmem:[%s8535_s2 + $0xa8] ss:$16 sps:$4 sm:$0xff]   ;;  %v8068_v21 = vld [vmem:[%s8535_s2 + $0x84] ss:$16 sps:$4 sm:$0xff]  }
 0x51e   :  { %3776 = vmatpush1.bf16.msra.mxu0 %v7835_v22  ;;  %3817 = vmatpush1.bf16.msra.mxu1 %v7840_v23  ;;  %v8073_v22 = vld [vmem:[%s8535_s2 + $0x8c] ss:$16 sps:$4 sm:$0xff]   ;;  %v8078_v23 = vld [vmem:[%s8535_s2 + $0x80] ss:$16 sps:$4 sm:$0xff]  }
 0x51f   :  { %3777 = vmatprep.subr.bf16.mxu0 %v8572_v8  ;;  %3818 = vmatprep.subr.bf16.mxu1 %v8573_v9  ;;  %v5215_v9 = vld [vmem:[%s8534_s1 + $0x50] sm:$0xff] }
 0x522   :  { %3778 = vmatpush1.bf16.msra.mxu0 %v7859_v41  ;;  %3819 = vmatpush1.bf16.msra.mxu1 %v8574_v10  ;;  %v8083_v41 = vld [vmem:[%s8535_s2 + $0x88] ss:$16 sps:$4 sm:$0xff]   ;;  %v3847_v10 = vunpack.c.l.bf16 %v5215_v9 }
 0x523   :  { %3779 = vmatprep.subr.bf16.mxu0 %v7871_v51  ;;  %3820 = vmatprep.subr.bf16.mxu1 %v7876_v28  ;;  %v8092_v51 = vld [vmem:[%s8535_s2 + $0x64] ss:$16 sps:$4 sm:$0xff]   ;;  %v8097_v28 = vld [vmem:[%s8535_s2 + $0x6c] ss:$16 sps:$4 sm:$0xff]  }
 0x524   :  { %v6348_v13 = vpop.eup %6347 }
 0x525   :  { %v3278_v14 = vmul.f32 %v6348_v13, %v6346_v12  ;;  %v3848_v12 = vunpack.c.h.bf16 %v5215_v9 }
 0x526   :  { %3780 = vmatpush1.bf16.msra.mxu0 %v7883_v58  ;;  %3821 = vmatpush1.bf16.msra.mxu1 %v7888_v61  ;;  %v8102_v58 = vld [vmem:[%s8535_s2 + $0x60] ss:$16 sps:$4 sm:$0xff]   ;;  %v8107_v61 = vld [vmem:[%s8535_s2 + $0x68] ss:$16 sps:$4 sm:$0xff]  }
 0x527   :  { %v3282_v15 = vpack.c.bf16 %v3278_v14, %v3278_v14  ;;  %4145 = vmatprep.subr.bf16.mxu1 %v7919_v42  ;;  %4104 = vmatprep.subr.bf16.mxu0 %v8020_v43  ;;  %v8116_v42 = vld [vmem:[%s8535_s2 + $0x44] ss:$16 sps:$4 sm:$0xff]  }
 0x529   :  { %5587 = vst [vmem:[%s8540_s7 + $0xc] sm:$0xf] %v3282_v15  ;;  %3798 = vmatmul.mubr.bf16.vlgmr.msra.gmra.mxu0 %v3282_v15  ;;  %3839 = vmatmul.mubr.bf16.vlgmr.msra.gmra.mxu1 %v3282_v15 }
 0x52a   :  { %4146 = vmatpush1.bf16.msra.mxu1 %v7924_v31  ;;  %4136 = vmatprep.mubr.bf16.mxu0 %v8559_v60  ;;  %v8121_v31 = vld [vmem:[%s8535_s2 + $0x4c] ss:$16 sps:$4 sm:$0xff]  }
 0x52b   :  { %4147 = vmatprep.subr.bf16.mxu1 %v7931_v44  ;;  %4177 = vmatprep.mubr.bf16.mxu1 %v8559_v60  ;;  %v8126_v44 = vld [vmem:[%s8535_s2 + $0x40] ss:$16 sps:$4 sm:$0xff]  }
 0x52c   :  { %4105 = vmatpush1.bf16.msra.mxu0 %v8025_v52 }
 0x52d   :  { %4106 = vmatprep.subr.bf16.mxu0 %v8032_v62 }
 0x52e   :  { %4148 = vmatpush1.bf16.msra.mxu1 %v7936_v45  ;;  %v8131_v45 = vld [vmem:[%s8535_s2 + $0x48] ss:$16 sps:$4 sm:$0xff]  }
 0x52f   :  { %4149 = vmatprep.subr.bf16.mxu1 %v8049_v19 }
 0x530   :  { %4107 = vmatpush1.bf16.msra.mxu0 %v8037_v17 }
 0x531   :  { %4108 = vmatprep.subr.bf16.mxu0 %v8044_v6 }
 0x532   :  { %4150 = vmatpush1.bf16.msra.mxu1 %v8059_v20 }
 0x533   :  { %4151 = vmatprep.subr.bf16.mxu1 %v8073_v22 }
 0x534   :  { %4109 = vmatpush1.bf16.msra.mxu0 %v8054_v18 }
 0x535   :  { %4110 = vmatprep.subr.bf16.mxu0 %v8068_v21 }
 0x536   :  { %4152 = vmatpush1.bf16.msra.mxu1 %v8083_v41 }
 0x537   :  { %4153 = vmatprep.subr.bf16.mxu1 %v8097_v28 }
 0x538   :  { %4111 = vmatpush1.bf16.msra.mxu0 %v8078_v23 }
 0x539   :  { %4112 = vmatprep.subr.bf16.mxu0 %v8092_v51 }
 0x53a   :  { %4154 = vmatpush1.bf16.msra.mxu1 %v8107_v61 }
 0x53b   :  { %4155 = vmatprep.subr.bf16.mxu1 %v8121_v31 }
 0x53c   :  { %4113 = vmatpush1.bf16.msra.mxu0 %v8102_v58 }
 0x53d   :  { %4114 = vmatprep.subr.bf16.mxu0 %v8116_v42 }
 0x53e   :  { %4156 = vmatpush1.bf16.msra.mxu1 %v8131_v45 }
 0x53f   :  { %4157 = vmatprep.subr.bf16.mxu1 %v8145_v49 }
 0x540   :  { %4115 = vmatpush1.bf16.msra.mxu0 %v8126_v44 }
 0x541   :  { %4116 = vmatprep.subr.bf16.mxu0 %v8140_v48 }
 0x542   :  { %4158 = vmatpush1.bf16.msra.mxu1 %v8155_v25 }
 0x543   :  { %4159 = vmatprep.subr.bf16.mxu1 %v8169_v35 }
 0x544   :  { %4117 = vmatpush1.bf16.msra.mxu0 %v8150_v50 }
 0x545   :  { %4118 = vmatprep.subr.bf16.mxu0 %v8164_v29 }
 0x546   :  { %4160 = vmatpush1.bf16.msra.mxu1 %v8179_v39 }
 0x547   :  { %4430 = vmatprep.subr.bf16.mxu1 %v8193_v54 }
 0x548   :  { %4119 = vmatpush1.bf16.msra.mxu0 %v8174_v36 }
 0x549   :  { %4389 = vmatprep.subr.bf16.mxu0 %v8188_v53 }
 0x5c9   :  { %v3514_v32 = vpop.f32.mrf.mxu0  ;;  %v3555_v33 = vpop.f32.mrf.mxu1 }
 0x5ca   :  { %v3566_v37 = vadd.f32 %v3562_v57, %v3514_v32  ;;  %v3568_v47 = vadd.f32 %v3564_v27, %v3555_v33 }
 0x5cb   :  { %v3516_v38 = vpop.f32.mrf.mxu0  ;;  %v3557_v56 = vpop.f32.mrf.mxu1 }
 0x5cc   :  { %v5652_v30 = vmul.f32 -1.442695, %v3566_v37  ;;  %v3567_v59 = vadd.f32 %v3563_v63, %v3516_v38  ;;  %v3569_v16 = vadd.f32 %v3565_v40, %v3557_v56 }
 0x5cd   :  { %v3518_v0 = vpop.f32.mrf.mxu0  ;;  %v3559_v1 = vpop.f32.mrf.mxu1 }
 0x5ce   :  { %6349 = vpow2.f32 %v5652_v30  ;;  %v5653_v24 = vmul.f32 -1.442695, %v3567_v59  ;;  %v5654_v46 = vmul.f32 -1.442695, %v3569_v16  ;;  %v5216_v16 = vld [vmem:[%s8534_s1 + $0x58] sm:$0xff] }
 0x5cf   :  { %v3519_v26 = vpop.f32.mrf.mxu0  ;;  %v3560_v2 = vpop.f32.mrf.mxu1  ;;  %v3850_v27 = vunpack.c.h.bf16 %v5216_v16 }
 0x5d0   :  { %6351 = vpow2.f32 %v5653_v24 }
 0x5d1   :  { %6353 = vpow2.f32 %v5654_v46 }
 0x5db   :  { %v6350_v3 = vpop.eup %6349 }
 0x5dc   :  { %v3858_v4 = vadd.f32 1.0, %v6350_v3  ;;  %v3849_v3 = vunpack.c.l.bf16 %v5216_v16  ;;  %v8291_v16 = vld [vmem:[%s8536_s3 + $0x80] ss:$16 sps:$4 sm:$0xff]  }
 0x5dd   :  { %v6352_v5 = vpop.eup %6351 }
 0x5de   :  { %6355 = vrcp.f32 %v3858_v4  ;;  %v3864_v8 = vadd.f32 1.0, %v6352_v5  ;;  %v6354_v15 = vpop.eup %6353 }
 0x5df   :  { %6357 = vtanh.f32 %v3568_v47  ;;  %v3871_v30 = vadd.f32 1.0, %v6354_v15  ;;  %v8216_v15 = vld [vmem:[%s8536_s3 + $0xe0] ss:$16 sps:$4 sm:$0xff]  }
 0x5e0   :  { %6359 = vrcp.f32 %v3864_v8 }
 0x5e9   :  { %v3799_v13 = vpop.f32.mrf.mxu0  ;;  %v3840_v14 = vpop.f32.mrf.mxu1 }
 0x5ea   :  { %v3851_v55 = vadd.f32 %v3847_v10, %v3799_v13 }
 0x5eb   :  { %v6356_v57 = vpop.eup %6355  ;;  %v3801_v63 = vpop.f32.mrf.mxu0 }
 0x5ec   :  { %v3842_v32 = vpop.f32.mrf.mxu1  ;;  %v6358_v33 = vpop.eup %6357  ;;  %v5655_v37 = vmul.f32 -1.442695, %v3851_v55  ;;  %v3852_v38 = vadd.f32 %v3848_v12, %v3801_v63  ;;  %v8221_v55 = vld [vmem:[%s8536_s3 + $0xe8] ss:$16 sps:$4 sm:$0xff]   ;;  %v8231_v63 = vld [vmem:[%s8536_s3 + $0xcc] ss:$16 sps:$4 sm:$0xff]  }
 0x5ed   :  { %v6360_v56 = vpop.eup %6359  ;;  %v3803_v59 = vpop.f32.mrf.mxu0  ;;  %v3875_v1 = vmul.f32 %v6358_v33, %v6356_v57  ;;  %v3854_v46 = vadd.f32 %v3850_v27, %v3842_v32  ;;  %v8226_v57 = vld [vmem:[%s8536_s3 + $0xc4] ss:$16 sps:$4 sm:$0xff]   ;;  %v8241_v32 = vld [vmem:[%s8536_s3 + $0xc0] ss:$16 sps:$4 sm:$0xff]   ;;  %v8246_v33 = vld [vmem:[%s8536_s3 + $0xc8] ss:$16 sps:$4 sm:$0xff]  }
 0x5ee   :  { %v3844_v0 = vpop.f32.mrf.mxu1  ;;  %v3874_v24 = vmul.f32 %v6360_v56, %v7963_v34  ;;  %6361 = vpow2.f32 %v5655_v37  ;;  %v5656_v26 = vmul.f32 -1.442695, %v3852_v38  ;;  %v3853_v34 = vadd.f32 %v3849_v3, %v3840_v14  ;;  %v8253_v37 = vld [vmem:[%s8536_s3 + $0xa4] ss:$16 sps:$4 sm:$0xff]   ;;  %v8258_v38 = vld [vmem:[%s8536_s3 + $0xac] ss:$16 sps:$4 sm:$0xff]  }
 0x5ef   :  { %v3804_v2 = vpop.f32.mrf.mxu0  ;;  %v5657_v47 = vmul.f32 -1.442695, %v3854_v46  ;;  %v8267_v56 = vld [vmem:[%s8536_s3 + $0xa0] ss:$16 sps:$4 sm:$0xff]   ;;  %v8279_v0 = vld [vmem:[%s8536_s3 + $0x84] ss:$16 sps:$4 sm:$0xff]  }
 0x5f0   :  { %v3845_v11 = vpop.f32.mrf.mxu1  ;;  %v8207_v40 = vadd.f32 %v3875_v1, %v3874_v24  ;;  %6363 = vpow2.f32 %v5656_v26  ;;  %v8284_v1 = vld [vmem:[%s8536_s3 + $0x8c] ss:$16 sps:$4 sm:$0xff]   ;;  %v8296_v27 = vld [vmem:[%s8536_s3 + $0x88] ss:$16 sps:$4 sm:$0xff]  }
 0x5f1   :  { %6365 = vrcp.f32 %v3871_v30  ;;  %v8272_v30 = vld [vmem:[%s8536_s3 + $0xa8] ss:$16 sps:$4 sm:$0xff]  }
 0x5f2   :  { %6367 = vtanh.f32 %v8207_v40 }
 0x5f3   :  { %6369 = vpow2.f32 %v5657_v47  ;;  %v8304_v47 = vld [vmem:[%s8536_s3 + $0x64] ss:$16 sps:$4 sm:$0xff]  }
 0x5fb   :  { %v6362_v4 = vpop.eup %6361 }
 0x5fc   :  { %v3882_v5 = vadd.f32 1.0, %v6362_v4  ;;  %v8309_v4 = vld [vmem:[%s8536_s3 + $0x6c] ss:$16 sps:$4 sm:$0xff]  }
 0x5fd   :  { %v6364_v8 = vpop.eup %6363 }
 0x5fe   :  { %v6366_v9 = vpop.eup %6365  ;;  %6371 = vrcp.f32 %v3882_v5  ;;  %v3888_v10 = vadd.f32 1.0, %v6364_v8  ;;  %v8323_v5 = vld [vmem:[%s8536_s3 + $0x68] ss:$16 sps:$4 sm:$0xff]   ;;  %v8330_v8 = vld [vmem:[%s8536_s3 + $0x44] ss:$16 sps:$4 sm:$0xff]  }
 0x5ff   :  { %v6368_v12 = vpop.eup %6367  ;;  %6373 = vtanh.f32 %v3853_v34 }
 0x600   :  { %6375 = vrcp.f32 %v3888_v10  ;;  %v3878_v13 = vmul.f32 %v6368_v12, %v6366_v9  ;;  %v6370_v59 = vpop.eup %6369  ;;  %v8335_v9 = vld [vmem:[%s8536_s3 + $0x4c] ss:$16 sps:$4 sm:$0xff]   ;;  %v8343_v10 = vld [vmem:[%s8536_s3 + $0x40] ss:$16 sps:$4 sm:$0xff]   ;;  %v8348_v12 = vld [vmem:[%s8536_s3 + $0x48] ss:$16 sps:$4 sm:$0xff]  }
 0x601   :  { %v3895_v11 = vadd.f32 1.0, %v6370_v59  ;;  %v8367_v59 = vld [vmem:[%s8536_s3 + $0x20] ss:$16 sps:$4 sm:$0xff]  }
 0x602   :  { %v3903_v14 = vpack.c.bf16 %v3878_v13, %v3878_v13  ;;  %v8355_v13 = vld [vmem:[%s8536_s3 + $0x24] ss:$16 sps:$4 sm:$0xff]  }
 0x603   :  { %6377 = vrcp.f32 %v3895_v11  ;;  %8575 = vst [vmem:[#allocation8_spill] sm:$0xff] %v8355_v13  ;;  %v8391_v11 = vld [vmem:[%s8536_s3] ss:$16 sps:$4 sm:$0xff]  }
 0x604   :  { %5658 = vst [vmem:[%s8539_s6 + $0x14] sm:$0xf] %v3903_v14  ;;  %4137 = vmatmul.mubr.bf16.vlgmr.msra.gmra.mxu0 %v3903_v14  ;;  %4178 = vmatmul.mubr.bf16.vlgmr.msra.gmra.mxu1 %v3903_v14  ;;  %v8360_v14 = vld [vmem:[%s8536_s3 + $0x2c] ss:$16 sps:$4 sm:$0xff]  }
 0x605   :  { %4390 = vmatpush1.bf16.msra.mxu0 %v8216_v15  ;;  %4431 = vmatpush1.bf16.msra.mxu1 %v8221_v55  ;;  %8576 = vst [vmem:[#allocation9_spill] sm:$0xff] %v8360_v14 }
 0x606   :  { %4391 = vmatprep.subr.bf16.mxu0 %v8226_v57  ;;  %4432 = vmatprep.subr.bf16.mxu1 %v8231_v63 }
 0x607   :  { %4421 = vmatprep.mubr.bf16.mxu0 %v8559_v60  ;;  %4462 = vmatprep.mubr.bf16.mxu1 %v8559_v60 }
 0x609   :  { %4392 = vmatpush1.bf16.msra.mxu0 %v8241_v32  ;;  %4433 = vmatpush1.bf16.msra.mxu1 %v8246_v33 }
 0x60a   :  { %4393 = vmatprep.subr.bf16.mxu0 %v8253_v37  ;;  %4434 = vmatprep.subr.bf16.mxu1 %v8258_v38 }
 0x60b   :  { %v6372_v24 = vpop.eup %6371 }
 0x60c   :  { %v6374_v26 = vpop.eup %6373 }
 0x60d   :  { %v6376_v2 = vpop.eup %6375  ;;  %4394 = vmatpush1.bf16.msra.mxu0 %v8267_v56  ;;  %4435 = vmatpush1.bf16.msra.mxu1 %v8272_v30  ;;  %v3899_v46 = vmul.f32 %v6374_v26, %v6372_v24  ;;  %v8372_v24 = vld [vmem:[%s8536_s3 + $0x28] ss:$16 sps:$4 sm:$0xff]   ;;  %v8379_v26 = vld [vmem:[%s8536_s3 + $0x4] ss:$16 sps:$4 sm:$0xff]  }
 0x60e   :  { %v3898_v3 = vmul.f32 %v6376_v2, %v7987_v7  ;;  %4395 = vmatprep.subr.bf16.mxu0 %v8279_v0  ;;  %4436 = vmatprep.subr.bf16.mxu1 %v8284_v1  ;;  %v8318_v7 = vld [vmem:[%s8536_s3 + $0x60] ss:$16 sps:$4 sm:$0xff]   ;;  %8577 = vst [vmem:[#allocation10_spill] sm:$0xff] %v8372_v24  ;;  %v8384_v2 = vld [vmem:[%s8536_s3 + $0xc] ss:$16 sps:$4 sm:$0xff]  }
 0x610   :  { %v8311_v34 = vadd.f32 %v3899_v46, %v3898_v3  ;;  %v8396_v46 = vld [vmem:[%s8536_s3 + $0x8] ss:$16 sps:$4 sm:$0xff]   ;;  %v6378_v3 = vpop.eup %6377 }
 0x611   :  { %4396 = vmatpush1.bf16.msra.mxu0 %v8291_v16  ;;  %4437 = vmatpush1.bf16.msra.mxu1 %v8296_v27 }
 0x612   :  { %4397 = vmatprep.subr.bf16.mxu0 %v8304_v47  ;;  %4438 = vmatprep.subr.bf16.mxu1 %v8309_v4  ;;  %6379 = vtanh.f32 %v8311_v34 }
 0x615   :  { %4398 = vmatpush1.bf16.msra.mxu0 %v8318_v7  ;;  %4439 = vmatpush1.bf16.msra.mxu1 %v8323_v5 }
 0x616   :  { %4399 = vmatprep.subr.bf16.mxu0 %v8330_v8  ;;  %4440 = vmatprep.subr.bf16.mxu1 %v8335_v9 }
 0x619   :  { %4400 = vmatpush1.bf16.msra.mxu0 %v8343_v10  ;;  %4441 = vmatpush1.bf16.msra.mxu1 %v8348_v12 }
 0x61a   :  { %4401 = vmatprep.subr.bf16.mxu0 %v8355_v13  ;;  %4442 = vmatprep.subr.bf16.mxu1 %v8360_v14 }
 0x61d   :  { %4402 = vmatpush1.bf16.msra.mxu0 %v8367_v59  ;;  %4443 = vmatpush1.bf16.msra.mxu1 %v8372_v24 }
 0x61e   :  { %4403 = vmatprep.subr.bf16.mxu0 %v8379_v26  ;;  %4444 = vmatprep.subr.bf16.mxu1 %v8384_v2 }
 0x61f   :  { %v6380_v14 = vpop.eup %6379 }
 0x620   :  { %v3902_v13 = vmul.f32 %v6380_v14, %v6378_v3 }
 0x621   :  { %4404 = vmatpush1.bf16.msra.mxu0 %v8391_v11  ;;  %4445 = vmatpush1.bf16.msra.mxu1 %v8396_v46 }
 0x622   :  { %v3906_v24 = vpack.c.bf16 %v3902_v13, %v3902_v13  ;;  %4728 = vmatprep.subr.bf16.mxu0 %v8020_v43  ;;  %v6185_v43 = vld [vmem:[%s8535_s2 + $0xec] ss:$16 sps:$4 sm:$0xff]  }
 0x623   :  { %4769 = vmatprep.subr.bf16.mxu1 %v6185_v43 }
 0x624   :  { %5659 = vst [vmem:[%s8540_s7 + $0x8] sm:$0xf] %v3906_v24  ;;  %4422 = vmatmul.mubr.bf16.vlgmr.msra.gmra.mxu0 %v3906_v24  ;;  %4463 = vmatmul.mubr.bf16.vlgmr.msra.gmra.mxu1 %v3906_v24 }
 0x625   :  { %4729 = vmatpush1.bf16.msra.mxu0 %v8025_v52  ;;  %4760 = vmatprep.mubr.bf16.mxu0 %v8559_v60  ;;  %v6183_v52 = vld [vmem:[%s8535_s2 + $0xe8] ss:$16 sps:$4 sm:$0xff]  }
 0x626   :  { %4730 = vmatprep.subr.bf16.mxu0 %v8032_v62  ;;  %4801 = vmatprep.mubr.bf16.mxu1 %v8559_v60  ;;  %v6188_v62 = vld [vmem:[%s8535_s2 + $0xcc] ss:$16 sps:$4 sm:$0xff]  }
 0x627   :  { %4770 = vmatpush1.bf16.msra.mxu1 %v6183_v52 }
 0x628   :  { %4771 = vmatprep.subr.bf16.mxu1 %v6188_v62 }
 0x629   :  { %4731 = vmatpush1.bf16.msra.mxu0 %v8037_v17  ;;  %v6186_v17 = vld [vmem:[%s8535_s2 + $0xc8] ss:$16 sps:$4 sm:$0xff]  }
 0x62a   :  { %4732 = vmatprep.subr.bf16.mxu0 %v8044_v6  ;;  %v52_v6 = vld [vmem:[%s8533_s0 + $0xc0] sm:$0xff] }
 0x62b   :  { %4772 = vmatpush1.bf16.msra.mxu1 %v6186_v17 }
 0x62c   :  { %4773 = vmatprep.subr.bf16.mxu1 %v8049_v19  ;;  %v4186_v19 = vunpack.c.l.bf16 %v52_v6 }
 0x62d   :  { %4733 = vmatpush1.bf16.msra.mxu0 %v8054_v18  ;;  %v4187_v18 = vunpack.c.h.bf16 %v52_v6 }
 0x62e   :  { %4734 = vmatprep.subr.bf16.mxu0 %v8068_v21 }
 0x62f   :  { %4774 = vmatpush1.bf16.msra.mxu1 %v8059_v20 }
 0x630   :  { %4775 = vmatprep.subr.bf16.mxu1 %v8073_v22 }
 0x631   :  { %4735 = vmatpush1.bf16.msra.mxu0 %v8078_v23 }
 0x632   :  { %4736 = vmatprep.subr.bf16.mxu0 %v8092_v51 }
 0x633   :  { %4776 = vmatpush1.bf16.msra.mxu1 %v8083_v41 }
 0x634   :  { %4777 = vmatprep.subr.bf16.mxu1 %v8097_v28 }
 0x635   :  { %4737 = vmatpush1.bf16.msra.mxu0 %v8102_v58 }
 0x636   :  { %4738 = vmatprep.subr.bf16.mxu0 %v8116_v42 }
 0x637   :  { %4778 = vmatpush1.bf16.msra.mxu1 %v8107_v61 }
 0x638   :  { %4779 = vmatprep.subr.bf16.mxu1 %v8121_v31 }
 0x639   :  { %4739 = vmatpush1.bf16.msra.mxu0 %v8126_v44 }
 0x63a   :  { %4740 = vmatprep.subr.bf16.mxu0 %v8140_v48 }
 0x63b   :  { %4780 = vmatpush1.bf16.msra.mxu1 %v8131_v45  ;;  %v54_v45 = vld [vmem:[%s8533_s0 + $0xc8] sm:$0xff] }
 0x63c   :  { %4781 = vmatprep.subr.bf16.mxu1 %v8145_v49  ;;  %v4189_v48 = vunpack.c.h.bf16 %v54_v45 }
 0x63d   :  { %4741 = vmatpush1.bf16.msra.mxu0 %v8150_v50  ;;  %v4188_v50 = vunpack.c.l.bf16 %v54_v45 }
 0x63e   :  { %4742 = vmatprep.subr.bf16.mxu0 %v8164_v29 }
 0x63f   :  { %4782 = vmatpush1.bf16.msra.mxu1 %v8155_v25 }
 0x640   :  { %4783 = vmatprep.subr.bf16.mxu1 %v8169_v35 }
 0x641   :  { %4743 = vmatpush1.bf16.msra.mxu0 %v8174_v36 }
 0x642   :  { %5012 = vmatprep.subr.bf16.mxu0 %v8188_v53 }
 0x643   :  { %4784 = vmatpush1.bf16.msra.mxu1 %v8179_v39 }
 0x644   :  { %5053 = vmatprep.subr.bf16.mxu1 %v8193_v54  ;;  %v5213_v54 = vld [vmem:[%s8534_s1 + $0x30] sm:$0xff] }
 0x645   :  { %v4471_v13 = vunpack.c.l.bf16 %v5213_v54  ;;  %v4472_v14 = vunpack.c.h.bf16 %v5213_v54 }
 0x6c4   :  { %v4138_v20 = vpop.f32.mrf.mxu0  ;;  %v4179_v21 = vpop.f32.mrf.mxu1 }
 0x6c5   :  { %v4190_v22 = vadd.f32 %v4186_v19, %v4138_v20  ;;  %v4192_v35 = vadd.f32 %v4188_v50, %v4179_v21 }
 0x6c6   :  { %v4140_v23 = vpop.f32.mrf.mxu0  ;;  %v4181_v41 = vpop.f32.mrf.mxu1 }
 0x6c7   :  { %v5724_v51 = vmul.f32 -1.442695, %v4190_v22  ;;  %v4191_v28 = vadd.f32 %v4187_v18, %v4140_v23  ;;  %v4193_v49 = vadd.f32 %v4189_v48, %v4181_v41 }
 0x6c8   :  { %v4142_v58 = vpop.f32.mrf.mxu0  ;;  %v4183_v61 = vpop.f32.mrf.mxu1 }
 0x6c9   :  { %6381 = vpow2.f32 %v5724_v51  ;;  %v5725_v42 = vmul.f32 -1.442695, %v4191_v28  ;;  %v5726_v25 = vmul.f32 -1.442695, %v4193_v49 }
 0x6ca   :  { %v4143_v31 = vpop.f32.mrf.mxu0  ;;  %v4184_v44 = vpop.f32.mrf.mxu1 }
 0x6cb   :  { %6383 = vpow2.f32 %v5725_v42  ;;  %v5214_v44 = vld [vmem:[%s8534_s1 + $0x38] sm:$0xff] }
 0x6cc   :  { %6385 = vpow2.f32 %v5726_v25  ;;  %v4474_v45 = vunpack.c.h.bf16 %v5214_v44  ;;  %v4473_v49 = vunpack.c.l.bf16 %v5214_v44 }
 0x6d6   :  { %v6382_v29 = vpop.eup %6381 }
 0x6d7   :  { %v4482_v36 = vadd.f32 1.0, %v6382_v29 }
 0x6d8   :  { %v6384_v39 = vpop.eup %6383 }
 0x6d9   :  { %6387 = vrcp.f32 %v4482_v36  ;;  %v4488_v53 = vadd.f32 1.0, %v6384_v39  ;;  %v6386_v43 = vpop.eup %6385 }
 0x6da   :  { %6389 = vtanh.f32 %v4192_v35  ;;  %v4495_v22 = vadd.f32 1.0, %v6386_v43 }
 0x6db   :  { %6391 = vrcp.f32 %v4488_v53 }
 0x6e4   :  { %v4423_v24 = vpop.f32.mrf.mxu0  ;;  %v4464_v3 = vpop.f32.mrf.mxu1 }
 0x6e5   :  { %v4475_v52 = vadd.f32 %v4471_v13, %v4423_v24 }
 0x6e6   :  { %v6388_v62 = vpop.eup %6387  ;;  %v4425_v17 = vpop.f32.mrf.mxu0 }
 0x6e7   :  { %v4466_v6 = vpop.f32.mrf.mxu1  ;;  %v6390_v19 = vpop.eup %6389  ;;  %v5727_v18 = vmul.f32 -1.442695, %v4475_v52  ;;  %v4476_v20 = vadd.f32 %v4472_v14, %v4425_v17 }
 0x6e8   :  { %v6392_v21 = vpop.eup %6391  ;;  %v4427_v23 = vpop.f32.mrf.mxu0  ;;  %v4499_v51 = vmul.f32 %v6390_v19, %v6388_v62  ;;  %v4478_v48 = vadd.f32 %v4474_v45, %v4466_v6 }
 0x6e9   :  { %v4468_v41 = vpop.f32.mrf.mxu1  ;;  %v4498_v28 = vmul.f32 %v6392_v21, %v8207_v40  ;;  %6393 = vpow2.f32 %v5727_v18  ;;  %v5728_v58 = vmul.f32 -1.442695, %v4476_v20  ;;  %v4477_v40 = vadd.f32 %v4473_v49, %v4464_v3  ;;  %v5211_v21 = vld [vmem:[%s8534_s1 + $0x10] sm:$0xff] }
 0x6ea   :  { %v4428_v61 = vpop.f32.mrf.mxu0  ;;  %v5729_v50 = vmul.f32 -1.442695, %v4478_v48  ;;  %v5095_v23 = vunpack.c.h.bf16 %v5211_v21 }
 0x6eb   :  { %v4469_v42 = vpop.f32.mrf.mxu1  ;;  %v8459_v31 = vadd.f32 %v4499_v51, %v4498_v28  ;;  %6395 = vpow2.f32 %v5728_v58 }
 0x6ec   :  { %6397 = vrcp.f32 %v4495_v22  ;;  %v5094_v22 = vunpack.c.l.bf16 %v5211_v21 }
 0x6ed   :  { %6399 = vtanh.f32 %v8459_v31 }
 0x6ee   :  { %6401 = vpow2.f32 %v5729_v50 }
 0x6f6   :  { %v6394_v25 = vpop.eup %6393 }
 0x6f7   :  { %v4506_v29 = vadd.f32 1.0, %v6394_v25 }
 0x6f8   :  { %v6396_v35 = vpop.eup %6395 }
 0x6f9   :  { %v6398_v36 = vpop.eup %6397  ;;  %6403 = vrcp.f32 %v4506_v29  ;;  %v4512_v39 = vadd.f32 1.0, %v6396_v35 }
 0x6fa   :  { %v6400_v53 = vpop.eup %6399  ;;  %6405 = vtanh.f32 %v4477_v40 }
 0x6fb   :  { %6407 = vrcp.f32 %v4512_v39  ;;  %v4502_v54 = vmul.f32 %v6400_v53, %v6398_v36  ;;  %v6402_v14 = vpop.eup %6401 }
 0x6fc   :  { %v4519_v3 = vadd.f32 1.0, %v6402_v14  ;;  %v5212_v14 = vld [vmem:[%s8534_s1 + $0x18] sm:$0xff] }
 0x6fd   :  { %v4527_v13 = vpack.c.bf16 %v4502_v54, %v4502_v54 }
 0x6fe   :  { %6409 = vrcp.f32 %v4519_v3 }
 0x6ff   :  { %5730 = vst [vmem:[%s8539_s6 + $0x18] sm:$0xf] %v4527_v13  ;;  %4761 = vmatmul.mubr.bf16.vlgmr.msra.gmra.mxu0 %v4527_v13  ;;  %4802 = vmatmul.mubr.bf16.vlgmr.msra.gmra.mxu1 %v4527_v13 }
 0x700   :  { %5013 = vmatpush1.bf16.msra.mxu0 %v8216_v15  ;;  %5054 = vmatpush1.bf16.msra.mxu1 %v8221_v55 }
 0x701   :  { %5014 = vmatprep.subr.bf16.mxu0 %v8226_v57  ;;  %5055 = vmatprep.subr.bf16.mxu1 %v8231_v63 }
 0x702   :  { %5044 = vmatprep.mubr.bf16.mxu0 %v8559_v60  ;;  %5085 = vmatprep.mubr.bf16.mxu1 %v8559_v60 }
 0x704   :  { %5015 = vmatpush1.bf16.msra.mxu0 %v8241_v32  ;;  %5056 = vmatpush1.bf16.msra.mxu1 %v8246_v33  ;;  %v8578_v32 = vld [vmem:[#allocation8_spill] sm:$0xff]  ;;  %v8579_v33 = vld [vmem:[#allocation9_spill] sm:$0xff] }
 0x705   :  { %5016 = vmatprep.subr.bf16.mxu0 %v8253_v37  ;;  %5057 = vmatprep.subr.bf16.mxu1 %v8258_v38  ;;  %v8580_v37 = vld [vmem:[#allocation10_spill] sm:$0xff] }
 0x706   :  { %v6404_v15 = vpop.eup %6403 }
 0x707   :  { %v6406_v24 = vpop.eup %6405 }
 0x708   :  { %v6408_v55 = vpop.eup %6407  ;;  %5017 = vmatpush1.bf16.msra.mxu0 %v8267_v56  ;;  %5058 = vmatpush1.bf16.msra.mxu1 %v8272_v30  ;;  %v4523_v57 = vmul.f32 %v6406_v24, %v6404_v15  ;;  %v5097_v15 = vunpack.c.h.bf16 %v5212_v14 }
 0x709   :  { %v4522_v60 = vmul.f32 %v6408_v55, %v8311_v34  ;;  %5018 = vmatprep.subr.bf16.mxu0 %v8279_v0  ;;  %5059 = vmatprep.subr.bf16.mxu1 %v8284_v1  ;;  %v56_v1 = vld [vmem:[%s8533_s0 + $0xe0] sm:$0xff]  ;;  %v5096_v55 = vunpack.c.l.bf16 %v5212_v14 }
 0x70b   :  { %v8483_v63 = vadd.f32 %v4523_v57, %v4522_v60  ;;  %v6410_v38 = vpop.eup %6409 }
 0x70c   :  { %5019 = vmatpush1.bf16.msra.mxu0 %v8291_v16  ;;  %5060 = vmatpush1.bf16.msra.mxu1 %v8296_v27  ;;  %v4810_v16 = vunpack.c.l.bf16 %v56_v1  ;;  %v4811_v27 = vunpack.c.h.bf16 %v56_v1 }
 0x70d   :  { %5020 = vmatprep.subr.bf16.mxu0 %v8304_v47  ;;  %5061 = vmatprep.subr.bf16.mxu1 %v8309_v4  ;;  %6411 = vtanh.f32 %v8483_v63 }
 0x710   :  { %5021 = vmatpush1.bf16.msra.mxu0 %v8318_v7  ;;  %5062 = vmatpush1.bf16.msra.mxu1 %v8323_v5 }
 0x711   :  { %5022 = vmatprep.subr.bf16.mxu0 %v8330_v8  ;;  %5063 = vmatprep.subr.bf16.mxu1 %v8335_v9 }
 0x714   :  { %5023 = vmatpush1.bf16.msra.mxu0 %v8343_v10  ;;  %5064 = vmatpush1.bf16.msra.mxu1 %v8348_v12 }
 0x715   :  { %5024 = vmatprep.subr.bf16.mxu0 %v8578_v32  ;;  %5065 = vmatprep.subr.bf16.mxu1 %v8579_v33 }
 0x718   :  { %5025 = vmatpush1.bf16.msra.mxu0 %v8367_v59  ;;  %5066 = vmatpush1.bf16.msra.mxu1 %v8580_v37 }
 0x719   :  { %5026 = vmatprep.subr.bf16.mxu0 %v8379_v26  ;;  %5067 = vmatprep.subr.bf16.mxu1 %v8384_v2 }
 0x71a   :  { %v6412_v56 = vpop.eup %6411 }
 0x71b   :  { %v4526_v30 = vmul.f32 %v6412_v56, %v6410_v38 }
 0x71c   :  { %5027 = vmatpush1.bf16.msra.mxu0 %v8391_v11  ;;  %5068 = vmatpush1.bf16.msra.mxu1 %v8396_v46  ;;  %v58_v11 = vld [vmem:[%s8533_s0 + $0xe8] sm:$0xff] }
 0x71d   :  { %v4530_v0 = vpack.c.bf16 %v4526_v30, %v4526_v30  ;;  %v4813_v46 = vunpack.c.h.bf16 %v58_v11  ;;  %v4812_v52 = vunpack.c.l.bf16 %v58_v11 }
 0x71f   :  { %5731 = vst [vmem:[%s8540_s7 + $0x4] sm:$0xf] %v4530_v0  ;;  %5045 = vmatmul.mubr.bf16.vlgmr.msra.gmra.mxu0 %v4530_v0  ;;  %5086 = vmatmul.mubr.bf16.vlgmr.msra.gmra.mxu1 %v4530_v0 }
 0x7bf   :  { %v4762_v47 = vpop.f32.mrf.mxu0  ;;  %v4803_v4 = vpop.f32.mrf.mxu1 }
 0x7c0   :  { %v4814_v34 = vadd.f32 %v4810_v16, %v4762_v47  ;;  %v4816_v6 = vadd.f32 %v4812_v52, %v4803_v4 }
 0x7c1   :  { %v4764_v7 = vpop.f32.mrf.mxu0  ;;  %v4805_v5 = vpop.f32.mrf.mxu1 }
 0x7c2   :  { %v5796_v8 = vmul.f32 -1.442695, %v4814_v34  ;;  %v4815_v9 = vadd.f32 %v4811_v27, %v4764_v7  ;;  %v4817_v43 = vadd.f32 %v4813_v46, %v4805_v5 }
 0x7c3   :  { %v4766_v10 = vpop.f32.mrf.mxu0  ;;  %v4807_v12 = vpop.f32.mrf.mxu1 }
 0x7c4   :  { %6413 = vpow2.f32 %v5796_v8  ;;  %v5797_v59 = vmul.f32 -1.442695, %v4815_v9  ;;  %v5798_v62 = vmul.f32 -1.442695, %v4817_v43 }
 0x7c5   :  { %v4767_v26 = vpop.f32.mrf.mxu0  ;;  %v4808_v2 = vpop.f32.mrf.mxu1 }
 0x7c6   :  { %6415 = vpow2.f32 %v5797_v59 }
 0x7c7   :  { %6417 = vpow2.f32 %v5798_v62 }
 0x7d1   :  { %v6414_v17 = vpop.eup %6413 }
 0x7d2   :  { %v5105_v19 = vadd.f32 1.0, %v6414_v17 }
 0x7d3   :  { %v6416_v18 = vpop.eup %6415 }
 0x7d4   :  { %6419 = vrcp.f32 %v5105_v19  ;;  %v5111_v20 = vadd.f32 1.0, %v6416_v18  ;;  %v6418_v28 = vpop.eup %6417 }
 0x7d5   :  { %6421 = vtanh.f32 %v4816_v6  ;;  %v5118_v25 = vadd.f32 1.0, %v6418_v28 }
 0x7d6   :  { %6423 = vrcp.f32 %v5111_v20 }
 0x7df   :  { %v5046_v41 = vpop.f32.mrf.mxu0  ;;  %v5087_v51 = vpop.f32.mrf.mxu1 }
 0x7e0   :  { %v5098_v58 = vadd.f32 %v5094_v22, %v5046_v41  ;;  %v5100_v60 = vadd.f32 %v5096_v55, %v5087_v51 }
 0x7e1   :  { %v6420_v61 = vpop.eup %6419  ;;  %v5048_v42 = vpop.f32.mrf.mxu0 }
 0x7e2   :  { %v5089_v44 = vpop.f32.mrf.mxu1  ;;  %v6422_v45 = vpop.eup %6421  ;;  %v5799_v48 = vmul.f32 -1.442695, %v5098_v58  ;;  %v5099_v49 = vadd.f32 %v5095_v23, %v5048_v42 }
 0x7e3   :  { %v6424_v50 = vpop.eup %6423  ;;  %v5050_v40 = vpop.f32.mrf.mxu0  ;;  %v5122_v35 = vmul.f32 %v6422_v45, %v6420_v61  ;;  %v5101_v24 = vadd.f32 %v5097_v15, %v5089_v44 }
 0x7e4   :  { %v5091_v29 = vpop.f32.mrf.mxu1  ;;  %v5121_v36 = vmul.f32 %v6424_v50, %v8459_v31  ;;  %6425 = vpow2.f32 %v5799_v48  ;;  %v5800_v39 = vmul.f32 -1.442695, %v5099_v49 }
 0x7e5   :  { %v5051_v53 = vpop.f32.mrf.mxu0  ;;  %v5801_v3 = vmul.f32 -1.442695, %v5101_v24 }
 0x7e6   :  { %v5092_v54 = vpop.f32.mrf.mxu1  ;;  %v5123_v13 = vadd.f32 %v5122_v35, %v5121_v36  ;;  %6427 = vpow2.f32 %v5800_v39 }
 0x7e7   :  { %6429 = vrcp.f32 %v5118_v25 }
 0x7e8   :  { %6431 = vtanh.f32 %v5123_v13 }
 0x7e9   :  { %6433 = vpow2.f32 %v5801_v3 }
 0x7f1   :  { %v6426_v57 = vpop.eup %6425 }
 0x7f2   :  { %v5129_v32 = vadd.f32 1.0, %v6426_v57 }
 0x7f3   :  { %v6428_v31 = vpop.eup %6427 }
 0x7f4   :  { %v6430_v33 = vpop.eup %6429  ;;  %6435 = vrcp.f32 %v5129_v32  ;;  %v5135_v37 = vadd.f32 1.0, %v6428_v31 }
 0x7f5   :  { %v6432_v38 = vpop.eup %6431  ;;  %6437 = vtanh.f32 %v5100_v60 }
 0x7f6   :  { %v5125_v56 = vmul.f32 %v6432_v38, %v6430_v33  ;;  %6439 = vrcp.f32 %v5135_v37  ;;  %v6434_v0 = vpop.eup %6433 }
 0x7f7   :  { %v5142_v47 = vadd.f32 1.0, %v6434_v0 }
 0x7f8   :  { %v5150_v30 = vpack.c.bf16 %v5125_v56, %v5125_v56  ;;  %5162 = vst [vmem:[%s8541_s8] sm:$0xff] %v5125_v56 }
 0x7f9   :  { %6441 = vrcp.f32 %v5142_v47 }
 0x7fa   :  { %5802 = vst [vmem:[%s8539_s6 + $0x1c] sm:$0xf] %v5150_v30 }
 0x801   :  { %v6436_v1 = vpop.eup %6435 }
 0x802   :  { %v6438_v16 = vpop.eup %6437 }
 0x803   :  { %v6440_v27 = vpop.eup %6439  ;;  %v5146_v4 = vmul.f32 %v6438_v16, %v6436_v1 }
 0x804   :  { %v5145_v34 = vmul.f32 %v6440_v27, %v8483_v63 }
 0x806   :  { %v5147_v7 = vadd.f32 %v5146_v4, %v5145_v34  ;;  %v6442_v5 = vpop.eup %6441 }
 0x808   :  { %6443 = vtanh.f32 %v5147_v7 }
 0x815   :  { %v6444_v8 = vpop.eup %6443 }
 0x816   :  { %v5149_v9 = vmul.f32 %v6444_v8, %v6442_v5 }
 0x818   :  { %v5153_v10 = vpack.c.bf16 %v5149_v9, %v5149_v9  ;;  %5803 = vst [vmem:[%s8541_s8 + $0x8] sm:$0xff] %v5149_v9 }
 0x81a   :  { %5154 = vst [vmem:[%s8540_s7] sm:$0xf] %v5153_v10 }

</bundles_post_ra>
